<compile_context>
chip_gen: v7x
topology: tpu7x:2x2x1
jax: 0.10.0
libtpu: 0.0.40
codegen_flags: <defaults>
</compile_context>

<pallas_src>
import functools

import jax
import jax.numpy as jnp
from jax.experimental import pallas as pl
from jax.experimental.pallas import tpu as pltpu

TM_MAX = 256                 # row tile over M = N*Ho*Wo
TK_MAX = 1024                # K tile; single block when K <= TK_MAX
VMEM_LIMIT = 64 * 1024 * 1024


def _round_up(x, m):
    return (x + m - 1) // m * m


def _row_tile(M):
    # Full-dim block for small M (always legal), TM_MAX otherwise.
    return M if M < TM_MAX else TM_MAX


def _k_tiling(K):
    if K <= TK_MAX:
        return K, K          # single full-dim K block, no padding
    return TK_MAX, _round_up(K, TK_MAX)


# --------------------------- Pallas kernels --------------------------------

def _conv_bias_act_kernel(x_ref, w_ref, b_ref, o_ref, acc_ref, *, act):
    """Fused im2col-matmul + bias + activation.  grid = (M tiles, K tiles)."""
    k = pl.program_id(1)
    nk = pl.num_programs(1)

    @pl.when(k == 0)
    def _():
        acc_ref[...] = jnp.zeros_like(acc_ref)

    acc_ref[...] += jnp.dot(x_ref[...], w_ref[...],
                            preferred_element_type=jnp.float32)

    @pl.when(k == nk - 1)
    def _():
        z = acc_ref[...] + b_ref[...]
        if act == "leaky":
            z = jnp.where(z >= 0.0, z, 0.2 * z)
        elif act == "sigmoid":
            # exact sigmoid via tanh (EUP slot), robust for large |z|
            z = 0.5 * (jnp.tanh(0.5 * z) + 1.0)
        o_ref[...] = z.astype(o_ref.dtype)


def _conv_stats_kernel(x_ref, w_ref, y_ref, sum_ref, sq_ref, acc_ref, *,
                       m_total, tm):
    """Fused im2col-matmul + per-channel sum / sum^2 accumulation (for BN)."""
    i = pl.program_id(0)
    k = pl.program_id(1)
    nk = pl.num_programs(1)

    @pl.when(jnp.logical_and(i == 0, k == 0))
    def _():
        sum_ref[...] = jnp.zeros_like(sum_ref)
        sq_ref[...] = jnp.zeros_like(sq_ref)

    @pl.when(k == 0)
    def _():
        acc_ref[...] = jnp.zeros_like(acc_ref)

    acc_ref[...] += jnp.dot(x_ref[...], w_ref[...],
                            preferred_element_type=jnp.float32)

    @pl.when(k == nk - 1)
    def _():
        y = acc_ref[...]
        y_ref[...] = y.astype(y_ref.dtype)
        if m_total % tm != 0:  # static: mask rows beyond the true M
            rows = i * tm + jax.lax.broadcasted_iota(jnp.int32, (tm, 1), 0)
            y = jnp.where(rows < m_total, y, 0.0)
        sum_ref[...] += jnp.sum(y, axis=0, keepdims=True)
        sq_ref[...] += jnp.sum(y * y, axis=0, keepdims=True)


def _affine_leaky_kernel(y_ref, s_ref, b_ref, o_ref):
    """Folded BatchNorm affine + LeakyReLU(0.2)."""
    z = y_ref[...].astype(jnp.float32) * s_ref[...] + b_ref[...]
    z = jnp.where(z >= 0.0, z, 0.2 * z)
    o_ref[...] = z.astype(o_ref.dtype)


# --------------------------- JAX glue (im2col, layers) ----------------------

def _im2col(x, kh, kw, stride, pad):
    """x: (N, H, W, C) -> (N*Ho*Wo, kh*kw*C) patches (same dtype as x)."""
    N, H, W, C = x.shape
    if pad > 0:
        x = jnp.pad(x, ((0, 0), (pad, pad), (pad, pad), (0, 0)))
    Hp, Wp = x.shape[1], x.shape[2]
    Ho = (Hp - kh) // stride + 1
    Wo = (Wp - kw) // stride + 1
    cols = []
    for di in range(kh):
        for dj in range(kw):
            cols.append(
                x[:, di:di + stride * Ho:stride, dj:dj + stride * Wo:stride, :])
    patches = jnp.concatenate(cols, axis=-1)          # (N, Ho, Wo, kh*kw*C)
    return patches.reshape(N * Ho * Wo, kh * kw * C), N, Ho, Wo


def _prep_matmul_inputs(x_nhwc, w, stride, pad):
    kh, kw, cin, cout = w.shape
    patches, N, Ho, Wo = _im2col(x_nhwc.astype(jnp.bfloat16), kh, kw, stride, pad)
    M, K = patches.shape
    tm = _row_tile(M)
    tk, Kp = _k_tiling(K)
    wmat = w.reshape(kh * kw * cin, cout).astype(jnp.bfloat16)
    if Kp != K:  # only for very large K (not hit at toy sizes)
        patches = jnp.pad(patches, ((0, 0), (0, Kp - K)))
        wmat = jnp.pad(wmat, ((0, Kp - K), (0, 0)))
    return patches, wmat, (N, Ho, Wo, M, cout, tm, tk, Kp)


def conv_bias_act(x_nhwc, w, b, stride, pad, act, out_dtype=jnp.bfloat16):
    """Conv2d + bias + activation in a single fused pallas_call."""
    patches, wmat, (N, Ho, Wo, M, cout, tm, tk, Kp) = _prep_matmul_inputs(
        x_nhwc, w, stride, pad)
    bias = b.astype(jnp.float32).reshape(1, cout)

    y = pl.pallas_call(
        functools.partial(_conv_bias_act_kernel, act=act),
        out_shape=jax.ShapeDtypeStruct((M, cout), out_dtype),
        grid_spec=pltpu.PrefetchScalarGridSpec(
            num_scalar_prefetch=0,
            grid=(pl.cdiv(M, tm), Kp // tk),
            in_specs=[pl.BlockSpec((tm, tk), lambda i, k: (i, k)),
                      pl.BlockSpec((tk, cout), lambda i, k: (k, 0)),
                      pl.BlockSpec((1, cout), lambda i, k: (0, 0))],
            out_specs=pl.BlockSpec((tm, cout), lambda i, k: (i, 0)),
            scratch_shapes=[pltpu.VMEM((tm, cout), jnp.float32)]),
        compiler_params=pltpu.CompilerParams(
            dimension_semantics=("parallel", "arbitrary"),
            vmem_limit_bytes=VMEM_LIMIT),
    )(patches, wmat, bias)
    return y.reshape(N, Ho, Wo, cout)


def conv_bn_leaky(x_nhwc, w, gamma, beta, stride, pad, eps=1e-5):
    """Conv2d (no bias) + BatchNorm2d (batch stats) + LeakyReLU(0.2)."""
    patches, wmat, (N, Ho, Wo, M, cout, tm, tk, Kp) = _prep_matmul_inputs(
        x_nhwc, w, stride, pad)

    y, ssum, ssq = pl.pallas_call(
        functools.partial(_conv_stats_kernel, m_total=M, tm=tm),
        out_shape=(jax.ShapeDtypeStruct((M, cout), jnp.bfloat16),
                   jax.ShapeDtypeStruct((1, cout), jnp.float32),
                   jax.ShapeDtypeStruct((1, cout), jnp.float32)),
        grid_spec=pltpu.PrefetchScalarGridSpec(
            num_scalar_prefetch=0,
            grid=(pl.cdiv(M, tm), Kp // tk),
            in_specs=[pl.BlockSpec((tm, tk), lambda i, k: (i, k)),
                      pl.BlockSpec((tk, cout), lambda i, k: (k, 0))],
            out_specs=(pl.BlockSpec((tm, cout), lambda i, k: (i, 0)),
                       pl.BlockSpec((1, cout), lambda i, k: (0, 0)),
                       pl.BlockSpec((1, cout), lambda i, k: (0, 0))),
            scratch_shapes=[pltpu.VMEM((tm, cout), jnp.float32)]),
        compiler_params=pltpu.CompilerParams(
            dimension_semantics=("arbitrary", "arbitrary"),
            vmem_limit_bytes=VMEM_LIMIT),
    )(patches, wmat)

    # BatchNorm2d: training-mode batch statistics, biased variance (tiny (C,) math)
    mean = ssum[0] / M
    var = jnp.maximum(ssq[0] / M - mean * mean, 0.0)
    scale = gamma.astype(jnp.float32) * jax.lax.rsqrt(var + eps)
    shift = beta.astype(jnp.float32) - mean * scale

    out = pl.pallas_call(
        _affine_leaky_kernel,
        out_shape=jax.ShapeDtypeStruct((M, cout), jnp.bfloat16),
        grid_spec=pltpu.PrefetchScalarGridSpec(
            num_scalar_prefetch=0,
            grid=(pl.cdiv(M, tm),),
            in_specs=[pl.BlockSpec((tm, cout), lambda i: (i, 0)),
                      pl.BlockSpec((1, cout), lambda i: (0, 0)),
                      pl.BlockSpec((1, cout), lambda i: (0, 0))],
            out_specs=pl.BlockSpec((tm, cout), lambda i: (i, 0))),
        compiler_params=pltpu.CompilerParams(
            dimension_semantics=("parallel",),
            vmem_limit_bytes=VMEM_LIMIT),
    )(y, scale.reshape(1, cout), shift.reshape(1, cout))
    return out.reshape(N, Ho, Wo, cout)


def init_params(key, channels_img, features_d):
    ks = jax.random.split(key, 6)
    fd = features_d

    def conv_w(k, kh, kw, cin, cout):
        bound = 1.0 / jnp.sqrt(float(kh * kw * cin))
        return jax.random.uniform(k, (kh, kw, cin, cout), jnp.float32,
                                  -bound, bound)

    return {
        "w1": conv_w(ks[0], 4, 4, channels_img, fd),
        "b1": jax.random.uniform(ks[5], (fd,), jnp.float32, -0.05, 0.05),
        "w2": conv_w(ks[1], 4, 4, fd, fd * 2),
        "g2": jnp.ones((fd * 2,), jnp.float32),
        "be2": jnp.zeros((fd * 2,), jnp.float32),
        "w3": conv_w(ks[2], 4, 4, fd * 2, fd * 4),
        "g3": jnp.ones((fd * 4,), jnp.float32),
        "be3": jnp.zeros((fd * 4,), jnp.float32),
        "w4": conv_w(ks[3], 4, 4, fd * 4, fd * 8),
        "g4": jnp.ones((fd * 8,), jnp.float32),
        "be4": jnp.zeros((fd * 8,), jnp.float32),
        "w5": conv_w(ks[4], 4, 4, fd * 8, 1),
        "b5": jnp.zeros((1,), jnp.float32),
    }


def discriminator_forward(params, x_nchw):
    # NCHW in / NCHW out (PyTorch convention); NHWC + bf16 internally.
    x = jnp.transpose(x_nchw, (0, 2, 3, 1)).astype(jnp.bfloat16)
    x = conv_bias_act(x, params["w1"], params["b1"], 2, 1, "leaky")
    x = conv_bn_leaky(x, params["w2"], params["g2"], params["be2"], 2, 1)
    x = conv_bn_leaky(x, params["w3"], params["g3"], params["be3"], 2, 1)
    x = conv_bn_leaky(x, params["w4"], params["g4"], params["be4"], 2, 1)
    x = conv_bias_act(x, params["w5"], params["b5"], 2, 0, "sigmoid",
                      out_dtype=jnp.float32)
    return jnp.transpose(x, (0, 3, 1, 2))  # (N, 1, 1, 1)


if __name__ == "__main__":
    key = jax.random.PRNGKey(0)
    k_x, k_p = jax.random.split(key)

    batch, channels_img, features_d = 2, 3, 8
    spatial = 64  # minimum spatial size consistent with the final 4x4 conv

    x = jax.random.normal(k_x, (batch, channels_img, spatial, spatial),
                          jnp.float32)
    params = init_params(k_p, channels_img, features_d)

    out = jax.jit(discriminator_forward)(params, x)
    out = jax.block_until_ready(out)

    assert out.shape == (batch, 1, 1, 1), out.shape
    assert bool(jnp.all(jnp.isfinite(out)))
    assert bool(jnp.all((out >= 0.0) & (out <= 1.0)))  # sigmoid output
    print("KERNEL_OK")
</pallas_src>

<mosaic_0001>
module attributes {stable_mosaic.version = 11 : i64} {
  func.func @_conv_bias_act_kernel(%arg0: i32, %arg1: i32, %arg2: memref<256x48xbf16, #tpu.memory_space<vmem>>, %arg3: memref<48x8xbf16, #tpu.memory_space<vmem>>, %arg4: memref<1x8xf32, #tpu.memory_space<vmem>>, %arg5: memref<256x8xbf16, #tpu.memory_space<vmem>>, %arg6: memref<256x8xf32, #tpu.memory_space<vmem>>) attributes {dimension_semantics = [#tpu.dimension_semantics<parallel>, #tpu.dimension_semantics<arbitrary>], iteration_bounds = array<i64: 8, 1>, scalar_prefetch = 0 : i64, scratch_operands = 1 : i64, tpu.core_type = #tpu.core_type<tc>, window_params = [{transform_indices = @transform_0, window_bounds = array<i64: 256, 48>}, {transform_indices = @transform_1, window_bounds = array<i64: 48, 8>}, {pipeline_mode = #tpu.pipeline_mode<synchronous>, transform_indices = @transform_2, window_bounds = array<i64: 1, 8>}, {transform_indices = @transform_3, window_bounds = array<i64: 256, 8>}]} {
    %c0_i32 = arith.constant 0 : i32
    %0 = arith.cmpi eq, %arg1, %c0_i32 : i32
    %1 = arith.extui %0 : i1 to i32
    %c0_i32_0 = arith.constant 0 : i32
    %2 = arith.cmpi ne, %1, %c0_i32_0 : i32
    scf.if %2 {
      %cst_10 = arith.constant 0.000000e+00 : f32
      %12 = vector.broadcast %cst_10 : f32 to vector<256x8xf32>
      %c0_11 = arith.constant 0 : index
      %c0_12 = arith.constant 0 : index
      %13 = vector.load %arg6[%c0_11, %c0_12] : memref<256x8xf32, #tpu.memory_space<vmem>>, vector<256x8xf32>
      tpu.vector_store %arg6[%c0_11, %c0_12], %12 {strides = array<i32>} : memref<256x8xf32, #tpu.memory_space<vmem>>, vector<256x8xf32>,
    } else {
    }
    %c0 = arith.constant 0 : index
    %c0_1 = arith.constant 0 : index
    %3 = vector.load %arg6[%c0, %c0_1] : memref<256x8xf32, #tpu.memory_space<vmem>>, vector<256x8xf32>
    %c0_2 = arith.constant 0 : index
    %c0_3 = arith.constant 0 : index
    %4 = vector.load %arg2[%c0_2, %c0_3] : memref<256x48xbf16, #tpu.memory_space<vmem>>, vector<256x48xbf16>
    %c0_4 = arith.constant 0 : index
    %c0_5 = arith.constant 0 : index
    %5 = vector.load %arg3[%c0_4, %c0_5] : memref<48x8xbf16, #tpu.memory_space<vmem>>, vector<48x8xbf16>
    %cst = arith.constant dense<0.000000e+00> : vector<256x8xf32>
    %6 = tpu.matmul %4, %5, %cst {dimension_numbers = #tpu.dot_dimension_numbers<[1], [0], [0], [1], [0, 0, 1, 1], [], []>} : vector<256x48xbf16>, vector<48x8xbf16>, vector<256x8xf32> -> vector<256x8xf32>
    %7 = arith.addf %3, %6 : vector<256x8xf32>
    %c0_6 = arith.constant 0 : index
    %c0_7 = arith.constant 0 : index
    %8 = vector.load %arg6[%c0_6, %c0_7] : memref<256x8xf32, #tpu.memory_space<vmem>>, vector<256x8xf32>
    tpu.vector_store %arg6[%c0_6, %c0_7], %7 {strides = array<i32>} : memref<256x8xf32, #tpu.memory_space<vmem>>, vector<256x8xf32>,
    %c0_i32_8 = arith.constant 0 : i32
    %9 = arith.cmpi eq, %arg1, %c0_i32_8 : i32
    %10 = arith.extui %9 : i1 to i32
    %c0_i32_9 = arith.constant 0 : i32
    %11 = arith.cmpi ne, %10, %c0_i32_9 : i32
    scf.if %11 {
      %c0_10 = arith.constant 0 : index
      %c0_11 = arith.constant 0 : index
      %12 = vector.load %arg6[%c0_10, %c0_11] : memref<256x8xf32, #tpu.memory_space<vmem>>, vector<256x8xf32>
      %c0_12 = arith.constant 0 : index
      %c0_13 = arith.constant 0 : index
      %13 = vector.load %arg4[%c0_12, %c0_13] : memref<1x8xf32, #tpu.memory_space<vmem>>, vector<1x8xf32>
      %14 = vector.broadcast %13 : vector<1x8xf32> to vector<256x8xf32>
      %15 = arith.addf %12, %14 : vector<256x8xf32>
      %cst_14 = arith.constant 0.000000e+00 : f32
      %16 = vector.broadcast %cst_14 : f32 to vector<256x8xf32>
      %17 = arith.cmpf oge, %15, %16 : vector<256x8xf32>
      %cst_15 = arith.constant 2.000000e-01 : f32
      %18 = vector.broadcast %cst_15 : f32 to vector<256x8xf32>
      %19 = arith.mulf %18, %15 : vector<256x8xf32>
      %20 = arith.select %17, %15, %19 : vector<256x8xi1>, vector<256x8xf32>
      %21 = arith.truncf %20 : vector<256x8xf32> to vector<256x8xbf16>
      %c0_16 = arith.constant 0 : index
      %c0_17 = arith.constant 0 : index
      %22 = vector.load %arg5[%c0_16, %c0_17] : memref<256x8xbf16, #tpu.memory_space<vmem>>, vector<256x8xbf16>
      tpu.vector_store %arg5[%c0_16, %c0_17], %21 {strides = array<i32>} : memref<256x8xbf16, #tpu.memory_space<vmem>>, vector<256x8xbf16>,
    } else {
    }
    return
  }
  func.func @transform_0(%arg0: i32, %arg1: i32) -> (i32, i32) {
    %c0_i32 = arith.constant 0 : i32
    return %arg0, %arg1 : i32, i32
  }
  func.func @transform_1(%arg0: i32, %arg1: i32) -> (i32, i32) {
    %c0_i32 = arith.constant 0 : i32
    %c0_i32_0 = arith.constant 0 : i32
    return %arg1, %c0_i32 : i32, i32
  }
  func.func @transform_2(%arg0: i32, %arg1: i32) -> (i32, i32) {
    %c0_i32 = arith.constant 0 : i32
    %c0_i32_0 = arith.constant 0 : i32
    %c0_i32_1 = arith.constant 0 : i32
    return %c0_i32, %c0_i32_0 : i32, i32
  }
  func.func @transform_3(%arg0: i32, %arg1: i32) -> (i32, i32) {
    %c0_i32 = arith.constant 0 : i32
    %c0_i32_0 = arith.constant 0 : i32
    return %arg0, %c0_i32 : i32, i32
  }
}

module attributes {stable_mosaic.version = 11 : i64} {
  func.func @_conv_stats_kernel(%arg0: i32, %arg1: i32, %arg2: memref<256x128xbf16, #tpu.memory_space<vmem>>, %arg3: memref<128x16xbf16, #tpu.memory_space<vmem>>, %arg4: memref<256x16xbf16, #tpu.memory_space<vmem>>, %arg5: memref<1x16xf32, #tpu.memory_space<vmem>>, %arg6: memref<1x16xf32, #tpu.memory_space<vmem>>, %arg7: memref<256x16xf32, #tpu.memory_space<vmem>>) attributes {dimension_semantics = [#tpu.dimension_semantics<arbitrary>, #tpu.dimension_semantics<arbitrary>], iteration_bounds = array<i64: 2, 1>, scalar_prefetch = 0 : i64, scratch_operands = 1 : i64, tpu.core_type = #tpu.core_type<tc>, window_params = [{transform_indices = @transform_0, window_bounds = array<i64: 256, 128>}, {transform_indices = @transform_1, window_bounds = array<i64: 128, 16>}, {transform_indices = @transform_2, window_bounds = array<i64: 256, 16>}, {pipeline_mode = #tpu.pipeline_mode<synchronous>, transform_indices = @transform_3, window_bounds = array<i64: 1, 16>}, {pipeline_mode = #tpu.pipeline_mode<synchronous>, transform_indices = @transform_4, window_bounds = array<i64: 1, 16>}]} {
    %c0_i32 = arith.constant 0 : i32
    %0 = arith.cmpi eq, %arg0, %c0_i32 : i32
    %c0_i32_0 = arith.constant 0 : i32
    %1 = arith.cmpi eq, %arg1, %c0_i32_0 : i32
    %2 = arith.andi %0, %1 : i1
    %3 = arith.extui %2 : i1 to i32
    %c0_i32_1 = arith.constant 0 : i32
    %4 = arith.cmpi ne, %3, %c0_i32_1 : i32
    scf.if %4 {
      %cst_13 = arith.constant 0.000000e+00 : f32
      %17 = vector.broadcast %cst_13 : f32 to vector<1x16xf32>
      %c0_14 = arith.constant 0 : index
      %c0_15 = arith.constant 0 : index
      %18 = vector.load %arg5[%c0_14, %c0_15] : memref<1x16xf32, #tpu.memory_space<vmem>>, vector<1x16xf32>
      tpu.vector_store %arg5[%c0_14, %c0_15], %17 {strides = array<i32>} : memref<1x16xf32, #tpu.memory_space<vmem>>, vector<1x16xf32>,
      %cst_16 = arith.constant 0.000000e+00 : f32
      %19 = vector.broadcast %cst_16 : f32 to vector<1x16xf32>
      %c0_17 = arith.constant 0 : index
      %c0_18 = arith.constant 0 : index
      %20 = vector.load %arg6[%c0_17, %c0_18] : memref<1x16xf32, #tpu.memory_space<vmem>>, vector<1x16xf32>
      tpu.vector_store %arg6[%c0_17, %c0_18], %19 {strides = array<i32>} : memref<1x16xf32, #tpu.memory_space<vmem>>, vector<1x16xf32>,
    } else {
    }
    %c0_i32_2 = arith.constant 0 : i32
    %5 = arith.cmpi eq, %arg1, %c0_i32_2 : i32
    %6 = arith.extui %5 : i1 to i32
    %c0_i32_3 = arith.constant 0 : i32
    %7 = arith.cmpi ne, %6, %c0_i32_3 : i32
    scf.if %7 {
      %cst_13 = arith.constant 0.000000e+00 : f32
      %17 = vector.broadcast %cst_13 : f32 to vector<256x16xf32>
      %c0_14 = arith.constant 0 : index
      %c0_15 = arith.constant 0 : index
      %18 = vector.load %arg7[%c0_14, %c0_15] : memref<256x16xf32, #tpu.memory_space<vmem>>, vector<256x16xf32>
      tpu.vector_store %arg7[%c0_14, %c0_15], %17 {strides = array<i32>} : memref<256x16xf32, #tpu.memory_space<vmem>>, vector<256x16xf32>,
    } else {
    }
    %c0 = arith.constant 0 : index
    %c0_4 = arith.constant 0 : index
    %8 = vector.load %arg7[%c0, %c0_4] : memref<256x16xf32, #tpu.memory_space<vmem>>, vector<256x16xf32>
    %c0_5 = arith.constant 0 : index
    %c0_6 = arith.constant 0 : index
    %9 = vector.load %arg2[%c0_5, %c0_6] : memref<256x128xbf16, #tpu.memory_space<vmem>>, vector<256x128xbf16>
    %c0_7 = arith.constant 0 : index
    %c0_8 = arith.constant 0 : index
    %10 = vector.load %arg3[%c0_7, %c0_8] : memref<128x16xbf16, #tpu.memory_space<vmem>>, vector<128x16xbf16>
    %cst = arith.constant dense<0.000000e+00> : vector<256x16xf32>
    %11 = tpu.matmul %9, %10, %cst {dimension_numbers = #tpu.dot_dimension_numbers<[1], [0], [0], [1], [0, 0, 1, 1], [], []>} : vector<256x128xbf16>, vector<128x16xbf16>, vector<256x16xf32> -> vector<256x16xf32>
    %12 = arith.addf %8, %11 : vector<256x16xf32>
    %c0_9 = arith.constant 0 : index
    %c0_10 = arith.constant 0 : index
    %13 = vector.load %arg7[%c0_9, %c0_10] : memref<256x16xf32, #tpu.memory_space<vmem>>, vector<256x16xf32>
    tpu.vector_store %arg7[%c0_9, %c0_10], %12 {strides = array<i32>} : memref<256x16xf32, #tpu.memory_space<vmem>>, vector<256x16xf32>,
    %c0_i32_11 = arith.constant 0 : i32
    %14 = arith.cmpi eq, %arg1, %c0_i32_11 : i32
    %15 = arith.extui %14 : i1 to i32
    %c0_i32_12 = arith.constant 0 : i32
    %16 = arith.cmpi ne, %15, %c0_i32_12 : i32
    scf.if %16 {
      %c0_13 = arith.constant 0 : index
      %c0_14 = arith.constant 0 : index
      %17 = vector.load %arg7[%c0_13, %c0_14] : memref<256x16xf32, #tpu.memory_space<vmem>>, vector<256x16xf32>
      %18 = arith.truncf %17 : vector<256x16xf32> to vector<256x16xbf16>
      %c0_15 = arith.constant 0 : index
      %c0_16 = arith.constant 0 : index
      %19 = vector.load %arg4[%c0_15, %c0_16] : memref<256x16xbf16, #tpu.memory_space<vmem>>, vector<256x16xbf16>
      tpu.vector_store %arg4[%c0_15, %c0_16], %18 {strides = array<i32>} : memref<256x16xbf16, #tpu.memory_space<vmem>>, vector<256x16xbf16>,
      %c0_17 = arith.constant 0 : index
      %c0_18 = arith.constant 0 : index
      %20 = vector.load %arg5[%c0_17, %c0_18] : memref<1x16xf32, #tpu.memory_space<vmem>>, vector<1x16xf32>
      %cst_19 = arith.constant dense<0.000000e+00> : vector<16xf32>
      %21 = vector.multi_reduction <add>, %17, %cst_19 [0] : vector<256x16xf32> to vector<16xf32>
      %22 = vector.shape_cast %21 : vector<16xf32> to vector<1x16xf32>
      %23 = arith.addf %20, %22 : vector<1x16xf32>
      %c0_20 = arith.constant 0 : index
      %c0_21 = arith.constant 0 : index
      %24 = vector.load %arg5[%c0_20, %c0_21] : memref<1x16xf32, #tpu.memory_space<vmem>>, vector<1x16xf32>
      tpu.vector_store %arg5[%c0_20, %c0_21], %23 {strides = array<i32>} : memref<1x16xf32, #tpu.memory_space<vmem>>, vector<1x16xf32>,
      %c0_22 = arith.constant 0 : index
      %c0_23 = arith.constant 0 : index
      %25 = vector.load %arg6[%c0_22, %c0_23] : memref<1x16xf32, #tpu.memory_space<vmem>>, vector<1x16xf32>
      %26 = arith.mulf %17, %17 : vector<256x16xf32>
      %cst_24 = arith.constant dense<0.000000e+00> : vector<16xf32>
      %27 = vector.multi_reduction <add>, %26, %cst_24 [0] : vector<256x16xf32> to vector<16xf32>
      %28 = vector.shape_cast %27 : vector<16xf32> to vector<1x16xf32>
      %29 = arith.addf %25, %28 : vector<1x16xf32>
      %c0_25 = arith.constant 0 : index
      %c0_26 = arith.constant 0 : index
      %30 = vector.load %arg6[%c0_25, %c0_26] : memref<1x16xf32, #tpu.memory_space<vmem>>, vector<1x16xf32>
      tpu.vector_store %arg6[%c0_25, %c0_26], %29 {strides = array<i32>} : memref<1x16xf32, #tpu.memory_space<vmem>>, vector<1x16xf32>,
    } else {
    }
    return
  }
  func.func @transform_0(%arg0: i32, %arg1: i32) -> (i32, i32) {
    %c0_i32 = arith.constant 0 : i32
    return %arg0, %arg1 : i32, i32
  }
  func.func @transform_1(%arg0: i32, %arg1: i32) -> (i32, i32) {
    %c0_i32 = arith.constant 0 : i32
    %c0_i32_0 = arith.constant 0 : i32
    return %arg1, %c0_i32 : i32, i32
  }
  func.func @transform_2(%arg0: i32, %arg1: i32) -> (i32, i32) {
    %c0_i32 = arith.constant 0 : i32
    %c0_i32_0 = arith.constant 0 : i32
    return %arg0, %c0_i32 : i32, i32
  }
  func.func @transform_3(%arg0: i32, %arg1: i32) -> (i32, i32) {
    %c0_i32 = arith.constant 0 : i32
    %c0_i32_0 = arith.constant 0 : i32
    %c0_i32_1 = arith.constant 0 : i32
    return %c0_i32, %c0_i32_0 : i32, i32
  }
  func.func @transform_4(%arg0: i32, %arg1: i32) -> (i32, i32) {
    %c0_i32 = arith.constant 0 : i32
    %c0_i32_0 = arith.constant 0 : i32
    %c0_i32_1 = arith.constant 0 : i32
    return %c0_i32, %c0_i32_0 : i32, i32
  }
}

module attributes {stable_mosaic.version = 11 : i64} {
  func.func @_affine_leaky_kernel(%arg0: i32, %arg1: memref<256x16xbf16, #tpu.memory_space<vmem>>, %arg2: memref<1x16xf32, #tpu.memory_space<vmem>>, %arg3: memref<1x16xf32, #tpu.memory_space<vmem>>, %arg4: memref<256x16xbf16, #tpu.memory_space<vmem>>) attributes {dimension_semantics = [#tpu.dimension_semantics<parallel>], iteration_bounds = array<i64: 2>, scalar_prefetch = 0 : i64, scratch_operands = 0 : i64, tpu.core_type = #tpu.core_type<tc>, window_params = [{transform_indices = @transform_0, window_bounds = array<i64: 256, 16>}, {pipeline_mode = #tpu.pipeline_mode<synchronous>, transform_indices = @transform_1, window_bounds = array<i64: 1, 16>}, {pipeline_mode = #tpu.pipeline_mode<synchronous>, transform_indices = @transform_2, window_bounds = array<i64: 1, 16>}, {transform_indices = @transform_3, window_bounds = array<i64: 256, 16>}]} {
    %c0 = arith.constant 0 : index
    %c0_0 = arith.constant 0 : index
    %0 = vector.load %arg1[%c0, %c0_0] : memref<256x16xbf16, #tpu.memory_space<vmem>>, vector<256x16xbf16>
    %1 = arith.extf %0 : vector<256x16xbf16> to vector<256x16xf32>
    %c0_1 = arith.constant 0 : index
    %c0_2 = arith.constant 0 : index
    %2 = vector.load %arg2[%c0_1, %c0_2] : memref<1x16xf32, #tpu.memory_space<vmem>>, vector<1x16xf32>
    %3 = vector.broadcast %2 : vector<1x16xf32> to vector<256x16xf32>
    %4 = arith.mulf %1, %3 : vector<256x16xf32>
    %c0_3 = arith.constant 0 : index
    %c0_4 = arith.constant 0 : index
    %5 = vector.load %arg3[%c0_3, %c0_4] : memref<1x16xf32, #tpu.memory_space<vmem>>, vector<1x16xf32>
    %6 = vector.broadcast %5 : vector<1x16xf32> to vector<256x16xf32>
    %7 = arith.addf %4, %6 : vector<256x16xf32>
    %cst = arith.constant 0.000000e+00 : f32
    %8 = vector.broadcast %cst : f32 to vector<256x16xf32>
    %9 = arith.cmpf oge, %7, %8 : vector<256x16xf32>
    %cst_5 = arith.constant 2.000000e-01 : f32
    %10 = vector.broadcast %cst_5 : f32 to vector<256x16xf32>
    %11 = arith.mulf %10, %7 : vector<256x16xf32>
    %12 = arith.select %9, %7, %11 : vector<256x16xi1>, vector<256x16xf32>
    %13 = arith.truncf %12 : vector<256x16xf32> to vector<256x16xbf16>
    %c0_6 = arith.constant 0 : index
    %c0_7 = arith.constant 0 : index
    %14 = vector.load %arg4[%c0_6, %c0_7] : memref<256x16xbf16, #tpu.memory_space<vmem>>, vector<256x16xbf16>
    tpu.vector_store %arg4[%c0_6, %c0_7], %13 {strides = array<i32>} : memref<256x16xbf16, #tpu.memory_space<vmem>>, vector<256x16xbf16>,
    return
  }
  func.func @transform_0(%arg0: i32) -> (i32, i32) {
    %c0_i32 = arith.constant 0 : i32
    %c0_i32_0 = arith.constant 0 : i32
    return %arg0, %c0_i32 : i32, i32
  }
  func.func @transform_1(%arg0: i32) -> (i32, i32) {
    %c0_i32 = arith.constant 0 : i32
    %c0_i32_0 = arith.constant 0 : i32
    %c0_i32_1 = arith.constant 0 : i32
    return %c0_i32, %c0_i32_0 : i32, i32
  }
  func.func @transform_2(%arg0: i32) -> (i32, i32) {
    %c0_i32 = arith.constant 0 : i32
    %c0_i32_0 = arith.constant 0 : i32
    %c0_i32_1 = arith.constant 0 : i32
    return %c0_i32, %c0_i32_0 : i32, i32
  }
  func.func @transform_3(%arg0: i32) -> (i32, i32) {
    %c0_i32 = arith.constant 0 : i32
    %c0_i32_0 = arith.constant 0 : i32
    return %arg0, %c0_i32 : i32, i32
  }
}

module attributes {stable_mosaic.version = 11 : i64} {
  func.func @_conv_stats_kernel(%arg0: i32, %arg1: i32, %arg2: memref<128x256xbf16, #tpu.memory_space<vmem>>, %arg3: memref<256x32xbf16, #tpu.memory_space<vmem>>, %arg4: memref<128x32xbf16, #tpu.memory_space<vmem>>, %arg5: memref<1x32xf32, #tpu.memory_space<vmem>>, %arg6: memref<1x32xf32, #tpu.memory_space<vmem>>, %arg7: memref<128x32xf32, #tpu.memory_space<vmem>>) attributes {dimension_semantics = [#tpu.dimension_semantics<arbitrary>, #tpu.dimension_semantics<arbitrary>], iteration_bounds = array<i64: 1, 1>, scalar_prefetch = 0 : i64, scratch_operands = 1 : i64, tpu.core_type = #tpu.core_type<tc>, window_params = [{transform_indices = @transform_0, window_bounds = array<i64: 128, 256>}, {transform_indices = @transform_1, window_bounds = array<i64: 256, 32>}, {transform_indices = @transform_2, window_bounds = array<i64: 128, 32>}, {pipeline_mode = #tpu.pipeline_mode<synchronous>, transform_indices = @transform_3, window_bounds = array<i64: 1, 32>}, {pipeline_mode = #tpu.pipeline_mode<synchronous>, transform_indices = @transform_4, window_bounds = array<i64: 1, 32>}]} {
    %c0_i32 = arith.constant 0 : i32
    %0 = arith.cmpi eq, %arg0, %c0_i32 : i32
    %c0_i32_0 = arith.constant 0 : i32
    %1 = arith.cmpi eq, %arg1, %c0_i32_0 : i32
    %2 = arith.andi %0, %1 : i1
    %3 = arith.extui %2 : i1 to i32
    %c0_i32_1 = arith.constant 0 : i32
    %4 = arith.cmpi ne, %3, %c0_i32_1 : i32
    scf.if %4 {
      %cst_13 = arith.constant 0.000000e+00 : f32
      %17 = vector.broadcast %cst_13 : f32 to vector<1x32xf32>
      %c0_14 = arith.constant 0 : index
      %c0_15 = arith.constant 0 : index
      %18 = vector.load %arg5[%c0_14, %c0_15] : memref<1x32xf32, #tpu.memory_space<vmem>>, vector<1x32xf32>
      tpu.vector_store %arg5[%c0_14, %c0_15], %17 {strides = array<i32>} : memref<1x32xf32, #tpu.memory_space<vmem>>, vector<1x32xf32>,
      %cst_16 = arith.constant 0.000000e+00 : f32
      %19 = vector.broadcast %cst_16 : f32 to vector<1x32xf32>
      %c0_17 = arith.constant 0 : index
      %c0_18 = arith.constant 0 : index
      %20 = vector.load %arg6[%c0_17, %c0_18] : memref<1x32xf32, #tpu.memory_space<vmem>>, vector<1x32xf32>
      tpu.vector_store %arg6[%c0_17, %c0_18], %19 {strides = array<i32>} : memref<1x32xf32, #tpu.memory_space<vmem>>, vector<1x32xf32>,
    } else {
    }
    %c0_i32_2 = arith.constant 0 : i32
    %5 = arith.cmpi eq, %arg1, %c0_i32_2 : i32
    %6 = arith.extui %5 : i1 to i32
    %c0_i32_3 = arith.constant 0 : i32
    %7 = arith.cmpi ne, %6, %c0_i32_3 : i32
    scf.if %7 {
      %cst_13 = arith.constant 0.000000e+00 : f32
      %17 = vector.broadcast %cst_13 : f32 to vector<128x32xf32>
      %c0_14 = arith.constant 0 : index
      %c0_15 = arith.constant 0 : index
      %18 = vector.load %arg7[%c0_14, %c0_15] : memref<128x32xf32, #tpu.memory_space<vmem>>, vector<128x32xf32>
      tpu.vector_store %arg7[%c0_14, %c0_15], %17 {strides = array<i32>} : memref<128x32xf32, #tpu.memory_space<vmem>>, vector<128x32xf32>,
    } else {
    }
    %c0 = arith.constant 0 : index
    %c0_4 = arith.constant 0 : index
    %8 = vector.load %arg7[%c0, %c0_4] : memref<128x32xf32, #tpu.memory_space<vmem>>, vector<128x32xf32>
    %c0_5 = arith.constant 0 : index
    %c0_6 = arith.constant 0 : index
    %9 = vector.load %arg2[%c0_5, %c0_6] : memref<128x256xbf16, #tpu.memory_space<vmem>>, vector<128x256xbf16>
    %c0_7 = arith.constant 0 : index
    %c0_8 = arith.constant 0 : index
    %10 = vector.load %arg3[%c0_7, %c0_8] : memref<256x32xbf16, #tpu.memory_space<vmem>>, vector<256x32xbf16>
    %cst = arith.constant dense<0.000000e+00> : vector<128x32xf32>
    %11 = tpu.matmul %9, %10, %cst {dimension_numbers = #tpu.dot_dimension_numbers<[1], [0], [0], [1], [0, 0, 1, 1], [], []>} : vector<128x256xbf16>, vector<256x32xbf16>, vector<128x32xf32> -> vector<128x32xf32>
    %12 = arith.addf %8, %11 : vector<128x32xf32>
    %c0_9 = arith.constant 0 : index
    %c0_10 = arith.constant 0 : index
    %13 = vector.load %arg7[%c0_9, %c0_10] : memref<128x32xf32, #tpu.memory_space<vmem>>, vector<128x32xf32>
    tpu.vector_store %arg7[%c0_9, %c0_10], %12 {strides = array<i32>} : memref<128x32xf32, #tpu.memory_space<vmem>>, vector<128x32xf32>,
    %c0_i32_11 = arith.constant 0 : i32
    %14 = arith.cmpi eq, %arg1, %c0_i32_11 : i32
    %15 = arith.extui %14 : i1 to i32
    %c0_i32_12 = arith.constant 0 : i32
    %16 = arith.cmpi ne, %15, %c0_i32_12 : i32
    scf.if %16 {
      %c0_13 = arith.constant 0 : index
      %c0_14 = arith.constant 0 : index
      %17 = vector.load %arg7[%c0_13, %c0_14] : memref<128x32xf32, #tpu.memory_space<vmem>>, vector<128x32xf32>
      %18 = arith.truncf %17 : vector<128x32xf32> to vector<128x32xbf16>
      %c0_15 = arith.constant 0 : index
      %c0_16 = arith.constant 0 : index
      %19 = vector.load %arg4[%c0_15, %c0_16] : memref<128x32xbf16, #tpu.memory_space<vmem>>, vector<128x32xbf16>
      tpu.vector_store %arg4[%c0_15, %c0_16], %18 {strides = array<i32>} : memref<128x32xbf16, #tpu.memory_space<vmem>>, vector<128x32xbf16>,
      %c0_17 = arith.constant 0 : index
      %c0_18 = arith.constant 0 : index
      %20 = vector.load %arg5[%c0_17, %c0_18] : memref<1x32xf32, #tpu.memory_space<vmem>>, vector<1x32xf32>
      %cst_19 = arith.constant dense<0.000000e+00> : vector<32xf32>
      %21 = vector.multi_reduction <add>, %17, %cst_19 [0] : vector<128x32xf32> to vector<32xf32>
      %22 = vector.shape_cast %21 : vector<32xf32> to vector<1x32xf32>
      %23 = arith.addf %20, %22 : vector<1x32xf32>
      %c0_20 = arith.constant 0 : index
      %c0_21 = arith.constant 0 : index
      %24 = vector.load %arg5[%c0_20, %c0_21] : memref<1x32xf32, #tpu.memory_space<vmem>>, vector<1x32xf32>
      tpu.vector_store %arg5[%c0_20, %c0_21], %23 {strides = array<i32>} : memref<1x32xf32, #tpu.memory_space<vmem>>, vector<1x32xf32>,
      %c0_22 = arith.constant 0 : index
      %c0_23 = arith.constant 0 : index
      %25 = vector.load %arg6[%c0_22, %c0_23] : memref<1x32xf32, #tpu.memory_space<vmem>>, vector<1x32xf32>
      %26 = arith.mulf %17, %17 : vector<128x32xf32>
      %cst_24 = arith.constant dense<0.000000e+00> : vector<32xf32>
      %27 = vector.multi_reduction <add>, %26, %cst_24 [0] : vector<128x32xf32> to vector<32xf32>
      %28 = vector.shape_cast %27 : vector<32xf32> to vector<1x32xf32>
      %29 = arith.addf %25, %28 : vector<1x32xf32>
      %c0_25 = arith.constant 0 : index
      %c0_26 = arith.constant 0 : index
      %30 = vector.load %arg6[%c0_25, %c0_26] : memref<1x32xf32, #tpu.memory_space<vmem>>, vector<1x32xf32>
      tpu.vector_store %arg6[%c0_25, %c0_26], %29 {strides = array<i32>} : memref<1x32xf32, #tpu.memory_space<vmem>>, vector<1x32xf32>,
    } else {
    }
    return
  }
  func.func @transform_0(%arg0: i32, %arg1: i32) -> (i32, i32) {
    %c0_i32 = arith.constant 0 : i32
    return %arg0, %arg1 : i32, i32
  }
  func.func @transform_1(%arg0: i32, %arg1: i32) -> (i32, i32) {
    %c0_i32 = arith.constant 0 : i32
    %c0_i32_0 = arith.constant 0 : i32
    return %arg1, %c0_i32 : i32, i32
  }
  func.func @transform_2(%arg0: i32, %arg1: i32) -> (i32, i32) {
    %c0_i32 = arith.constant 0 : i32
    %c0_i32_0 = arith.constant 0 : i32
    return %arg0, %c0_i32 : i32, i32
  }
  func.func @transform_3(%arg0: i32, %arg1: i32) -> (i32, i32) {
    %c0_i32 = arith.constant 0 : i32
    %c0_i32_0 = arith.constant 0 : i32
    %c0_i32_1 = arith.constant 0 : i32
    return %c0_i32, %c0_i32_0 : i32, i32
  }
  func.func @transform_4(%arg0: i32, %arg1: i32) -> (i32, i32) {
    %c0_i32 = arith.constant 0 : i32
    %c0_i32_0 = arith.constant 0 : i32
    %c0_i32_1 = arith.constant 0 : i32
    return %c0_i32, %c0_i32_0 : i32, i32
  }
}

module attributes {stable_mosaic.version = 11 : i64} {
  func.func @_affine_leaky_kernel(%arg0: i32, %arg1: memref<128x32xbf16, #tpu.memory_space<vmem>>, %arg2: memref<1x32xf32, #tpu.memory_space<vmem>>, %arg3: memref<1x32xf32, #tpu.memory_space<vmem>>, %arg4: memref<128x32xbf16, #tpu.memory_space<vmem>>) attributes {dimension_semantics = [#tpu.dimension_semantics<parallel>], iteration_bounds = array<i64: 1>, scalar_prefetch = 0 : i64, scratch_operands = 0 : i64, tpu.core_type = #tpu.core_type<tc>, window_params = [{transform_indices = @transform_0, window_bounds = array<i64: 128, 32>}, {pipeline_mode = #tpu.pipeline_mode<synchronous>, transform_indices = @transform_1, window_bounds = array<i64: 1, 32>}, {pipeline_mode = #tpu.pipeline_mode<synchronous>, transform_indices = @transform_2, window_bounds = array<i64: 1, 32>}, {transform_indices = @transform_3, window_bounds = array<i64: 128, 32>}]} {
    %c0 = arith.constant 0 : index
    %c0_0 = arith.constant 0 : index
    %0 = vector.load %arg1[%c0, %c0_0] : memref<128x32xbf16, #tpu.memory_space<vmem>>, vector<128x32xbf16>
    %1 = arith.extf %0 : vector<128x32xbf16> to vector<128x32xf32>
    %c0_1 = arith.constant 0 : index
    %c0_2 = arith.constant 0 : index
    %2 = vector.load %arg2[%c0_1, %c0_2] : memref<1x32xf32, #tpu.memory_space<vmem>>, vector<1x32xf32>
    %3 = vector.broadcast %2 : vector<1x32xf32> to vector<128x32xf32>
    %4 = arith.mulf %1, %3 : vector<128x32xf32>
    %c0_3 = arith.constant 0 : index
    %c0_4 = arith.constant 0 : index
    %5 = vector.load %arg3[%c0_3, %c0_4] : memref<1x32xf32, #tpu.memory_space<vmem>>, vector<1x32xf32>
    %6 = vector.broadcast %5 : vector<1x32xf32> to vector<128x32xf32>
    %7 = arith.addf %4, %6 : vector<128x32xf32>
    %cst = arith.constant 0.000000e+00 : f32
    %8 = vector.broadcast %cst : f32 to vector<128x32xf32>
    %9 = arith.cmpf oge, %7, %8 : vector<128x32xf32>
    %cst_5 = arith.constant 2.000000e-01 : f32
    %10 = vector.broadcast %cst_5 : f32 to vector<128x32xf32>
    %11 = arith.mulf %10, %7 : vector<128x32xf32>
    %12 = arith.select %9, %7, %11 : vector<128x32xi1>, vector<128x32xf32>
    %13 = arith.truncf %12 : vector<128x32xf32> to vector<128x32xbf16>
    %c0_6 = arith.constant 0 : index
    %c0_7 = arith.constant 0 : index
    %14 = vector.load %arg4[%c0_6, %c0_7] : memref<128x32xbf16, #tpu.memory_space<vmem>>, vector<128x32xbf16>
    tpu.vector_store %arg4[%c0_6, %c0_7], %13 {strides = array<i32>} : memref<128x32xbf16, #tpu.memory_space<vmem>>, vector<128x32xbf16>,
    return
  }
  func.func @transform_0(%arg0: i32) -> (i32, i32) {
    %c0_i32 = arith.constant 0 : i32
    %c0_i32_0 = arith.constant 0 : i32
    return %arg0, %c0_i32 : i32, i32
  }
  func.func @transform_1(%arg0: i32) -> (i32, i32) {
    %c0_i32 = arith.constant 0 : i32
    %c0_i32_0 = arith.constant 0 : i32
    %c0_i32_1 = arith.constant 0 : i32
    return %c0_i32, %c0_i32_0 : i32, i32
  }
  func.func @transform_2(%arg0: i32) -> (i32, i32) {
    %c0_i32 = arith.constant 0 : i32
    %c0_i32_0 = arith.constant 0 : i32
    %c0_i32_1 = arith.constant 0 : i32
    return %c0_i32, %c0_i32_0 : i32, i32
  }
  func.func @transform_3(%arg0: i32) -> (i32, i32) {
    %c0_i32 = arith.constant 0 : i32
    %c0_i32_0 = arith.constant 0 : i32
    return %arg0, %c0_i32 : i32, i32
  }
}

module attributes {stable_mosaic.version = 11 : i64} {
  func.func @_conv_stats_kernel(%arg0: i32, %arg1: i32, %arg2: memref<32x512xbf16, #tpu.memory_space<vmem>>, %arg3: memref<512x64xbf16, #tpu.memory_space<vmem>>, %arg4: memref<32x64xbf16, #tpu.memory_space<vmem>>, %arg5: memref<1x64xf32, #tpu.memory_space<vmem>>, %arg6: memref<1x64xf32, #tpu.memory_space<vmem>>, %arg7: memref<32x64xf32, #tpu.memory_space<vmem>>) attributes {dimension_semantics = [#tpu.dimension_semantics<arbitrary>, #tpu.dimension_semantics<arbitrary>], iteration_bounds = array<i64: 1, 1>, scalar_prefetch = 0 : i64, scratch_operands = 1 : i64, tpu.core_type = #tpu.core_type<tc>, window_params = [{transform_indices = @transform_0, window_bounds = array<i64: 32, 512>}, {transform_indices = @transform_1, window_bounds = array<i64: 512, 64>}, {transform_indices = @transform_2, window_bounds = array<i64: 32, 64>}, {pipeline_mode = #tpu.pipeline_mode<synchronous>, transform_indices = @transform_3, window_bounds = array<i64: 1, 64>}, {pipeline_mode = #tpu.pipeline_mode<synchronous>, transform_indices = @transform_4, window_bounds = array<i64: 1, 64>}]} {
    %c0_i32 = arith.constant 0 : i32
    %0 = arith.cmpi eq, %arg0, %c0_i32 : i32
    %c0_i32_0 = arith.constant 0 : i32
    %1 = arith.cmpi eq, %arg1, %c0_i32_0 : i32
    %2 = arith.andi %0, %1 : i1
    %3 = arith.extui %2 : i1 to i32
    %c0_i32_1 = arith.constant 0 : i32
    %4 = arith.cmpi ne, %3, %c0_i32_1 : i32
    scf.if %4 {
      %cst_13 = arith.constant 0.000000e+00 : f32
      %17 = vector.broadcast %cst_13 : f32 to vector<1x64xf32>
      %c0_14 = arith.constant 0 : index
      %c0_15 = arith.constant 0 : index
      %18 = vector.load %arg5[%c0_14, %c0_15] : memref<1x64xf32, #tpu.memory_space<vmem>>, vector<1x64xf32>
      tpu.vector_store %arg5[%c0_14, %c0_15], %17 {strides = array<i32>} : memref<1x64xf32, #tpu.memory_space<vmem>>, vector<1x64xf32>,
      %cst_16 = arith.constant 0.000000e+00 : f32
      %19 = vector.broadcast %cst_16 : f32 to vector<1x64xf32>
      %c0_17 = arith.constant 0 : index
      %c0_18 = arith.constant 0 : index
      %20 = vector.load %arg6[%c0_17, %c0_18] : memref<1x64xf32, #tpu.memory_space<vmem>>, vector<1x64xf32>
      tpu.vector_store %arg6[%c0_17, %c0_18], %19 {strides = array<i32>} : memref<1x64xf32, #tpu.memory_space<vmem>>, vector<1x64xf32>,
    } else {
    }
    %c0_i32_2 = arith.constant 0 : i32
    %5 = arith.cmpi eq, %arg1, %c0_i32_2 : i32
    %6 = arith.extui %5 : i1 to i32
    %c0_i32_3 = arith.constant 0 : i32
    %7 = arith.cmpi ne, %6, %c0_i32_3 : i32
    scf.if %7 {
      %cst_13 = arith.constant 0.000000e+00 : f32
      %17 = vector.broadcast %cst_13 : f32 to vector<32x64xf32>
      %c0_14 = arith.constant 0 : index
      %c0_15 = arith.constant 0 : index
      %18 = vector.load %arg7[%c0_14, %c0_15] : memref<32x64xf32, #tpu.memory_space<vmem>>, vector<32x64xf32>
      tpu.vector_store %arg7[%c0_14, %c0_15], %17 {strides = array<i32>} : memref<32x64xf32, #tpu.memory_space<vmem>>, vector<32x64xf32>,
    } else {
    }
    %c0 = arith.constant 0 : index
    %c0_4 = arith.constant 0 : index
    %8 = vector.load %arg7[%c0, %c0_4] : memref<32x64xf32, #tpu.memory_space<vmem>>, vector<32x64xf32>
    %c0_5 = arith.constant 0 : index
    %c0_6 = arith.constant 0 : index
    %9 = vector.load %arg2[%c0_5, %c0_6] : memref<32x512xbf16, #tpu.memory_space<vmem>>, vector<32x512xbf16>
    %c0_7 = arith.constant 0 : index
    %c0_8 = arith.constant 0 : index
    %10 = vector.load %arg3[%c0_7, %c0_8] : memref<512x64xbf16, #tpu.memory_space<vmem>>, vector<512x64xbf16>
    %cst = arith.constant dense<0.000000e+00> : vector<32x64xf32>
    %11 = tpu.matmul %9, %10, %cst {dimension_numbers = #tpu.dot_dimension_numbers<[1], [0], [0], [1], [0, 0, 1, 1], [], []>} : vector<32x512xbf16>, vector<512x64xbf16>, vector<32x64xf32> -> vector<32x64xf32>
    %12 = arith.addf %8, %11 : vector<32x64xf32>
    %c0_9 = arith.constant 0 : index
    %c0_10 = arith.constant 0 : index
    %13 = vector.load %arg7[%c0_9, %c0_10] : memref<32x64xf32, #tpu.memory_space<vmem>>, vector<32x64xf32>
    tpu.vector_store %arg7[%c0_9, %c0_10], %12 {strides = array<i32>} : memref<32x64xf32, #tpu.memory_space<vmem>>, vector<32x64xf32>,
    %c0_i32_11 = arith.constant 0 : i32
    %14 = arith.cmpi eq, %arg1, %c0_i32_11 : i32
    %15 = arith.extui %14 : i1 to i32
    %c0_i32_12 = arith.constant 0 : i32
    %16 = arith.cmpi ne, %15, %c0_i32_12 : i32
    scf.if %16 {
      %c0_13 = arith.constant 0 : index
      %c0_14 = arith.constant 0 : index
      %17 = vector.load %arg7[%c0_13, %c0_14] : memref<32x64xf32, #tpu.memory_space<vmem>>, vector<32x64xf32>
      %18 = arith.truncf %17 : vector<32x64xf32> to vector<32x64xbf16>
      %c0_15 = arith.constant 0 : index
      %c0_16 = arith.constant 0 : index
      %19 = vector.load %arg4[%c0_15, %c0_16] : memref<32x64xbf16, #tpu.memory_space<vmem>>, vector<32x64xbf16>
      tpu.vector_store %arg4[%c0_15, %c0_16], %18 {strides = array<i32>} : memref<32x64xbf16, #tpu.memory_space<vmem>>, vector<32x64xbf16>,
      %c0_17 = arith.constant 0 : index
      %c0_18 = arith.constant 0 : index
      %20 = vector.load %arg5[%c0_17, %c0_18] : memref<1x64xf32, #tpu.memory_space<vmem>>, vector<1x64xf32>
      %cst_19 = arith.constant dense<0.000000e+00> : vector<64xf32>
      %21 = vector.multi_reduction <add>, %17, %cst_19 [0] : vector<32x64xf32> to vector<64xf32>
      %22 = vector.shape_cast %21 : vector<64xf32> to vector<1x64xf32>
      %23 = arith.addf %20, %22 : vector<1x64xf32>
      %c0_20 = arith.constant 0 : index
      %c0_21 = arith.constant 0 : index
      %24 = vector.load %arg5[%c0_20, %c0_21] : memref<1x64xf32, #tpu.memory_space<vmem>>, vector<1x64xf32>
      tpu.vector_store %arg5[%c0_20, %c0_21], %23 {strides = array<i32>} : memref<1x64xf32, #tpu.memory_space<vmem>>, vector<1x64xf32>,
      %c0_22 = arith.constant 0 : index
      %c0_23 = arith.constant 0 : index
      %25 = vector.load %arg6[%c0_22, %c0_23] : memref<1x64xf32, #tpu.memory_space<vmem>>, vector<1x64xf32>
      %26 = arith.mulf %17, %17 : vector<32x64xf32>
      %cst_24 = arith.constant dense<0.000000e+00> : vector<64xf32>
      %27 = vector.multi_reduction <add>, %26, %cst_24 [0] : vector<32x64xf32> to vector<64xf32>
      %28 = vector.shape_cast %27 : vector<64xf32> to vector<1x64xf32>
      %29 = arith.addf %25, %28 : vector<1x64xf32>
      %c0_25 = arith.constant 0 : index
      %c0_26 = arith.constant 0 : index
      %30 = vector.load %arg6[%c0_25, %c0_26] : memref<1x64xf32, #tpu.memory_space<vmem>>, vector<1x64xf32>
      tpu.vector_store %arg6[%c0_25, %c0_26], %29 {strides = array<i32>} : memref<1x64xf32, #tpu.memory_space<vmem>>, vector<1x64xf32>,
    } else {
    }
    return
  }
  func.func @transform_0(%arg0: i32, %arg1: i32) -> (i32, i32) {
    %c0_i32 = arith.constant 0 : i32
    return %arg0, %arg1 : i32, i32
  }
  func.func @transform_1(%arg0: i32, %arg1: i32) -> (i32, i32) {
    %c0_i32 = arith.constant 0 : i32
    %c0_i32_0 = arith.constant 0 : i32
    return %arg1, %c0_i32 : i32, i32
  }
  func.func @transform_2(%arg0: i32, %arg1: i32) -> (i32, i32) {
    %c0_i32 = arith.constant 0 : i32
    %c0_i32_0 = arith.constant 0 : i32
    return %arg0, %c0_i32 : i32, i32
  }
  func.func @transform_3(%arg0: i32, %arg1: i32) -> (i32, i32) {
    %c0_i32 = arith.constant 0 : i32
    %c0_i32_0 = arith.constant 0 : i32
    %c0_i32_1 = arith.constant 0 : i32
    return %c0_i32, %c0_i32_0 : i32, i32
  }
  func.func @transform_4(%arg0: i32, %arg1: i32) -> (i32, i32) {
    %c0_i32 = arith.constant 0 : i32
    %c0_i32_0 = arith.constant 0 : i32
    %c0_i32_1 = arith.constant 0 : i32
    return %c0_i32, %c0_i32_0 : i32, i32
  }
}

module attributes {stable_mosaic.version = 11 : i64} {
  func.func @_affine_leaky_kernel(%arg0: i32, %arg1: memref<32x64xbf16, #tpu.memory_space<vmem>>, %arg2: memref<1x64xf32, #tpu.memory_space<vmem>>, %arg3: memref<1x64xf32, #tpu.memory_space<vmem>>, %arg4: memref<32x64xbf16, #tpu.memory_space<vmem>>) attributes {dimension_semantics = [#tpu.dimension_semantics<parallel>], iteration_bounds = array<i64: 1>, scalar_prefetch = 0 : i64, scratch_operands = 0 : i64, tpu.core_type = #tpu.core_type<tc>, window_params = [{transform_indices = @transform_0, window_bounds = array<i64: 32, 64>}, {pipeline_mode = #tpu.pipeline_mode<synchronous>, transform_indices = @transform_1, window_bounds = array<i64: 1, 64>}, {pipeline_mode = #tpu.pipeline_mode<synchronous>, transform_indices = @transform_2, window_bounds = array<i64: 1, 64>}, {transform_indices = @transform_3, window_bounds = array<i64: 32, 64>}]} {
    %c0 = arith.constant 0 : index
    %c0_0 = arith.constant 0 : index
    %0 = vector.load %arg1[%c0, %c0_0] : memref<32x64xbf16, #tpu.memory_space<vmem>>, vector<32x64xbf16>
    %1 = arith.extf %0 : vector<32x64xbf16> to vector<32x64xf32>
    %c0_1 = arith.constant 0 : index
    %c0_2 = arith.constant 0 : index
    %2 = vector.load %arg2[%c0_1, %c0_2] : memref<1x64xf32, #tpu.memory_space<vmem>>, vector<1x64xf32>
    %3 = vector.broadcast %2 : vector<1x64xf32> to vector<32x64xf32>
    %4 = arith.mulf %1, %3 : vector<32x64xf32>
    %c0_3 = arith.constant 0 : index
    %c0_4 = arith.constant 0 : index
    %5 = vector.load %arg3[%c0_3, %c0_4] : memref<1x64xf32, #tpu.memory_space<vmem>>, vector<1x64xf32>
    %6 = vector.broadcast %5 : vector<1x64xf32> to vector<32x64xf32>
    %7 = arith.addf %4, %6 : vector<32x64xf32>
    %cst = arith.constant 0.000000e+00 : f32
    %8 = vector.broadcast %cst : f32 to vector<32x64xf32>
    %9 = arith.cmpf oge, %7, %8 : vector<32x64xf32>
    %cst_5 = arith.constant 2.000000e-01 : f32
    %10 = vector.broadcast %cst_5 : f32 to vector<32x64xf32>
    %11 = arith.mulf %10, %7 : vector<32x64xf32>
    %12 = arith.select %9, %7, %11 : vector<32x64xi1>, vector<32x64xf32>
    %13 = arith.truncf %12 : vector<32x64xf32> to vector<32x64xbf16>
    %c0_6 = arith.constant 0 : index
    %c0_7 = arith.constant 0 : index
    %14 = vector.load %arg4[%c0_6, %c0_7] : memref<32x64xbf16, #tpu.memory_space<vmem>>, vector<32x64xbf16>
    tpu.vector_store %arg4[%c0_6, %c0_7], %13 {strides = array<i32>} : memref<32x64xbf16, #tpu.memory_space<vmem>>, vector<32x64xbf16>,
    return
  }
  func.func @transform_0(%arg0: i32) -> (i32, i32) {
    %c0_i32 = arith.constant 0 : i32
    %c0_i32_0 = arith.constant 0 : i32
    return %arg0, %c0_i32 : i32, i32
  }
  func.func @transform_1(%arg0: i32) -> (i32, i32) {
    %c0_i32 = arith.constant 0 : i32
    %c0_i32_0 = arith.constant 0 : i32
    %c0_i32_1 = arith.constant 0 : i32
    return %c0_i32, %c0_i32_0 : i32, i32
  }
  func.func @transform_2(%arg0: i32) -> (i32, i32) {
    %c0_i32 = arith.constant 0 : i32
    %c0_i32_0 = arith.constant 0 : i32
    %c0_i32_1 = arith.constant 0 : i32
    return %c0_i32, %c0_i32_0 : i32, i32
  }
  func.func @transform_3(%arg0: i32) -> (i32, i32) {
    %c0_i32 = arith.constant 0 : i32
    %c0_i32_0 = arith.constant 0 : i32
    return %arg0, %c0_i32 : i32, i32
  }
}

module attributes {stable_mosaic.version = 11 : i64} {
  func.func @_conv_bias_act_kernel(%arg0: i32, %arg1: i32, %arg2: memref<2x1024xbf16, #tpu.memory_space<vmem>>, %arg3: memref<1024x1xbf16, #tpu.memory_space<vmem>>, %arg4: memref<1x1xf32, #tpu.memory_space<vmem>>, %arg5: memref<2x1xf32, #tpu.memory_space<vmem>>, %arg6: memref<2x1xf32, #tpu.memory_space<vmem>>) attributes {dimension_semantics = [#tpu.dimension_semantics<parallel>, #tpu.dimension_semantics<arbitrary>], iteration_bounds = array<i64: 1, 1>, scalar_prefetch = 0 : i64, scratch_operands = 1 : i64, tpu.core_type = #tpu.core_type<tc>, window_params = [{transform_indices = @transform_0, window_bounds = array<i64: 2, 1024>}, {transform_indices = @transform_1, window_bounds = array<i64: 1024, 1>}, {pipeline_mode = #tpu.pipeline_mode<synchronous>, transform_indices = @transform_2, window_bounds = array<i64: 1, 1>}, {transform_indices = @transform_3, window_bounds = array<i64: 2, 1>}]} {
    %c0_i32 = arith.constant 0 : i32
    %0 = arith.cmpi eq, %arg1, %c0_i32 : i32
    %1 = arith.extui %0 : i1 to i32
    %c0_i32_0 = arith.constant 0 : i32
    %2 = arith.cmpi ne, %1, %c0_i32_0 : i32
    scf.if %2 {
      %cst_10 = arith.constant 0.000000e+00 : f32
      %12 = vector.broadcast %cst_10 : f32 to vector<2x1xf32>
      %c0_11 = arith.constant 0 : index
      %c0_12 = arith.constant 0 : index
      %13 = vector.load %arg6[%c0_11, %c0_12] : memref<2x1xf32, #tpu.memory_space<vmem>>, vector<2x1xf32>
      tpu.vector_store %arg6[%c0_11, %c0_12], %12 {strides = array<i32>} : memref<2x1xf32, #tpu.memory_space<vmem>>, vector<2x1xf32>,
    } else {
    }
    %c0 = arith.constant 0 : index
    %c0_1 = arith.constant 0 : index
    %3 = vector.load %arg6[%c0, %c0_1] : memref<2x1xf32, #tpu.memory_space<vmem>>, vector<2x1xf32>
    %c0_2 = arith.constant 0 : index
    %c0_3 = arith.constant 0 : index
    %4 = vector.load %arg2[%c0_2, %c0_3] : memref<2x1024xbf16, #tpu.memory_space<vmem>>, vector<2x1024xbf16>
    %c0_4 = arith.constant 0 : index
    %c0_5 = arith.constant 0 : index
    %5 = vector.load %arg3[%c0_4, %c0_5] : memref<1024x1xbf16, #tpu.memory_space<vmem>>, vector<1024x1xbf16>
    %cst = arith.constant dense<0.000000e+00> : vector<2x1xf32>
    %6 = tpu.matmul %4, %5, %cst {dimension_numbers = #tpu.dot_dimension_numbers<[1], [0], [0], [1], [0, 0, 1, 1], [], []>} : vector<2x1024xbf16>, vector<1024x1xbf16>, vector<2x1xf32> -> vector<2x1xf32>
    %7 = arith.addf %3, %6 : vector<2x1xf32>
    %c0_6 = arith.constant 0 : index
    %c0_7 = arith.constant 0 : index
    %8 = vector.load %arg6[%c0_6, %c0_7] : memref<2x1xf32, #tpu.memory_space<vmem>>, vector<2x1xf32>
    tpu.vector_store %arg6[%c0_6, %c0_7], %7 {strides = array<i32>} : memref<2x1xf32, #tpu.memory_space<vmem>>, vector<2x1xf32>,
    %c0_i32_8 = arith.constant 0 : i32
    %9 = arith.cmpi eq, %arg1, %c0_i32_8 : i32
    %10 = arith.extui %9 : i1 to i32
    %c0_i32_9 = arith.constant 0 : i32
    %11 = arith.cmpi ne, %10, %c0_i32_9 : i32
    scf.if %11 {
      %c0_10 = arith.constant 0 : index
      %c0_11 = arith.constant 0 : index
      %12 = vector.load %arg6[%c0_10, %c0_11] : memref<2x1xf32, #tpu.memory_space<vmem>>, vector<2x1xf32>
      %c0_12 = arith.constant 0 : index
      %c0_13 = arith.constant 0 : index
      %13 = vector.load %arg4[%c0_12, %c0_13] : memref<1x1xf32, #tpu.memory_space<vmem>>, vector<1x1xf32>
      %14 = vector.broadcast %13 : vector<1x1xf32> to vector<2x1xf32>
      %15 = arith.addf %12, %14 : vector<2x1xf32>
      %cst_14 = arith.constant 5.000000e-01 : f32
      %16 = vector.broadcast %cst_14 : f32 to vector<2x1xf32>
      %17 = arith.mulf %16, %15 : vector<2x1xf32>
      %18 = math.tanh %17 : vector<2x1xf32>
      %cst_15 = arith.constant 1.000000e+00 : f32
      %19 = vector.broadcast %cst_15 : f32 to vector<2x1xf32>
      %20 = arith.addf %18, %19 : vector<2x1xf32>
      %cst_16 = arith.constant 5.000000e-01 : f32
      %21 = vector.broadcast %cst_16 : f32 to vector<2x1xf32>
      %22 = arith.mulf %21, %20 : vector<2x1xf32>
      %c0_17 = arith.constant 0 : index
      %c0_18 = arith.constant 0 : index
      %23 = vector.load %arg5[%c0_17, %c0_18] : memref<2x1xf32, #tpu.memory_space<vmem>>, vector<2x1xf32>
      tpu.vector_store %arg5[%c0_17, %c0_18], %22 {strides = array<i32>} : memref<2x1xf32, #tpu.memory_space<vmem>>, vector<2x1xf32>,
    } else {
    }
    return
  }
  func.func @transform_0(%arg0: i32, %arg1: i32) -> (i32, i32) {
    %c0_i32 = arith.constant 0 : i32
    return %arg0, %arg1 : i32, i32
  }
  func.func @transform_1(%arg0: i32, %arg1: i32) -> (i32, i32) {
    %c0_i32 = arith.constant 0 : i32
    %c0_i32_0 = arith.constant 0 : i32
    return %arg1, %c0_i32 : i32, i32
  }
  func.func @transform_2(%arg0: i32, %arg1: i32) -> (i32, i32) {
    %c0_i32 = arith.constant 0 : i32
    %c0_i32_0 = arith.constant 0 : i32
    %c0_i32_1 = arith.constant 0 : i32
    return %c0_i32, %c0_i32_0 : i32, i32
  }
  func.func @transform_3(%arg0: i32, %arg1: i32) -> (i32, i32) {
    %c0_i32 = arith.constant 0 : i32
    %c0_i32_0 = arith.constant 0 : i32
    return %arg0, %c0_i32 : i32, i32
  }
}

</mosaic_0001>

<bundles_post_ra>
// kernel: discriminator_forward.8
= control target key start
LH: loop header
LB: loop body
LE: loop exit
PB: predicated region body
PF: predicated region fallthrough
CT: control target
= control target key end

     0   :  { %8 = vsyncpa [#allocation4], 0  ;;  %s2167_s0 = inlined_call_operand.hbm [shape: bf16[2048,48], index: 0, kind: input, shape index: {}]   ;;  %s2168_s1 = inlined_call_operand.hbm [shape: bf16[48,8], index: 1, kind: input, shape index: {}]   ;;  %s2169_s2 = inlined_call_operand.hbm [shape: f32[1,8], index: 2, kind: input, shape index: {}]   ;;  %s2170_s3 = inlined_call_operand.hbm [shape: bf16[2048,8], index: 3, kind: output, shape index: {}]  }
   0x1   :  { %10 = vsyncpa [#allocation4 + $0x1], 0 }
   0x2   :  { %11 = vsyncpa [#allocation7], 0 }
   0x3   :  { %12 = vsyncpa [#allocation5], 0 }
   0x4   :  { %14 = vsyncpa [#allocation5 + $0x1], 0  ;;  %s1666_s12 = smov 0   ;;  %s1668_s13 = smov 0  }
   0x5   :  { %s1670_s14 = smov 0   ;;  %s1672_s15 = smov 0  }
   0x6   :  { %s1674_s16 = smov 0   ;;  %s1676_s17 = smov 0  }
   0x7 LB: > { %s1172_s18 = sadd.s32 4294967295, %s1635_s17   ;;  %s1173_s19 = sadd.s32 4294967294, %s1635_s17   ;;  %s1635_s17 = sphi %s1676_s17, %s20_s17   ;;  %s1631_s16 = sphi %s1674_s16, %s2192_s16   ;;  %s1627_s15 = sphi %s1672_s15, %s2191_s15   ;;  %s1623_s14 = sphi %s1670_s14, %s2190_s14   ;;  %s1619_s13 = sphi %s1668_s13, %s2189_s13   ;;  %s1615_s12 = sphi %s1666_s12, %s2188_s12  }
   0x8   : > { %p54_p0 = scmp.ne.s32.totalorder %s1619_s13, %s1615_s12  ;;  %p1700_p1 = scmp.eq.s32.totalorder %s1172_s18, 0 }
   0x9   : > { %p1704_p2 = scmp.eq.s32.totalorder %s1172_s18, 7  ;;  %p131_p3 = scmp.eq.s32.totalorder %s1173_s19, 7 }
   0xa   : > { %s2175_s20 = scalar_select %p1700_p1, 1, 0 }
   0xb   : > { %s2176_s21 = scalar_select %p1704_p2, 1, 0 }
   0xc   : > { %p1710_p4 = por %p1700_p1, %p54_p0  ;;  %p1174_p5 = scmp.ge.s32.totalorder %s1635_s17, 1 }
   0xd   : > { %p1715_p6 = por %p131_p3, %p54_p0  ;;  %p138_p7 = scmp.lt.s32.totalorder %s1635_s17, 9 }
   0xe   : > { %s2177_s22 = scalar_select %p1710_p4, 1, 0 }
   0xf   : > { %s2178_s23 = scalar_select %p1715_p6, 1, 0 }
  0x10   : > { %p1720_p8 = pnand %p1174_p5, %p138_p7  ;;  %s1637_s25 = smov [#allocation6]  }
  0x11   : > { %s153_s26 = sshll.u32 %s1637_s25, 4  ;;  %s1638_s28 = smov [#allocation8]   ;;  %s154_s26 = int_to_ptr.vmem [resolvable:$true] %s153_s26 }
  0x12   : > { %s2179_s24 = scalar_select %p1720_p8, 1, 0 }
  0x13   : > { %p1368_p9 = pneg %p1720_p8  ;;  %s167_s29 = sshll.u32 %s1638_s28, 4  ;;  %s1732_s29 = int_to_ptr.vmem [resolvable:$true] %s167_s29 }
  0x14   : > { %s1463_s5 = scalar_lea.hbm %s2168_s1, 384 }
  0x15   : > { %p1728_p10 = pnand %p1368_p9, %p1700_p1  ;;  %p1464_p11 = scmp.ne.s32.totalorder %s2168_s1, %s1463_s5 }
  0x16   : > { %p1470_p3 = scmp.lt.u32.totalorder %s1463_s5, %s2168_s1 }
  0x17   : > { %p1465_p12 = pneg %p1728_p10 }
  0x19   : > { %p1466_p13 = pnand %p1465_p12, %p1464_p11 }
  0x1b   : > { %p1467_p0 = pneg %p1466_p13 }
  0x1d   : > { %p1472_p5 = pnand %p1470_p3, %p1467_p0 }
  0x1f   : > { %1475 = shalt.err (!%p1472_p5)
}
  0x20   : > { %s1476_s10 = scalar_lea.vmem %s154_s26, 384  ;;  %p1484_p1 = scmp.lt.s32.totalorder %s154_s26, %s154_s26 }
  0x21   : > { %p1477_p7 = scmp.ne.s32.totalorder %s154_s26, %s1476_s10  ;;  %p1485_p4 = scmp.lt.s32.totalorder %s1476_s10, %s1476_s10 }
  0x23   : > { %p1479_p9 = pnand %p1477_p7, %p1465_p12  ;;  %p1486_p8 = por %p1485_p4, %p1484_p1 }
  0x25   : > { %p1480_p6 = pneg %p1479_p9 }
  0x27   : > { %p1487_p2 = pnand %p1486_p8, %p1480_p6 }
  0x29   : > { %1490 = shalt.err (!%p1487_p2)
}
  0x2a   : > { %s1639_s11 = smov 64   ;;  %s1640_s18 = smov 4  }
  0x2b   : > { %1371 = dma.hbm_to_vmem [thread:$0]  (!%p1728_p10), %s2168_s1, 384, %s154_s26, [#allocation7], %s1639_s11, %s1639_s11, %s1640_s18  }
  0x2c   : > { %s1491_s4 = scalar_lea.hbm %s2169_s2, 16 }
  0x2d   : > { %p1492_p1 = scmp.ne.s32.totalorder %s2169_s2, %s1491_s4  ;;  %p1498_p6 = scmp.lt.u32.totalorder %s1491_s4, %s2169_s2 }
  0x2f   : > { %p1494_p2 = pnand %p1492_p1, %p1465_p12 }
  0x31   : > { %p1495_p4 = pneg %p1494_p2 }
  0x33   : > { %p1500_p8 = pnand %p1498_p6, %p1495_p4 }
  0x35   : > { %1503 = shalt.err (!%p1500_p8)
}
  0x36   : > { %s1504_s26 = scalar_lea.vmem %s1732_s29, 16  ;;  %s1511_s9 = scalar_lea.vmem %s1732_s29, 32 }
  0x37   : > { %p1505_p11 = scmp.ne.s32.totalorder %s1732_s29, %s1504_s26  ;;  %p1512_p3 = scmp.lt.s32.totalorder %s1732_s29, %s1732_s29 }
  0x38   : > { %p1513_p5 = scmp.lt.s32.totalorder %s1511_s9, %s1504_s26 }
  0x39   : > { %p1507_p13 = pnand %p1505_p11, %p1465_p12 }
  0x3a   : > { %p1514_p7 = por %p1513_p5, %p1512_p3 }
  0x3b   : > { %p1508_p0 = pneg %p1507_p13 }
  0x3d   : > { %p1515_p9 = pnand %p1514_p7, %p1508_p0 }
  0x3f   : > { %1518 = shalt.err (!%p1515_p9)
}
  0x40   : > { %1374 = dma.hbm_to_vmem [thread:$0]  (!%p1728_p10), %s2169_s2, 16, %s1732_s29, [#allocation7]  }
  0x41   : > { %s32_s25 = sadd.s32 1, %s1631_s16  ;;  %s41_s28 = sadd.s32 1, %s1623_s14 }
  0x42   : > { %p34_p12 = scmp.ge.s32.totalorder %s32_s25, 8  ;;  %p48_p1 = scmp.ne.s32.totalorder %s1623_s14, %s1619_s13 }
  0x43   : > { %p49_p2 = scmp.eq.s32.totalorder %s1635_s17, 0  ;;  %p1385_p4 = scmp.lt.s32.totalorder %s1635_s17, 8 }
  0x44   : > { %s2194_s25 = smov (%p34_p12, %s32_s25), 0  ;;  %p2181_p8 = scmp.ne.s32.totalorder %s2176_s21, 0 }
  0x45   : > { %p50_p6 = por %p49_p2, %p48_p1  ;;  %s36_s30 = ssub.s32 %s1631_s16, %s2194_s25 }
  0x46   : > { %p1795_p11 = por %p2181_p8, %p48_p1  ;;  %s178_s4 = sand.u32 1, %s1623_s14  }
  0x47   : > { %p39_p13 = scmp.eq.s32.totalorder %s36_s30, 0  ;;  %s1178_s29 = sshll.u32 %s178_s4, 7 }
  0x48   : > { %s1259_s5 = sshll.u32 %s1631_s16, 11  ;;  %s182_s21 = scalar_lea.vmem [#allocation3], %s1178_s29 }
  0x49   : > { %s1804_s6 = scalar_select %p39_p13, %s1623_s14, %s41_s28  }
  0x4a   : > { %s1809_s26 = scalar_lea.hbm %s2167_s0, %s1259_s5  ;;  %s190_s9 = sshll.u32 %s182_s21, 4  ;;  %s1817_s9 = int_to_ptr.vmem [resolvable:$true] %s190_s9 }
  0x4b   : > { %p1813_p10 = pnand %p1385_p4, %p50_p6  ;;  %s1819_s19 = scalar_lea.sflag [#allocation4], %s178_s4 }
  0x4c   : > { %s1519_s28 = scalar_lea.hbm %s1809_s26, 2048  ;;  %s1524_s5 = scalar_lea.hbm %s2167_s0, 16384 }
  0x4d   : > { %p1520_p0 = scmp.ne.s32.totalorder %s1809_s26, %s1519_s28  ;;  %p1521_p3 = pneg %p1813_p10 }
  0x4e   : > { %p1525_p9 = scmp.lt.u32.totalorder %s1809_s26, %s2167_s0  ;;  %p1526_p12 = scmp.lt.u32.totalorder %s1524_s5, %s1519_s28 }
  0x4f   : > { %p1522_p5 = pnand %p1521_p3, %p1520_p0  ;;  %p1528_p2 = scmp.lt.u32.totalorder %s1519_s28, %s1809_s26 }
  0x50   : > { %p1527_p1 = por %p1526_p12, %p1525_p9 }
  0x51   : > { %p1523_p7 = pneg %p1522_p5 }
  0x52   : > { %p1529_p4 = por %p1528_p2, %p1527_p1 }
  0x54   : > { %p1530_p6 = pnand %p1529_p4, %p1523_p7 }
  0x56   : > { %1533 = shalt.err (!%p1530_p6)
}
  0x57   : > { %s1534_s4 = scalar_lea.vmem %s1817_s9, 2048  ;;  %s1641_s21 = smov [#allocation3]  }
  0x58   : > { %p1535_p8 = scmp.ne.s32.totalorder %s1817_s9, %s1534_s4  ;;  %s1539_s30 = sshll.u32 %s1641_s21, 4  ;;  %s1540_s30 = int_to_ptr.vmem [resolvable:$false] %s1539_s30 }
  0x59   : > { %s1541_s29 = scalar_lea.vmem %s1540_s30, 4096  ;;  %p1542_p5 = scmp.lt.s32.totalorder %s1817_s9, %s1540_s30 }
  0x5a   : > { %p1537_p13 = pnand %p1535_p8, %p1521_p3  ;;  %p1543_p9 = scmp.lt.s32.totalorder %s1541_s29, %s1534_s4 }
  0x5c   : > { %p1538_p0 = pneg %p1537_p13  ;;  %p1544_p12 = por %p1543_p9, %p1542_p5 }
  0x5e   : > { %p1545_p1 = pnand %p1544_p12, %p1538_p0 }
  0x60   : > { %1548 = shalt.err (!%p1545_p1)
}
  0x61   : > { %1378 = dma.hbm_to_vmem [thread:$0]  (!%p1813_p10), %s1809_s26, 2048, %s1817_s9, %s1819_s19, %s1639_s11, %s1639_s11, %s1640_s18  }
  0x62   : > { %p2184_p3 = scmp.ne.s32.totalorder %s2179_s24, 0 }
  0x63   : > { %s1853_s28 = sand.u32 (!%p2184_p3), 1, %s1619_s13   ;;  %p2185_p7 = scmp.ne.s32.totalorder (!%p2184_p3), %s2177_s22, 0 }
  0x64   : > { %202 = sbr.rel (%p2184_p3) target bundleno = 415 (0x19f), region = 32  ;;  %s1182_s5 = sshll.u32 (!%p2184_p3), %s1853_s28, 7 }
  0x65   : > { %s205_s7 = scalar_lea.sflag (!%p2184_p3), [#allocation4], %s1853_s28  ;;  %s1859_s10 = scalar_lea.vmem (!%p2184_p3), [#allocation3], %s1182_s5 }
  0x6b   : > { %1602 = dma.done.wait (%p2185_p7), %s205_s7, 2048  }
  0x6c   : > { %1604 = vsyncadd (%p2185_p7), %s205_s7, 4294965248  ;;  %p2186_p10 = scmp.ne.s32.totalorder %s2175_s20, 0 }
  0x6e   : > { %1606 = dma.done.wait (%p2186_p10), [#allocation7], 400  }
  0x6f   : > { %1608 = vsyncadd (%p2186_p10), [#allocation7], 4294966896  ;;  %vm247_vm0 = vcmask 64512   ;;  %v1642_v0 = vmov 0.0   ;;  %v1444_v1 = vld [vmem:[#allocation6] sm:$0xff]   ;;  %v1445_v2 = vld [vmem:[#allocation6 + $0x8] sm:$0xff]  }
  0x70   : > { %250 = vst.msk [vmem:[#allocation2 + $0x10] sm:$0xff] %vm247_vm0, %v1642_v0  ;;  %248 = vst.msk [vmem:[#allocation2] sm:$0xff] %vm247_vm0, %v1642_v0  ;;  %1312 = vmatprep.subr.bf16.mxu0 %v1444_v1  ;;  %1350 = vmatprep.subr.bf16.mxu1 %v1444_v1  ;;  %v1446_v3 = vld [vmem:[#allocation6 + $0x10] sm:$0xff]   ;;  %vm448_vm1 = vcmask 392192   ;;  %v1447_v4 = vld [vmem:[%s1859_s10] sm:$0xff]   ;;  %vm1021_vm2 = vcmask 60416  }
  0x71   : > { %249 = vst.msk [vmem:[#allocation2 + $0x8] sm:$0xff] %vm247_vm0, %v1642_v0  ;;  %251 = vst.msk [vmem:[#allocation2 + $0x18] sm:$0xff] %vm247_vm0, %v1642_v0  ;;  %1313 = vmatpush3.bf16.msra.mxu0 %v1444_v1  ;;  %1353 = vmatpush3.bf16.msra.mxu1 %v1444_v1  ;;  %v1448_v5 = vld [vmem:[%s1859_s10 + $0x40] sm:$0xff]   ;;  %v1449_v6 = vld [vmem:[%s1859_s10 + $0x8] sm:$0xff]   ;;  %s1965_s20 = scalar_lea.vmem [#allocation9], %s1182_s5  ;;  %s1292_s22 = sshll.u32 %s1627_s15, 11 }
  0x72   : > { %252 = vst.msk [vmem:[#allocation2 + $0x20] sm:$0xff] %vm247_vm0, %v1642_v0  ;;  %253 = vst.msk [vmem:[#allocation2 + $0x28] sm:$0xff] %vm247_vm0, %v1642_v0  ;;  %1314 = vmatprep.subr.bf16.mxu0 %v1445_v2  ;;  %1351 = vmatprep.subr.bf16.mxu1 %v1445_v2  ;;  %v1450_v7 = vld [vmem:[%s1859_s10 + $0x48] sm:$0xff]   ;;  %v1451_v8 = vld [vmem:[%s1859_s10 + $0x10] sm:$0xff]   ;;  %s1068_s24 = sshll.u32 %s1965_s20, 4  ;;  %s2115_s26 = scalar_lea.hbm %s2170_s3, %s1292_s22  ;;  %s2117_s24 = int_to_ptr.vmem [resolvable:$true] %s1068_s24 }
  0x73   : > { %254 = vst.msk [vmem:[#allocation2 + $0x30] sm:$0xff] %vm247_vm0, %v1642_v0  ;;  %255 = vst.msk [vmem:[#allocation2 + $0x38] sm:$0xff] %vm247_vm0, %v1642_v0  ;;  %1318 = vmatprep.mubr.msk.bf16.mxu0 %vm448_vm1, %v1447_v4  ;;  %1334 = vmatprep.mubr.msk.bf16.mxu1 %vm448_vm1, %v1448_v5  ;;  %v1452_v9 = vld [vmem:[%s1859_s10 + $0x50] sm:$0xff]   ;;  %v1453_v10 = vld [vmem:[%s1859_s10 + $0x18] sm:$0xff]   ;;  %s1055_s15 = scalar_lea.sflag [#allocation5], %s1853_s28  ;;  %s1549_s9 = scalar_lea.vmem %s2117_s24, 2048 }
  0x74   : > { %256 = vst.msk [vmem:[#allocation2 + $0x40] sm:$0xff] %vm247_vm0, %v1642_v0  ;;  %257 = vst.msk [vmem:[#allocation2 + $0x48] sm:$0xff] %vm247_vm0, %v1642_v0  ;;  %v1454_v11 = vld [vmem:[%s1859_s10 + $0x58] sm:$0xff]   ;;  %v1455_v12 = vld [vmem:[%s1859_s10 + $0x20] sm:$0xff]   ;;  %p1550_p2 = scmp.ne.s32.totalorder %s2117_s24, %s1549_s9  ;;  %s1643_s19 = smov [#allocation9]  }
  0x75   : > { %258 = vst.msk [vmem:[#allocation2 + $0x50] sm:$0xff] %vm247_vm0, %v1642_v0  ;;  %259 = vst.msk [vmem:[#allocation2 + $0x58] sm:$0xff] %vm247_vm0, %v1642_v0  ;;  %1315 = vmatpush3.bf16.msra.mxu0 %v1445_v2  ;;  %1354 = vmatpush3.bf16.msra.mxu1 %v1445_v2  ;;  %v1456_v13 = vld [vmem:[%s1859_s10 + $0x60] sm:$0xff]   ;;  %v1457_v14 = vld [vmem:[%s1859_s10 + $0x28] sm:$0xff]   ;;  %s1553_s8 = sshll.u32 %s1643_s19, 4  ;;  %s1554_s8 = int_to_ptr.vmem [resolvable:$false] %s1553_s8 }
  0x76   : > { %260 = vst.msk [vmem:[#allocation2 + $0x60] sm:$0xff] %vm247_vm0, %v1642_v0  ;;  %261 = vst.msk [vmem:[#allocation2 + $0x68] sm:$0xff] %vm247_vm0, %v1642_v0  ;;  %1316 = vmatprep.subr.bf16.mxu0 %v1446_v3  ;;  %1352 = vmatprep.subr.bf16.mxu1 %v1446_v3  ;;  %v1458_v15 = vld [vmem:[%s1859_s10 + $0x68] sm:$0xff]   ;;  %v1459_v16 = vld [vmem:[%s1859_s10 + $0x30] sm:$0xff]   ;;  %p1551_p4 = pnand %p1550_p2, %p1795_p11  ;;  %s1555_s4 = scalar_lea.vmem %s1554_s8, 4096 }
  0x77   : > { %262 = vst.msk [vmem:[#allocation2 + $0x70] sm:$0xff] %vm247_vm0, %v1642_v0  ;;  %263 = vst.msk [vmem:[#allocation2 + $0x78] sm:$0xff] %vm247_vm0, %v1642_v0  ;;  %v1460_v17 = vld [vmem:[%s1859_s10 + $0x70] sm:$0xff]   ;;  %v1461_v18 = vld [vmem:[%s1859_s10 + $0x38] sm:$0xff]   ;;  %p1556_p8 = scmp.lt.s32.totalorder %s2117_s24, %s1554_s8  ;;  %p1557_p13 = scmp.lt.s32.totalorder %s1555_s4, %s1549_s9 }
  0x78   : > { %264 = vst.msk [vmem:[#allocation2 + $0x80] sm:$0xff] %vm247_vm0, %v1642_v0  ;;  %265 = vst.msk [vmem:[#allocation2 + $0x88] sm:$0xff] %vm247_vm0, %v1642_v0  ;;  %v1462_v19 = vld [vmem:[%s1859_s10 + $0x78] sm:$0xff]   ;;  %v282_v20 = vld [vmem:[#allocation2 + $0x10] sm:$0xff]  ;;  %p1552_p6 = pneg %p1551_p4 }
  0x79   : > { %266 = vst.msk [vmem:[#allocation2 + $0x90] sm:$0xff] %vm247_vm0, %v1642_v0  ;;  %267 = vst.msk [vmem:[#allocation2 + $0x98] sm:$0xff] %vm247_vm0, %v1642_v0  ;;  %1317 = vmatpush3.bf16.msra.mxu0 %v1446_v3  ;;  %1355 = vmatpush3.bf16.msra.mxu1 %v1446_v3  ;;  %v280_v22 = vld [vmem:[#allocation2] sm:$0xff]  ;;  %v283_v26 = vld [vmem:[#allocation2 + $0x18] sm:$0xff]  ;;  %p1558_p0 = por %p1557_p13, %p1556_p8 }
  0x7a   : > { %268 = vst.msk [vmem:[#allocation2 + $0xa0] sm:$0xff] %vm247_vm0, %v1642_v0  ;;  %269 = vst.msk [vmem:[#allocation2 + $0xa8] sm:$0xff] %vm247_vm0, %v1642_v0  ;;  %v281_v32 = vld [vmem:[#allocation2 + $0x8] sm:$0xff]  ;;  %v286_v44 = vld [vmem:[#allocation2 + $0x30] sm:$0xff] }
  0x7b   : > { %270 = vst.msk [vmem:[#allocation2 + $0xb0] sm:$0xff] %vm247_vm0, %v1642_v0  ;;  %271 = vst.msk [vmem:[#allocation2 + $0xb8] sm:$0xff] %vm247_vm0, %v1642_v0  ;;  %v284_v46 = vld [vmem:[#allocation2 + $0x20] sm:$0xff]  ;;  %v1941_v48 = vld [vmem:[#allocation8] ss:$0 sm:$0xff]  ;;  %p1559_p5 = pnand %p1558_p0, %p1552_p6 }
  0x7c   : > { %272 = vst.msk [vmem:[#allocation2 + $0xc0] sm:$0xff] %vm247_vm0, %v1642_v0  ;;  %273 = vst.msk [vmem:[#allocation2 + $0xc8] sm:$0xff] %vm247_vm0, %v1642_v0  ;;  %1319 = vmatmul.mubr.msk.bf16.vlgmr.msra.gmra.mrb[0].mxu0 %vm448_vm1, %v1449_v6  ;;  %1335 = vmatmul.mubr.msk.bf16.vlgmr.msra.gmra.mrb[0].mxu1 %vm448_vm1, %v1450_v7  ;;  %v287_v51 = vld [vmem:[#allocation2 + $0x38] sm:$0xff]  ;;  %v285_v57 = vld [vmem:[#allocation2 + $0x28] sm:$0xff] }
  0x7d   : > { %274 = vst.msk [vmem:[#allocation2 + $0xd0] sm:$0xff] %vm247_vm0, %v1642_v0  ;;  %275 = vst.msk [vmem:[#allocation2 + $0xd8] sm:$0xff] %vm247_vm0, %v1642_v0  ;;  %1322 = vmatprep.mubr.msk.bf16.mxu0 %vm448_vm1, %v1451_v8  ;;  %1338 = vmatprep.mubr.msk.bf16.mxu1 %vm448_vm1, %v1452_v9 }
  0x7e   : > { %276 = vst.msk [vmem:[#allocation2 + $0xe0] sm:$0xff] %vm247_vm0, %v1642_v0  ;;  %277 = vst.msk [vmem:[#allocation2 + $0xe8] sm:$0xff] %vm247_vm0, %v1642_v0 }
  0x7f   : > { %278 = vst.msk [vmem:[#allocation2 + $0xf0] sm:$0xff] %vm247_vm0, %v1642_v0  ;;  %279 = vst.msk [vmem:[#allocation2 + $0xf8] sm:$0xff] %vm247_vm0, %v1642_v0  ;;  %v296_v23 = vld [vmem:[#allocation2 + $0x80] sm:$0xff]  ;;  %v297_v33 = vld [vmem:[#allocation2 + $0x88] sm:$0xff] }
  0x80   : > { %v298_v21 = vld [vmem:[#allocation2 + $0x90] sm:$0xff]  ;;  %v299_v27 = vld [vmem:[#allocation2 + $0x98] sm:$0xff] }
  0x81   : > { %v300_v47 = vld [vmem:[#allocation2 + $0xa0] sm:$0xff]  ;;  %v301_v58 = vld [vmem:[#allocation2 + $0xa8] sm:$0xff] }
  0x82   : > { %v302_v45 = vld [vmem:[#allocation2 + $0xb0] sm:$0xff]  ;;  %v303_v52 = vld [vmem:[#allocation2 + $0xb8] sm:$0xff] }
  0x84   : > { %1323 = vmatmul.mubr.msk.bf16.gmra.mrb[4].mxu0 %vm448_vm1, %v1453_v10  ;;  %1339 = vmatmul.mubr.msk.bf16.gmra.mrb[4].mxu1 %vm448_vm1, %v1454_v11 }
  0x85   : > { %1326 = vmatprep.mubr.msk.bf16.mxu0 %vm448_vm1, %v1455_v12  ;;  %1342 = vmatprep.mubr.msk.bf16.mxu1 %vm448_vm1, %v1456_v13 }
  0x8c   : > { %1327 = vmatmul.mubr.msk.bf16.gmra.mrb[8].mxu0 %vm448_vm1, %v1457_v14  ;;  %1343 = vmatmul.mubr.msk.bf16.gmra.mrb[8].mxu1 %vm448_vm1, %v1458_v15 }
  0x8d   : > { %1330 = vmatprep.mubr.msk.bf16.mxu0 %vm448_vm1, %v1459_v16  ;;  %1346 = vmatprep.mubr.msk.bf16.mxu1 %vm448_vm1, %v1460_v17 }
  0x94   : > { %1331 = vmatmul.mubr.msk.bf16.gmra.mrb[12].mxu0 %vm448_vm1, %v1461_v18  ;;  %1347 = vmatmul.mubr.msk.bf16.gmra.mrb[12].mxu1 %vm448_vm1, %v1462_v19 }
 0x14f   : > { %v1320_v24 = vpop.f32.mrb[0].mxu0  ;;  %v1336_v25 = vpop.f32.mrb[0].mxu1 }
 0x150   : > { %v660_v28 = vadd.f32 %v1320_v24, %v282_v20  ;;  %v676_v29 = vadd.f32 %v1336_v25, %v298_v21  ;;  %v531_v30 = vpop.f32.mrb[1].mxu0  ;;  %v595_v31 = vpop.f32.mrb[1].mxu1 }
 0x151   : > { %v658_v34 = vadd.f32 %v531_v30, %v280_v22  ;;  %v674_v35 = vadd.f32 %v595_v31, %v296_v23  ;;  %v1321_v36 = vpop.f32.mrb[2].mxu0  ;;  %v1337_v37 = vpop.f32.mrb[2].mxu1 }
 0x152   : > { %693 = vst.msk [vmem:[#allocation2 + $0x10] sm:$0xff] %vm247_vm0, %v660_v28  ;;  %709 = vst.msk [vmem:[#allocation2 + $0x90] sm:$0xff] %vm247_vm0, %v676_v29  ;;  %v661_v38 = vadd.f32 %v1321_v36, %v283_v26  ;;  %v677_v39 = vadd.f32 %v1337_v37, %v299_v27  ;;  %v534_v40 = vpop.f32.mrb[3].mxu0  ;;  %v598_v41 = vpop.f32.mrb[3].mxu1  ;;  %v290_v29 = vld [vmem:[#allocation2 + $0x50] sm:$0xff] }
 0x153   : > { %691 = vst.msk [vmem:[#allocation2] sm:$0xff] %vm247_vm0, %v658_v34  ;;  %707 = vst.msk [vmem:[#allocation2 + $0x80] sm:$0xff] %vm247_vm0, %v674_v35  ;;  %v659_v42 = vadd.f32 %v534_v40, %v281_v32  ;;  %v675_v43 = vadd.f32 %v598_v41, %v297_v33 }
 0x154   : > { %694 = vst.msk [vmem:[#allocation2 + $0x18] sm:$0xff] %vm247_vm0, %v661_v38  ;;  %710 = vst.msk [vmem:[#allocation2 + $0x98] sm:$0xff] %vm247_vm0, %v677_v39 }
 0x155   : > { %692 = vst.msk [vmem:[#allocation2 + $0x8] sm:$0xff] %vm247_vm0, %v659_v42  ;;  %708 = vst.msk [vmem:[#allocation2 + $0x88] sm:$0xff] %vm247_vm0, %v675_v43 }
 0x157   : > { %v1324_v49 = vpop.f32.mrb[4].mxu0  ;;  %v1340_v50 = vpop.f32.mrb[4].mxu1 }
 0x158   : > { %v664_v53 = vadd.f32 %v1324_v49, %v286_v44  ;;  %v680_v54 = vadd.f32 %v1340_v50, %v302_v45  ;;  %v547_v55 = vpop.f32.mrb[5].mxu0  ;;  %v611_v56 = vpop.f32.mrb[5].mxu1 }
 0x159   : > { %v728_v59 = vld [vmem:[#allocation2 + $0x10] sm:$0xff]  ;;  %v662_v61 = vadd.f32 %v547_v55, %v284_v46  ;;  %v678_v62 = vadd.f32 %v611_v56, %v300_v47  ;;  %v1325_v63 = vpop.f32.mrb[6].mxu0  ;;  %v1341_v0 = vpop.f32.mrb[6].mxu1 }
 0x15a   : > { %v744_v60 = vld [vmem:[#allocation2 + $0x90] sm:$0xff]  ;;  %v767_v1 = vadd.f32 %v1941_v48, %v728_v59  ;;  %v726_v3 = vld [vmem:[#allocation2] sm:$0xff]  ;;  %697 = vst.msk [vmem:[#allocation2 + $0x30] sm:$0xff] %vm247_vm0, %v664_v53  ;;  %713 = vst.msk [vmem:[#allocation2 + $0xb0] sm:$0xff] %vm247_vm0, %v680_v54  ;;  %v665_v5 = vadd.f32 %v1325_v63, %v287_v51  ;;  %v681_v6 = vadd.f32 %v1341_v0, %v303_v52  ;;  %v550_v7 = vpop.f32.mrb[7].mxu0  ;;  %v614_v8 = vpop.f32.mrb[7].mxu1 }
 0x15b   : > { %v783_v2 = vadd.f32 %v1941_v48, %v744_v60  ;;  %v742_v4 = vld [vmem:[#allocation2 + $0x80] sm:$0xff]  ;;  %v765_v9 = vadd.f32 %v1941_v48, %v726_v3  ;;  %v729_v11 = vld [vmem:[#allocation2 + $0x18] sm:$0xff]  ;;  %695 = vst.msk [vmem:[#allocation2 + $0x20] sm:$0xff] %vm247_vm0, %v662_v61  ;;  %711 = vst.msk [vmem:[#allocation2 + $0xa0] sm:$0xff] %vm247_vm0, %v678_v62  ;;  %v663_v13 = vadd.f32 %v550_v7, %v285_v57 }
 0x15c   : > { %v781_v10 = vadd.f32 %v1941_v48, %v742_v4  ;;  %v745_v12 = vld [vmem:[#allocation2 + $0x98] sm:$0xff]  ;;  %v679_v14 = vadd.f32 %v614_v8, %v301_v58  ;;  %vm799_vm3 = vcmp.ge.f32.partialorder %v767_v1, 0.0  ;;  %v831_v15 = vmul.f32 0.2, %v767_v1  ;;  %698 = vst.msk [vmem:[#allocation2 + $0x38] sm:$0xff] %vm247_vm0, %v665_v5  ;;  %714 = vst.msk [vmem:[#allocation2 + $0xb8] sm:$0xff] %vm247_vm0, %v681_v6 }
 0x15d   : > { %vm815_vm4 = vcmp.ge.f32.partialorder %v783_v2, 0.0  ;;  %v847_v16 = vmul.f32 0.2, %v783_v2  ;;  %vm797_vm5 = vcmp.ge.f32.partialorder %v765_v9, 0.0  ;;  %v829_v17 = vmul.f32 0.2, %v765_v9 }
 0x15e   : > { %vm813_vm6 = vcmp.ge.f32.partialorder %v781_v10, 0.0  ;;  %v845_v18 = vmul.f32 0.2, %v781_v10  ;;  %696 = vst.msk [vmem:[#allocation2 + $0x28] sm:$0xff] %vm247_vm0, %v663_v13  ;;  %712 = vst.msk [vmem:[#allocation2 + $0xa8] sm:$0xff] %vm247_vm0, %v679_v14  ;;  %v863_v19 = vsel %vm799_vm3, %v767_v1, %v831_v15  ;;  %v768_v21 = vadd.f32 %v1941_v48, %v729_v11  ;;  %v727_v23 = vld [vmem:[#allocation2 + $0x8] sm:$0xff] }
 0x15f   : > { %v879_v20 = vsel %vm815_vm4, %v783_v2, %v847_v16  ;;  %v784_v22 = vadd.f32 %v1941_v48, %v745_v12  ;;  %v743_v24 = vld [vmem:[#allocation2 + $0x88] sm:$0xff]  ;;  %v1262_v25 = vpack.c.bf16 %v863_v19, %v863_v19  ;;  %v861_v27 = vsel %vm797_vm5, %v765_v9, %v829_v17  ;;  %v1328_v30 = vpop.f32.mrb[8].mxu0  ;;  %v1957_v31 = vpop.f32.mrb[8].mxu1  ;;  %v306_v14 = vld [vmem:[#allocation2 + $0xd0] sm:$0xff] }
 0x160   : > { %v1278_v26 = vpack.c.bf16 %v879_v20, %v879_v20  ;;  %v877_v28 = vsel %vm813_vm6, %v781_v10, %v845_v18  ;;  %v1260_v32 = vpack.c.bf16 %v861_v27, %v861_v27  ;;  %vm800_vm7 = vcmp.ge.f32.partialorder %v768_v21, 0.0  ;;  %v1959_v35 = vpop.f32.mrb[9].mxu0  ;;  %v1961_v36 = vpop.f32.mrb[9].mxu1 }
 0x161   : > { %v1276_v33 = vpack.c.bf16 %v877_v28, %v877_v28  ;;  %v832_v34 = vmul.f32 0.2, %v768_v21  ;;  %1024 = vst.msk [vmem:[%s1965_s20 + $0x8] sm:$0xf] %vm1021_vm2, %v1262_v25  ;;  %vm816_vm8 = vcmp.ge.f32.partialorder %v784_v22, 0.0  ;;  %v766_v38 = vadd.f32 %v1941_v48, %v727_v23  ;;  %v732_v40 = vld [vmem:[#allocation2 + $0x30] sm:$0xff] }
 0x162   : > { %1040 = vst.msk [vmem:[%s1965_s20 + $0x48] sm:$0xf] %vm1021_vm2, %v1278_v26  ;;  %v848_v37 = vmul.f32 0.2, %v784_v22  ;;  %v782_v39 = vadd.f32 %v1941_v48, %v743_v24  ;;  %v748_v41 = vld [vmem:[#allocation2 + $0xb0] sm:$0xff]  ;;  %v1973_v42 = vpop.f32.mrb[10].mxu0  ;;  %v771_v44 = vadd.f32 %v1941_v48, %v732_v40  ;;  %v668_v46 = vadd.f32 %v1328_v30, %v290_v29 }
 0x163   : > { %1022 = vst.msk [vmem:[%s1965_s20] sm:$0xf] %vm1021_vm2, %v1260_v32  ;;  %1038 = vst.msk [vmem:[%s1965_s20 + $0x40] sm:$0xf] %vm1021_vm2, %v1276_v33  ;;  %v864_v43 = vsel %vm800_vm7, %v768_v21, %v832_v34  ;;  %v787_v45 = vadd.f32 %v1941_v48, %v748_v41  ;;  %v1982_v47 = vpop.f32.mrb[10].mxu1  ;;  %v1984_v49 = vpop.f32.mrb[11].mxu0  ;;  %v684_v29 = vadd.f32 %v1957_v31, %v306_v14 }
 0x164   : > { %v1263_v50 = vpack.c.bf16 %v864_v43, %v864_v43  ;;  %v880_v51 = vsel %vm816_vm8, %v784_v22, %v848_v37  ;;  %vm798_vm9 = vcmp.ge.f32.partialorder %v766_v38, 0.0  ;;  %v830_v52 = vmul.f32 0.2, %v766_v38  ;;  %v730_v53 = vld [vmem:[#allocation2 + $0x20] sm:$0xff]  ;;  %v1987_v55 = vpop.f32.mrb[11].mxu1  ;;  %v733_v58 = vld [vmem:[#allocation2 + $0x38] sm:$0xff] }
 0x165   : > { %v746_v54 = vld [vmem:[#allocation2 + $0xa0] sm:$0xff]  ;;  %v1279_v56 = vpack.c.bf16 %v880_v51, %v880_v51  ;;  %vm814_vm10 = vcmp.ge.f32.partialorder %v782_v39, 0.0  ;;  %v846_v57 = vmul.f32 0.2, %v782_v39  ;;  %vm803_vm11 = vcmp.ge.f32.partialorder %v771_v44, 0.0  ;;  %701 = vst.msk [vmem:[#allocation2 + $0x50] sm:$0xff] %vm247_vm0, %v668_v46 }
 0x166   : > { %1025 = vst.msk [vmem:[%s1965_s20 + $0xc] sm:$0xf] %vm1021_vm2, %v1263_v50  ;;  %v862_v59 = vsel %vm798_vm9, %v766_v38, %v830_v52  ;;  %v835_v60 = vmul.f32 0.2, %v771_v44  ;;  %vm819_vm12 = vcmp.ge.f32.partialorder %v787_v45, 0.0  ;;  %v769_v0 = vadd.f32 %v1941_v48, %v730_v53  ;;  %v749_v6 = vld [vmem:[#allocation2 + $0xb8] sm:$0xff] }
 0x167   : > { %v851_v61 = vmul.f32 0.2, %v787_v45  ;;  %1041 = vst.msk [vmem:[%s1965_s20 + $0x4c] sm:$0xf] %vm1021_vm2, %v1279_v56  ;;  %v1261_v62 = vpack.c.bf16 %v862_v59, %v862_v59  ;;  %v878_v63 = vsel %vm814_vm10, %v782_v39, %v846_v57  ;;  %v785_v1 = vadd.f32 %v1941_v48, %v746_v54  ;;  %v731_v7 = vld [vmem:[#allocation2 + $0x28] sm:$0xff]  ;;  %v1997_v9 = vpop.f32.mrb[12].mxu0 }
 0x168   : > { %v1277_v2 = vpack.c.bf16 %v878_v63, %v878_v63  ;;  %v867_v3 = vsel %vm803_vm11, %v771_v44, %v835_v60  ;;  %v772_v5 = vadd.f32 %v1941_v48, %v733_v58  ;;  %v747_v8 = vld [vmem:[#allocation2 + $0xa8] sm:$0xff]  ;;  %v1999_v10 = vpop.f32.mrb[12].mxu1  ;;  %vm801_vm13 = vcmp.ge.f32.partialorder %v769_v0, 0.0  ;;  %v2003_v15 = vpop.f32.mrb[13].mxu0  ;;  %v288_v30 = vld [vmem:[#allocation2 + $0x40] sm:$0xff]  ;;  %v291_v40 = vld [vmem:[#allocation2 + $0x58] sm:$0xff] }
 0x169   : > { %v883_v4 = vsel %vm819_vm12, %v787_v45, %v851_v61  ;;  %1023 = vst.msk [vmem:[%s1965_s20 + $0x4] sm:$0xf] %vm1021_vm2, %v1261_v62  ;;  %v1266_v11 = vpack.c.bf16 %v867_v3, %v867_v3  ;;  %v833_v13 = vmul.f32 0.2, %v769_v0  ;;  %v2005_v16 = vpop.f32.mrb[13].mxu1  ;;  %vm817_vm14 = vcmp.ge.f32.partialorder %v785_v1, 0.0 }
 0x16a   : > { %v1282_v12 = vpack.c.bf16 %v883_v4, %v883_v4  ;;  %1039 = vst.msk [vmem:[%s1965_s20 + $0x44] sm:$0xf] %vm1021_vm2, %v1277_v2  ;;  %v849_v17 = vmul.f32 0.2, %v785_v1  ;;  %vm804_vm15 = vcmp.ge.f32.partialorder %v772_v5, 0.0  ;;  %v788_v20 = vadd.f32 %v1941_v48, %v749_v6  ;;  %v2016_v23 = vpop.f32.mrb[14].mxu0 }
 0x16b   : > { %v836_v18 = vmul.f32 0.2, %v772_v5  ;;  %1028 = vst.msk [vmem:[%s1965_s20 + $0x18] sm:$0xf] %vm1021_vm2, %v1266_v11  ;;  %v865_v19 = vsel %vm801_vm13, %v769_v0, %v833_v13  ;;  %v770_v21 = vadd.f32 %v1941_v48, %v731_v7  ;;  %v786_v22 = vadd.f32 %v1941_v48, %v747_v8  ;;  %v2018_v24 = vpop.f32.mrb[14].mxu1  ;;  %v304_v32 = vld [vmem:[#allocation2 + $0xc0] sm:$0xff] }
 0x16c   : > { %1044 = vst.msk [vmem:[%s1965_s20 + $0x58] sm:$0xf] %vm1021_vm2, %v1282_v12  ;;  %v1264_v25 = vpack.c.bf16 %v865_v19, %v865_v19  ;;  %v881_v26 = vsel %vm817_vm14, %v785_v1, %v849_v17  ;;  %v736_v28 = vld [vmem:[#allocation2 + $0x50] sm:$0xff]  ;;  %v582_v33 = vpop.f32.mrb[15].mxu0  ;;  %v2021_v34 = vpop.f32.mrb[15].mxu1  ;;  %vm820_vm1 = vcmp.ge.f32.partialorder %v788_v20, 0.0  ;;  %v666_v46 = vadd.f32 %v1959_v35, %v288_v30 }
 0x16d   : > { %v868_v27 = vsel %vm804_vm15, %v772_v5, %v836_v18  ;;  %v1280_v37 = vpack.c.bf16 %v881_v26, %v881_v26  ;;  %v852_v39 = vmul.f32 0.2, %v788_v20  ;;  %v307_v41 = vld [vmem:[#allocation2 + $0xd8] sm:$0xff]  ;;  %vm802_vm3 = vcmp.ge.f32.partialorder %v770_v21, 0.0  ;;  %717 = vst.msk [vmem:[#allocation2 + $0xd0] sm:$0xff] %vm247_vm0, %v684_v29  ;;  %v289_v51 = vld [vmem:[#allocation2 + $0x48] sm:$0xff] }
 0x16e   : > { %v1267_v38 = vpack.c.bf16 %v868_v27, %v868_v27  ;;  %1026 = vst.msk [vmem:[%s1965_s20 + $0x10] sm:$0xf] %vm1021_vm2, %v1264_v25  ;;  %v834_v43 = vmul.f32 0.2, %v770_v21  ;;  %vm818_vm4 = vcmp.ge.f32.partialorder %v786_v22, 0.0  ;;  %v775_v45 = vadd.f32 %v1941_v48, %v736_v28  ;;  %v305_v52 = vld [vmem:[#allocation2 + $0xc8] sm:$0xff] }
 0x16f   : > { %v850_v44 = vmul.f32 0.2, %v786_v22  ;;  %1042 = vst.msk [vmem:[%s1965_s20 + $0x50] sm:$0xf] %vm1021_vm2, %v1280_v37  ;;  %v884_v31 = vsel %vm820_vm1, %v788_v20, %v852_v39  ;;  %v682_v50 = vadd.f32 %v1961_v36, %v304_v32  ;;  %v294_v53 = vld [vmem:[#allocation2 + $0x70] sm:$0xff]  ;;  %v669_v58 = vadd.f32 %v1973_v42, %v291_v40  ;;  %v292_v60 = vld [vmem:[#allocation2 + $0x60] sm:$0xff] }
 0x170   : > { %1029 = vst.msk [vmem:[%s1965_s20 + $0x1c] sm:$0xf] %vm1021_vm2, %v1267_v38  ;;  %v1283_v54 = vpack.c.bf16 %v884_v31, %v884_v31  ;;  %v866_v56 = vsel %vm802_vm3, %v770_v21, %v834_v43  ;;  %v310_v59 = vld [vmem:[#allocation2 + $0xf0] sm:$0xff]  ;;  %v308_v61 = vld [vmem:[#allocation2 + $0xe0] sm:$0xff]  ;;  %vm807_vm5 = vcmp.ge.f32.partialorder %v775_v45, 0.0  ;;  %v295_v36 = vld [vmem:[#allocation2 + $0x78] sm:$0xff]  ;;  %v685_v42 = vadd.f32 %v1982_v47, %v307_v41 }
 0x171   : > { %v882_v57 = vsel %vm818_vm4, %v786_v22, %v850_v44  ;;  %v1265_v62 = vpack.c.bf16 %v866_v56, %v866_v56  ;;  %v839_v35 = vmul.f32 0.2, %v775_v45  ;;  %699 = vst.msk [vmem:[#allocation2 + $0x40] sm:$0xff] %vm247_vm0, %v666_v46  ;;  %715 = vst.msk [vmem:[#allocation2 + $0xc0] sm:$0xff] %vm247_vm0, %v682_v50  ;;  %v311_v0 = vld [vmem:[#allocation2 + $0xf8] sm:$0xff]  ;;  %v293_v1 = vld [vmem:[#allocation2 + $0x68] sm:$0xff]  ;;  %v667_v2 = vadd.f32 %v1984_v49, %v289_v51 }
 0x172   : > { %v1281_v63 = vpack.c.bf16 %v882_v57, %v882_v57  ;;  %1045 = vst.msk [vmem:[%s1965_s20 + $0x5c] sm:$0xf] %vm1021_vm2, %v1283_v54  ;;  %v683_v3 = vadd.f32 %v1987_v55, %v305_v52  ;;  %v672_v4 = vadd.f32 %v1997_v9, %v294_v53  ;;  %v309_v5 = vld [vmem:[#allocation2 + $0xe8] sm:$0xff]  ;;  %v688_v7 = vadd.f32 %v1999_v10, %v310_v59 }
 0x173   : > { %702 = vst.msk [vmem:[#allocation2 + $0x58] sm:$0xff] %vm247_vm0, %v669_v58  ;;  %v871_v6 = vsel %vm807_vm5, %v775_v45, %v839_v35  ;;  %v670_v8 = vadd.f32 %v2003_v15, %v292_v60  ;;  %v686_v47 = vadd.f32 %v2005_v16, %v308_v61  ;;  %718 = vst.msk [vmem:[#allocation2 + $0xd8] sm:$0xff] %vm247_vm0, %v685_v42 }
 0x174   : > { %1027 = vst.msk [vmem:[%s1965_s20 + $0x14] sm:$0xf] %vm1021_vm2, %v1265_v62  ;;  %1043 = vst.msk [vmem:[%s1965_s20 + $0x54] sm:$0xf] %vm1021_vm2, %v1281_v63  ;;  %v1270_v11 = vpack.c.bf16 %v871_v6, %v871_v6  ;;  %v673_v49 = vadd.f32 %v2016_v23, %v295_v36  ;;  %v689_v55 = vadd.f32 %v2018_v24, %v311_v0  ;;  %v752_v10 = vld [vmem:[#allocation2 + $0xd0] sm:$0xff] }
 0x175   : > { %700 = vst.msk [vmem:[#allocation2 + $0x48] sm:$0xff] %vm247_vm0, %v667_v2  ;;  %716 = vst.msk [vmem:[#allocation2 + $0xc8] sm:$0xff] %vm247_vm0, %v683_v3  ;;  %v671_v9 = vadd.f32 %v582_v33, %v293_v1  ;;  %v687_v12 = vadd.f32 %v2021_v34, %v309_v5  ;;  %v791_v13 = vadd.f32 %v1941_v48, %v752_v10 }
 0x176   : > { %705 = vst.msk [vmem:[#allocation2 + $0x70] sm:$0xff] %vm247_vm0, %v672_v4  ;;  %721 = vst.msk [vmem:[#allocation2 + $0xf0] sm:$0xff] %vm247_vm0, %v688_v7 }
 0x177   : > { %703 = vst.msk [vmem:[#allocation2 + $0x60] sm:$0xff] %vm247_vm0, %v670_v8  ;;  %719 = vst.msk [vmem:[#allocation2 + $0xe0] sm:$0xff] %vm247_vm0, %v686_v47  ;;  %vm823_vm6 = vcmp.ge.f32.partialorder %v791_v13, 0.0  ;;  %v855_v14 = vmul.f32 0.2, %v791_v13 }
 0x178   : > { %1032 = vst.msk [vmem:[%s1965_s20 + $0x28] sm:$0xf] %vm1021_vm2, %v1270_v11  ;;  %v734_v15 = vld [vmem:[#allocation2 + $0x40] sm:$0xff] }
 0x179   : > { %706 = vst.msk [vmem:[#allocation2 + $0x78] sm:$0xff] %vm247_vm0, %v673_v49  ;;  %722 = vst.msk [vmem:[#allocation2 + $0xf8] sm:$0xff] %vm247_vm0, %v689_v55  ;;  %v750_v16 = vld [vmem:[#allocation2 + $0xc0] sm:$0xff]  ;;  %v773_v17 = vadd.f32 %v1941_v48, %v734_v15  ;;  %v887_v20 = vsel %vm823_vm6, %v791_v13, %v855_v14 }
 0x17a   : > { %704 = vst.msk [vmem:[#allocation2 + $0x68] sm:$0xff] %vm247_vm0, %v671_v9  ;;  %720 = vst.msk [vmem:[#allocation2 + $0xe8] sm:$0xff] %vm247_vm0, %v687_v12  ;;  %v789_v18 = vadd.f32 %v1941_v48, %v750_v16  ;;  %v737_v19 = vld [vmem:[#allocation2 + $0x58] sm:$0xff]  ;;  %v1286_v22 = vpack.c.bf16 %v887_v20, %v887_v20 }
 0x17b   : > { %v776_v21 = vadd.f32 %v1941_v48, %v737_v19  ;;  %vm805_vm7 = vcmp.ge.f32.partialorder %v773_v17, 0.0  ;;  %v837_v23 = vmul.f32 0.2, %v773_v17  ;;  %v753_v24 = vld [vmem:[#allocation2 + $0xd8] sm:$0xff] }
 0x17c   : > { %vm821_vm8 = vcmp.ge.f32.partialorder %v789_v18, 0.0  ;;  %v735_v25 = vld [vmem:[#allocation2 + $0x48] sm:$0xff]  ;;  %v853_v26 = vmul.f32 0.2, %v789_v18  ;;  %v792_v28 = vadd.f32 %v1941_v48, %v753_v24  ;;  %1048 = vst.msk [vmem:[%s1965_s20 + $0x68] sm:$0xf] %vm1021_vm2, %v1286_v22 }
 0x17d   : > { %vm808_vm0 = vcmp.ge.f32.partialorder %v776_v21, 0.0  ;;  %v840_v27 = vmul.f32 0.2, %v776_v21  ;;  %v751_v29 = vld [vmem:[#allocation2 + $0xc8] sm:$0xff]  ;;  %v869_v30 = vsel %vm805_vm7, %v773_v17, %v837_v23  ;;  %v774_v32 = vadd.f32 %v1941_v48, %v735_v25  ;;  %v740_v34 = vld [vmem:[#allocation2 + $0x70] sm:$0xff] }
 0x17e   : > { %v790_v33 = vadd.f32 %v1941_v48, %v751_v29  ;;  %v1268_v37 = vpack.c.bf16 %v869_v30, %v869_v30  ;;  %v885_v38 = vsel %vm821_vm8, %v789_v18, %v853_v26  ;;  %vm824_vm9 = vcmp.ge.f32.partialorder %v792_v28, 0.0  ;;  %v756_v40 = vld [vmem:[#allocation2 + $0xf0] sm:$0xff]  ;;  %v738_v41 = vld [vmem:[#allocation2 + $0x60] sm:$0xff] }
 0x17f   : > { %v872_v39 = vsel %vm808_vm0, %v776_v21, %v840_v27  ;;  %v754_v43 = vld [vmem:[#allocation2 + $0xe0] sm:$0xff]  ;;  %v1284_v44 = vpack.c.bf16 %v885_v38, %v885_v38  ;;  %v856_v45 = vmul.f32 0.2, %v792_v28  ;;  %vm806_vm10 = vcmp.ge.f32.partialorder %v774_v32, 0.0 }
 0x180   : > { %v1271_v31 = vpack.c.bf16 %v872_v39, %v872_v39  ;;  %1030 = vst.msk [vmem:[%s1965_s20 + $0x20] sm:$0xf] %vm1021_vm2, %v1268_v37  ;;  %v838_v46 = vmul.f32 0.2, %v774_v32  ;;  %vm822_vm11 = vcmp.ge.f32.partialorder %v790_v33, 0.0  ;;  %v779_v51 = vadd.f32 %v1941_v48, %v740_v34  ;;  %v741_v60 = vld [vmem:[#allocation2 + $0x78] sm:$0xff] }
 0x181   : > { %v854_v50 = vmul.f32 0.2, %v790_v33  ;;  %1046 = vst.msk [vmem:[%s1965_s20 + $0x60] sm:$0xf] %vm1021_vm2, %v1284_v44  ;;  %v888_v52 = vsel %vm824_vm9, %v792_v28, %v856_v45  ;;  %v795_v53 = vadd.f32 %v1941_v48, %v756_v40  ;;  %v777_v54 = vadd.f32 %v1941_v48, %v738_v41  ;;  %v757_v61 = vld [vmem:[#allocation2 + $0xf8] sm:$0xff]  ;;  %v739_v36 = vld [vmem:[#allocation2 + $0x68] sm:$0xff] }
 0x182   : > { %1033 = vst.msk [vmem:[%s1965_s20 + $0x2c] sm:$0xf] %vm1021_vm2, %v1271_v31  ;;  %v793_v56 = vadd.f32 %v1941_v48, %v754_v43  ;;  %v1287_v57 = vpack.c.bf16 %v888_v52, %v888_v52  ;;  %v870_v58 = vsel %vm806_vm10, %v774_v32, %v838_v46  ;;  %vm811_vm12 = vcmp.ge.f32.partialorder %v779_v51, 0.0  ;;  %v755_v47 = vld [vmem:[#allocation2 + $0xe8] sm:$0xff] }
 0x183   : > { %v886_v59 = vsel %vm822_vm11, %v790_v33, %v854_v50  ;;  %v1269_v62 = vpack.c.bf16 %v870_v58, %v870_v58  ;;  %v843_v35 = vmul.f32 0.2, %v779_v51  ;;  %vm827_vm13 = vcmp.ge.f32.partialorder %v795_v53, 0.0 }
 0x184   : > { %v1285_v63 = vpack.c.bf16 %v886_v59, %v886_v59  ;;  %1049 = vst.msk [vmem:[%s1965_s20 + $0x6c] sm:$0xf] %vm1021_vm2, %v1287_v57  ;;  %v859_v0 = vmul.f32 0.2, %v795_v53  ;;  %vm809_vm14 = vcmp.ge.f32.partialorder %v777_v54, 0.0  ;;  %vm825_vm15 = vcmp.ge.f32.partialorder %v793_v56, 0.0 }
 0x185   : > { %v841_v1 = vmul.f32 0.2, %v777_v54  ;;  %1031 = vst.msk [vmem:[%s1965_s20 + $0x24] sm:$0xf] %vm1021_vm2, %v1269_v62  ;;  %v875_v42 = vsel %vm811_vm12, %v779_v51, %v843_v35  ;;  %v857_v2 = vmul.f32 0.2, %v793_v56  ;;  %v780_v3 = vadd.f32 %v1941_v48, %v741_v60 }
 0x186   : > { %1047 = vst.msk [vmem:[%s1965_s20 + $0x64] sm:$0xf] %vm1021_vm2, %v1285_v63  ;;  %v796_v4 = vadd.f32 %v1941_v48, %v757_v61  ;;  %v1274_v5 = vpack.c.bf16 %v875_v42, %v875_v42  ;;  %v891_v6 = vsel %vm827_vm13, %v795_v53, %v859_v0  ;;  %v778_v8 = vadd.f32 %v1941_v48, %v739_v36 }
 0x187   : > { %v873_v7 = vsel %vm809_vm14, %v777_v54, %v841_v1  ;;  %v1290_v11 = vpack.c.bf16 %v891_v6, %v891_v6  ;;  %v889_v55 = vsel %vm825_vm15, %v793_v56, %v857_v2  ;;  %vm812_vm1 = vcmp.ge.f32.partialorder %v780_v3, 0.0 }
 0x188   : > { %v1272_v49 = vpack.c.bf16 %v873_v7, %v873_v7  ;;  %1036 = vst.msk [vmem:[%s1965_s20 + $0x38] sm:$0xf] %vm1021_vm2, %v1274_v5  ;;  %v1288_v9 = vpack.c.bf16 %v889_v55, %v889_v55  ;;  %v844_v10 = vmul.f32 0.2, %v780_v3  ;;  %vm828_vm3 = vcmp.ge.f32.partialorder %v796_v4, 0.0 }
 0x189   : > { %v860_v12 = vmul.f32 0.2, %v796_v4  ;;  %1052 = vst.msk [vmem:[%s1965_s20 + $0x78] sm:$0xf] %vm1021_vm2, %v1290_v11  ;;  %vm810_vm4 = vcmp.ge.f32.partialorder %v778_v8, 0.0  ;;  %v794_v14 = vadd.f32 %v1941_v48, %v755_v47 }
 0x18a   : > { %1034 = vst.msk [vmem:[%s1965_s20 + $0x30] sm:$0xf] %vm1021_vm2, %v1272_v49  ;;  %v842_v13 = vmul.f32 0.2, %v778_v8  ;;  %1050 = vst.msk [vmem:[%s1965_s20 + $0x70] sm:$0xf] %vm1021_vm2, %v1288_v9  ;;  %v876_v15 = vsel %vm812_vm1, %v780_v3, %v844_v10 }
 0x18b   : > { %v892_v16 = vsel %vm828_vm3, %v796_v4, %v860_v12  ;;  %v1275_v17 = vpack.c.bf16 %v876_v15, %v876_v15  ;;  %vm826_vm5 = vcmp.ge.f32.partialorder %v794_v14, 0.0  ;;  %v858_v21 = vmul.f32 0.2, %v794_v14 }
 0x18c   : > { %v1291_v18 = vpack.c.bf16 %v892_v16, %v892_v16  ;;  %v874_v19 = vsel %vm810_vm4, %v778_v8, %v842_v13 }
 0x18d   : > { %v1273_v20 = vpack.c.bf16 %v874_v19, %v874_v19  ;;  %1037 = vst.msk [vmem:[%s1965_s20 + $0x3c] sm:$0xf] %vm1021_vm2, %v1275_v17  ;;  %v890_v48 = vsel %vm826_vm5, %v794_v14, %v858_v21 }
 0x18e   : > { %1053 = vst.msk [vmem:[%s1965_s20 + $0x7c] sm:$0xf] %vm1021_vm2, %v1291_v18  ;;  %v1289_v22 = vpack.c.bf16 %v890_v48, %v890_v48 }
 0x18f   : > { %1035 = vst.msk [vmem:[%s1965_s20 + $0x34] sm:$0xf] %vm1021_vm2, %v1273_v20 }
 0x190   : > { %1051 = vst.msk [vmem:[%s1965_s20 + $0x74] sm:$0xf] %vm1021_vm2, %v1289_v22 }
 0x191   : > { %1562 = shalt.err (!%p1559_p5)
}
 0x192   : > { %s1563_s21 = scalar_lea.hbm %s2115_s26, 2048  ;;  %s1567_s5 = scalar_lea.hbm %s2170_s3, 16384 }
 0x193   : > { %p1564_p9 = scmp.ne.s32.totalorder %s2115_s26, %s1563_s21  ;;  %p1568_p3 = scmp.lt.u32.totalorder %s2115_s26, %s2170_s3 }
 0x194   : > { %p1569_p7 = scmp.lt.u32.totalorder %s1567_s5, %s1563_s21  ;;  %p1571_p2 = scmp.lt.u32.totalorder %s1563_s21, %s2115_s26 }
 0x195   : > { %p1565_p12 = pnand %p1564_p9, %p1795_p11 }
 0x196   : > { %p1570_p10 = por %p1569_p7, %p1568_p3 }
 0x197   : > { %p1566_p1 = pneg %p1565_p12 }
 0x198   : > { %p1572_p4 = por %p1571_p2, %p1570_p10 }
 0x19a   : > { %p1573_p6 = pnand %p1572_p4, %p1566_p1 }
 0x19c   : > { %1576 = shalt.err (!%p1573_p6)
}
 0x19d   : > { %s1644_s20 = smov 64   ;;  %s1645_s22 = smov 4  }
 0x19e   : > { %1366 = dma.vmem_to_hbm [thread:$0]  (%p1795_p11), %s2117_s24, 2048, %s2115_s26, %s1055_s15, %s1644_s20, %s1644_s20, %s1645_s22  }
 0x19f PF: > { %p1388_p8 = scmp.ge.s32.totalorder %s1635_s17, 2  ;;  %s1083_s11 = sand.u32 1, %s1615_s12  }
 0x1a0   : > { %p2187_p13 = scmp.ne.s32.totalorder %s2178_s23, 0  ;;  %s1084_s18 = scalar_lea.sflag [#allocation5], %s1083_s11 }
 0x1a2   : > { %p1380_p0 = pnand %p1388_p8, %p2187_p13 }
 0x1a4   : > { %1610 = dma.done.wait (!%p1380_p0), %s1084_s18, 2048  }
 0x1a5   : > { %1612 = vsyncadd (!%p1380_p0), %s1084_s18, 4294965248  ;;  %s20_s17 = sadd.s32 1, %s1635_s17   ;;  %s2188_s12 = smov %s1619_s13 }
 0x1a6   : > { %p17_p5 = scmp.ge.s32.totalorder %s20_s17, 10   ;;  %s2189_s13 = smov %s1623_s14 }
 0x1a7   : > { %s2190_s14 = smov %s1804_s6  ;;  %s2191_s15 = smov %s1631_s16 }
 0x1a8   : > { %s2192_s16 = smov %s2194_s25  ;;  %19 = sbr.rel (!%p17_p5) target bundleno = 7 (0x7), region = 94 }
 0x1af   :  { %1089 = vsyncpa [#allocation4], 1 }
 0x1b0   :  { %1091 = vsyncpa [#allocation4 + $0x1], 1 }
 0x1b1   :  { %1092 = vsyncpa [#allocation7], 1 }
 0x1b2   :  { %1093 = vsyncpa [#allocation5], 1 }
 0x1b3   :  { %1095 = vsyncpa [#allocation5 + $0x1], 1 }

// kernel: discriminator_forward.9
= control target key start
LH: loop header
LB: loop body
LE: loop exit
PB: predicated region body
PF: predicated region fallthrough
CT: control target
= control target key end

     0   :  { %10 = vsyncpa [#allocation4], 0  ;;  %s2472_s0 = inlined_call_operand.hbm [shape: bf16[512,128], index: 0, kind: input, shape index: {}]   ;;  %s2473_s1 = inlined_call_operand.hbm [shape: bf16[128,16], index: 1, kind: input, shape index: {}]   ;;  %s2474_s2 = inlined_call_operand.hbm [shape: bf16[512,16], index: 2, kind: output, shape index: {0}]   ;;  %s2475_s3 = inlined_call_operand.hbm [shape: f32[1,16], index: 3, kind: output, shape index: {1}]   ;;  %s2476_s4 = inlined_call_operand.hbm [shape: f32[1,16], index: 4, kind: output, shape index: {2}]  }
   0x1   :  { %12 = vsyncpa [#allocation4 + $0x1], 0 }
   0x2   :  { %13 = vsyncpa [#allocation7], 0 }
   0x3   :  { %14 = vsyncpa [#allocation5], 0 }
   0x4   :  { %16 = vsyncpa [#allocation5 + $0x1], 0 }
   0x5   :  { %17 = vsyncpa [#allocation10], 0  ;;  %s1830_s15 = smov 0   ;;  %s1832_s16 = smov 0  }
   0x6   :  { %s1834_s17 = smov 0   ;;  %s1836_s18 = smov 0  }
   0x7   :  { %s1838_s19 = smov 0   ;;  %s1840_s20 = smov 0  }
   0x8 LB: > { %s1274_s21 = sadd.s32 4294967295, %s1792_s20   ;;  %s1275_s22 = sadd.s32 4294967294, %s1792_s20   ;;  %s1792_s20 = sphi %s1840_s20, %s23_s20   ;;  %s1788_s19 = sphi %s1838_s19, %s2504_s19   ;;  %s1784_s18 = sphi %s1836_s18, %s2503_s18   ;;  %s1780_s17 = sphi %s1834_s17, %s2502_s17   ;;  %s1776_s16 = sphi %s1832_s16, %s2501_s16   ;;  %s1772_s15 = sphi %s1830_s15, %s2500_s15  }
   0x9   : > { %p57_p0 = scmp.ne.s32.totalorder %s1776_s16, %s1772_s15  ;;  %p1864_p1 = scmp.eq.s32.totalorder %s1274_s21, 0 }
   0xa   : > { %p1868_p2 = scmp.eq.s32.totalorder %s1274_s21, 1  ;;  %p113_p3 = scmp.eq.s32.totalorder %s1275_s22, 1 }
   0xb   : > { %s2483_s23 = scalar_select %p1864_p1, 1, 0 }
   0xc   : > { %s2484_s24 = scalar_select %p1868_p2, 1, 0 }
   0xd   : > { %p1874_p4 = por %p1864_p1, %p57_p0  ;;  %p1276_p5 = scmp.ge.s32.totalorder %s1792_s20, 1 }
   0xe   : > { %p1879_p6 = por %p113_p3, %p57_p0  ;;  %p162_p7 = scmp.lt.s32.totalorder %s1792_s20, 3 }
   0xf   : > { %s2485_s25 = scalar_select %p1874_p4, 1, 0 }
  0x10   : > { %s2486_s26 = scalar_select %p1879_p6, 1, 0 }
  0x11   : > { %p1884_p8 = pnand %p1276_p5, %p162_p7  ;;  %s1794_s28 = smov [#allocation6]  }
  0x12   : > { %s177_s29 = sshll.u32 %s1794_s28, 4  ;;  %s35_s5 = sadd.s32 1, %s1788_s19  ;;  %s178_s29 = int_to_ptr.vmem [resolvable:$true] %s177_s29 }
  0x13   : > { %s2487_s27 = scalar_select %p1884_p8, 1, 0 }
  0x14   : > { %p1491_p9 = pneg %p1884_p8  ;;  %s1592_s8 = scalar_lea.hbm %s2473_s1, 1024 }
  0x15   : > { %p1593_p12 = scmp.ne.s32.totalorder %s2473_s1, %s1592_s8  ;;  %p1599_p5 = scmp.lt.u32.totalorder %s1592_s8, %s2473_s1 }
  0x16   : > { %p1893_p11 = pnand %p1491_p9, %p1864_p1 }
  0x18   : > { %p1594_p13 = pneg %p1893_p11 }
  0x1a   : > { %p1595_p0 = pnand %p1594_p13, %p1593_p12 }
  0x1c   : > { %p1596_p3 = pneg %p1595_p0 }
  0x1e   : > { %p1601_p7 = pnand %p1599_p5, %p1596_p3 }
  0x20   : > { %1604 = shalt.err (!%p1601_p7)
}
  0x21   : > { %s1605_s13 = scalar_lea.vmem %s178_s29, 1024  ;;  %p1613_p1 = scmp.lt.s32.totalorder %s178_s29, %s178_s29 }
  0x22   : > { %p1606_p9 = scmp.ne.s32.totalorder %s178_s29, %s1605_s13  ;;  %p1614_p4 = scmp.lt.s32.totalorder %s1605_s13, %s1605_s13 }
  0x24   : > { %p1608_p10 = pnand %p1606_p9, %p1594_p13  ;;  %p1615_p8 = por %p1614_p4, %p1613_p1 }
  0x26   : > { %p1609_p6 = pneg %p1608_p10 }
  0x28   : > { %p1616_p2 = pnand %p1615_p8, %p1609_p6 }
  0x2a   : > { %1619 = shalt.err (!%p1616_p2)
}
  0x2b   : > { %s2482_s14 = smov 64   ;;  %s1796_s21 = smov 4  }
  0x2c   : > { %1494 = dma.hbm_to_vmem [thread:$0]  (!%p1893_p11), %s2473_s1, 1024, %s178_s29, [#allocation7], %s2482_s14, %s2482_s14, %s1796_s21  }
  0x2d   : > { %p37_p1 = scmp.ge.s32.totalorder %s35_s5, 2  ;;  %s44_s6 = sadd.s32 1, %s1780_s17 }
  0x2e   : > { %p51_p2 = scmp.ne.s32.totalorder %s1780_s17, %s1776_s16  ;;  %p52_p4 = scmp.eq.s32.totalorder %s1792_s20, 0 }
  0x2f   : > { %s2506_s5 = smov (%p37_p1, %s35_s5), 0  ;;  %p2490_p8 = scmp.ne.s32.totalorder %s2484_s24, 0 }
  0x30   : > { %p1923_p6 = por %p52_p4, %p51_p2  ;;  %s39_s8 = ssub.s32 %s1788_s19, %s2506_s5 }
  0x31   : > { %p1929_p10 = por %p2490_p8, %p51_p2  ;;  %p1504_p12 = scmp.lt.s32.totalorder %s1792_s20, 2 }
  0x32   : > { %p42_p11 = scmp.eq.s32.totalorder %s39_s8, 0  ;;  %s191_s29 = sand.u32 1, %s1780_s17  }
  0x33   : > { %s1279_s9 = sshll.u32 %s191_s29, 7  ;;  %s1352_s11 = sshll.u32 %s1788_s19, 11 }
  0x34   : > { %s1938_s10 = scalar_select %p42_p11, %s1780_s17, %s44_s6  }
  0x35   : > { %s1944_s22 = scalar_lea.hbm %s2472_s0, %s1352_s11  ;;  %s195_s28 = scalar_lea.vmem [#allocation3], %s1279_s9 }
  0x36   : > { %s203_s14 = sshll.u32 %s195_s28, 4  ;;  %p1950_p13 = pnand %p1504_p12, %p1923_p6  ;;  %s1946_s14 = int_to_ptr.vmem [resolvable:$true] %s203_s14 }
  0x37   : > { %s1954_s6 = scalar_lea.sflag [#allocation4], %s191_s29  ;;  %s1620_s12 = scalar_lea.hbm %s1944_s22, 2048 }
  0x38   : > { %p1621_p0 = scmp.ne.s32.totalorder %s1944_s22, %s1620_s12  ;;  %p1622_p3 = pneg %p1950_p13 }
  0x39   : > { %s1625_s7 = scalar_lea.hbm %s2472_s0, 4096  ;;  %p1626_p9 = scmp.lt.u32.totalorder %s1944_s22, %s2472_s0 }
  0x3a   : > { %p1623_p5 = pnand %p1622_p3, %p1621_p0  ;;  %p1627_p1 = scmp.lt.u32.totalorder %s1625_s7, %s1620_s12 }
  0x3b   : > { %p1629_p4 = scmp.lt.u32.totalorder %s1620_s12, %s1944_s22 }
  0x3c   : > { %p1624_p7 = pneg %p1623_p5  ;;  %p1628_p2 = por %p1627_p1, %p1626_p9 }
  0x3e   : > { %p1630_p6 = por %p1629_p4, %p1628_p2 }
  0x40   : > { %p1631_p8 = pnand %p1630_p6, %p1624_p7 }
  0x42   : > { %1634 = shalt.err (!%p1631_p8)
}
  0x43   : > { %s1635_s29 = scalar_lea.vmem %s1946_s14, 2048  ;;  %s1797_s9 = smov [#allocation3]  }
  0x44   : > { %p1636_p12 = scmp.ne.s32.totalorder %s1946_s14, %s1635_s29  ;;  %s1640_s11 = sshll.u32 %s1797_s9, 4  ;;  %s1641_s11 = int_to_ptr.vmem [resolvable:$false] %s1640_s11 }
  0x45   : > { %s1642_s13 = scalar_lea.vmem %s1641_s11, 4096  ;;  %p1643_p5 = scmp.lt.s32.totalorder %s1946_s14, %s1641_s11 }
  0x46   : > { %p1638_p11 = pnand %p1636_p12, %p1622_p3  ;;  %p1644_p9 = scmp.lt.s32.totalorder %s1642_s13, %s1635_s29 }
  0x48   : > { %p1639_p0 = pneg %p1638_p11  ;;  %p1645_p1 = por %p1644_p9, %p1643_p5 }
  0x4a   : > { %p1646_p2 = pnand %p1645_p1, %p1639_p0 }
  0x4c   : > { %1649 = shalt.err (!%p1646_p2)
}
  0x4d   : > { %s2493_s12 = smov 64   ;;  %p2494_p3 = scmp.ne.s32.totalorder %s2487_s27, 0 }
  0x4e   : > { %1498 = dma.hbm_to_vmem [thread:$0]  (!%p1950_p13), %s1944_s22, 2048, %s1946_s14, %s1954_s6, %s2493_s12, %s2493_s12, %s1796_s21  }
  0x4f   : > { %215 = sbr.rel (%p2494_p3) target bundleno = 486 (0x1e6), region = 28  ;;  %s1988_s7 = sand.u32 (!%p2494_p3), 1, %s1776_s16  }
  0x50   : > { %s1283_s28 = sshll.u32 (!%p2494_p3), %s1988_s7, 7  ;;  %s218_s29 = scalar_lea.sflag (!%p2494_p3), [#allocation4], %s1988_s7 }
  0x51   : > { %s1992_s9 = scalar_lea.vmem (!%p2494_p3), [#allocation3], %s1283_s28  ;;  %p2495_p7 = scmp.ne.s32.totalorder (!%p2494_p3), %s2485_s25, 0 }
  0x56   : > { %1755 = dma.done.wait (%p2495_p7), %s218_s29, 2048  }
  0x57   : > { %1757 = vsyncadd (%p2495_p7), %s218_s29, 4294965248  ;;  %p2496_p13 = scmp.ne.s32.totalorder %s2483_s23, 0 }
  0x59   : > { %1759 = dma.done.wait (%p2496_p13), [#allocation7], 1024  }
  0x5a   : > { %1761 = vsyncadd (%p2496_p13), [#allocation7], 4294966272  ;;  %p254_p4 = scmp.eq.s32.totalorder %s1784_s18, 0  ;;  %s2003_s27 = scalar_lea.vmem [#allocation8], %s1283_s28 }
  0x5b   : > { %vm260_vm0 = vcmask (%p254_p4), 122880   ;;  %v1798_v0 = vmov (%p254_p4), 0.0  }
  0x5c   : > { %259 = sbr.rel (!%p254_p4) target bundleno = 99 (0x63), region = 40  ;;  %261 = vst.msk [vmem:[#allocation9] sm:$0x1] (%p254_p4), %vm260_vm0, %v1798_v0  ;;  %262 = vst.msk [vmem:[#allocation11] sm:$0x1] (%p254_p4), %vm260_vm0, %v1798_v0 }
  0x63 PF: > { %v1568_v1 = vld [vmem:[#allocation6] sm:$0xff]   ;;  %vm266_vm1 = vcmask 130048   ;;  %v1569_v2 = vld [vmem:[#allocation6 + $0x8] sm:$0xff]   ;;  %v1799_v3 = vmov 0.0   ;;  %v1570_v4 = vld [vmem:[#allocation6 + $0x10] sm:$0xff]   ;;  %vm912_vm2 = vcmask 125952  }
  0x64   : > { %1411 = vmatprep.subr.bf16.mxu0 %v1568_v1  ;;  %1459 = vmatprep.subr.bf16.mxu1 %v1568_v1  ;;  %269 = vst.msk [vmem:[#allocation2 + $0x10] sm:$0xff] %vm266_vm1, %v1799_v3  ;;  %267 = vst.msk [vmem:[#allocation2] sm:$0xff] %vm266_vm1, %v1799_v3  ;;  %v1571_v5 = vld [vmem:[#allocation6 + $0x18] sm:$0xff]   ;;  %v1576_v6 = vld [vmem:[%s1992_s9] sm:$0xff]   ;;  %s1386_s23 = sshll.u32 %s1784_s18, 11  ;;  %s1136_s25 = sshll.u32 %s2003_s27, 4  ;;  %s2271_s25 = int_to_ptr.vmem [resolvable:$true] %s1136_s25 }
  0x65   : > { %268 = vst.msk [vmem:[#allocation2 + $0x8] sm:$0xff] %vm266_vm1, %v1799_v3  ;;  %270 = vst.msk [vmem:[#allocation2 + $0x18] sm:$0xff] %vm266_vm1, %v1799_v3  ;;  %1412 = vmatpush3.bf16.msra.mxu0 %v1568_v1  ;;  %1467 = vmatpush3.bf16.msra.mxu1 %v1568_v1  ;;  %v1572_v7 = vld [vmem:[#allocation6 + $0x20] sm:$0xff]   ;;  %v1573_v8 = vld [vmem:[#allocation6 + $0x28] sm:$0xff]   ;;  %s2269_s22 = scalar_lea.hbm %s2474_s2, %s1386_s23  ;;  %s1123_s18 = scalar_lea.sflag [#allocation5], %s1988_s7 }
  0x66   : > { %271 = vst.msk [vmem:[#allocation2 + $0x20] sm:$0xff] %vm266_vm1, %v1799_v3  ;;  %272 = vst.msk [vmem:[#allocation2 + $0x28] sm:$0xff] %vm266_vm1, %v1799_v3  ;;  %1413 = vmatprep.subr.bf16.mxu0 %v1569_v2  ;;  %1460 = vmatprep.subr.bf16.mxu1 %v1569_v2  ;;  %v1584_v9 = vld [vmem:[%s1992_s9 + $0x40] sm:$0xff]   ;;  %v1574_v10 = vld [vmem:[#allocation6 + $0x30] sm:$0xff]   ;;  %s1650_s8 = scalar_lea.vmem %s2271_s25, 2048  ;;  %s1800_s6 = smov [#allocation8]  }
  0x67   : > { %273 = vst.msk [vmem:[#allocation2 + $0x30] sm:$0xff] %vm266_vm1, %v1799_v3  ;;  %274 = vst.msk [vmem:[#allocation2 + $0x38] sm:$0xff] %vm266_vm1, %v1799_v3  ;;  %1427 = vmatprep.mubr.bf16.mxu0 %v1576_v6  ;;  %1443 = vmatprep.mubr.bf16.mxu1 %v1584_v9  ;;  %v1575_v11 = vld [vmem:[#allocation6 + $0x38] sm:$0xff]   ;;  %v1577_v12 = vld [vmem:[%s1992_s9 + $0x8] sm:$0xff]   ;;  %p1651_p6 = scmp.ne.s32.totalorder %s2271_s25, %s1650_s8  ;;  %s1654_s11 = sshll.u32 %s1800_s6, 4  ;;  %s1655_s11 = int_to_ptr.vmem [resolvable:$false] %s1654_s11 }
  0x68   : > { %275 = vst.msk [vmem:[#allocation2 + $0x40] sm:$0xff] %vm266_vm1, %v1799_v3  ;;  %276 = vst.msk [vmem:[#allocation2 + $0x48] sm:$0xff] %vm266_vm1, %v1799_v3  ;;  %v1585_v13 = vld [vmem:[%s1992_s9 + $0x48] sm:$0xff]   ;;  %v1578_v14 = vld [vmem:[%s1992_s9 + $0x10] sm:$0xff]   ;;  %s1656_s13 = scalar_lea.vmem %s1655_s11, 4096  ;;  %p1657_p11 = scmp.lt.s32.totalorder %s2271_s25, %s1655_s11 }
  0x69   : > { %277 = vst.msk [vmem:[#allocation2 + $0x50] sm:$0xff] %vm266_vm1, %v1799_v3  ;;  %278 = vst.msk [vmem:[#allocation2 + $0x58] sm:$0xff] %vm266_vm1, %v1799_v3  ;;  %1414 = vmatpush3.bf16.msra.mxu0 %v1569_v2  ;;  %1468 = vmatpush3.bf16.msra.mxu1 %v1569_v2  ;;  %v1586_v15 = vld [vmem:[%s1992_s9 + $0x50] sm:$0xff]   ;;  %v1579_v16 = vld [vmem:[%s1992_s9 + $0x18] sm:$0xff]   ;;  %p1652_p8 = pnand %p1651_p6, %p1929_p10  ;;  %p1658_p0 = scmp.lt.s32.totalorder %s1656_s13, %s1650_s8 }
  0x6a   : > { %279 = vst.msk [vmem:[#allocation2 + $0x60] sm:$0xff] %vm266_vm1, %v1799_v3  ;;  %280 = vst.msk [vmem:[#allocation2 + $0x68] sm:$0xff] %vm266_vm1, %v1799_v3  ;;  %1415 = vmatprep.subr.bf16.mxu0 %v1570_v4  ;;  %1461 = vmatprep.subr.bf16.mxu1 %v1570_v4  ;;  %v1587_v17 = vld [vmem:[%s1992_s9 + $0x58] sm:$0xff]   ;;  %v1580_v18 = vld [vmem:[%s1992_s9 + $0x20] sm:$0xff]  }
  0x6b   : > { %281 = vst.msk [vmem:[#allocation2 + $0x70] sm:$0xff] %vm266_vm1, %v1799_v3  ;;  %282 = vst.msk [vmem:[#allocation2 + $0x78] sm:$0xff] %vm266_vm1, %v1799_v3  ;;  %v1588_v19 = vld [vmem:[%s1992_s9 + $0x60] sm:$0xff]   ;;  %v1581_v20 = vld [vmem:[%s1992_s9 + $0x28] sm:$0xff]   ;;  %p1653_p12 = pneg %p1652_p8  ;;  %p1659_p5 = por %p1658_p0, %p1657_p11 }
  0x6c   : > { %283 = vst.msk [vmem:[#allocation2 + $0x80] sm:$0xff] %vm266_vm1, %v1799_v3  ;;  %284 = vst.msk [vmem:[#allocation2 + $0x88] sm:$0xff] %vm266_vm1, %v1799_v3  ;;  %v1589_v21 = vld [vmem:[%s1992_s9 + $0x68] sm:$0xff]   ;;  %v1582_v22 = vld [vmem:[%s1992_s9 + $0x30] sm:$0xff]  }
  0x6d   : > { %285 = vst.msk [vmem:[#allocation2 + $0x90] sm:$0xff] %vm266_vm1, %v1799_v3  ;;  %286 = vst.msk [vmem:[#allocation2 + $0x98] sm:$0xff] %vm266_vm1, %v1799_v3  ;;  %1416 = vmatpush3.bf16.msra.mxu0 %v1570_v4  ;;  %1469 = vmatpush3.bf16.msra.mxu1 %v1570_v4  ;;  %v1590_v23 = vld [vmem:[%s1992_s9 + $0x70] sm:$0xff]   ;;  %v1583_v24 = vld [vmem:[%s1992_s9 + $0x38] sm:$0xff]   ;;  %p1660_p9 = pnand %p1659_p5, %p1653_p12 }
  0x6e   : > { %287 = vst.msk [vmem:[#allocation2 + $0xa0] sm:$0xff] %vm266_vm1, %v1799_v3  ;;  %288 = vst.msk [vmem:[#allocation2 + $0xa8] sm:$0xff] %vm266_vm1, %v1799_v3  ;;  %1417 = vmatprep.subr.bf16.mxu0 %v1571_v5  ;;  %1462 = vmatprep.subr.bf16.mxu1 %v1571_v5  ;;  %v1591_v25 = vld [vmem:[%s1992_s9 + $0x78] sm:$0xff]   ;;  %v301_v26 = vld [vmem:[#allocation2 + $0x10] sm:$0xff] }
  0x6f   : > { %289 = vst.msk [vmem:[#allocation2 + $0xb0] sm:$0xff] %vm266_vm1, %v1799_v3  ;;  %290 = vst.msk [vmem:[#allocation2 + $0xb8] sm:$0xff] %vm266_vm1, %v1799_v3  ;;  %v299_v28 = vld [vmem:[#allocation2] sm:$0xff]  ;;  %v302_v31 = vld [vmem:[#allocation2 + $0x18] sm:$0xff] }
  0x70   : > { %291 = vst.msk [vmem:[#allocation2 + $0xc0] sm:$0xff] %vm266_vm1, %v1799_v3  ;;  %292 = vst.msk [vmem:[#allocation2 + $0xc8] sm:$0xff] %vm266_vm1, %v1799_v3  ;;  %v300_v36 = vld [vmem:[#allocation2 + $0x8] sm:$0xff]  ;;  %v305_v50 = vld [vmem:[#allocation2 + $0x30] sm:$0xff] }
  0x71   : > { %293 = vst.msk [vmem:[#allocation2 + $0xd0] sm:$0xff] %vm266_vm1, %v1799_v3  ;;  %294 = vst.msk [vmem:[#allocation2 + $0xd8] sm:$0xff] %vm266_vm1, %v1799_v3  ;;  %1418 = vmatpush3.bf16.msra.mxu0 %v1571_v5  ;;  %1470 = vmatpush3.bf16.msra.mxu1 %v1571_v5  ;;  %v303_v52 = vld [vmem:[#allocation2 + $0x20] sm:$0xff]  ;;  %v306_v55 = vld [vmem:[#allocation2 + $0x38] sm:$0xff] }
  0x72   : > { %295 = vst.msk [vmem:[#allocation2 + $0xe0] sm:$0xff] %vm266_vm1, %v1799_v3  ;;  %296 = vst.msk [vmem:[#allocation2 + $0xe8] sm:$0xff] %vm266_vm1, %v1799_v3  ;;  %1419 = vmatprep.subr.bf16.mxu0 %v1572_v7  ;;  %1463 = vmatprep.subr.bf16.mxu1 %v1572_v7  ;;  %v304_v59 = vld [vmem:[#allocation2 + $0x28] sm:$0xff] }
  0x73   : > { %297 = vst.msk [vmem:[#allocation2 + $0xf0] sm:$0xff] %vm266_vm1, %v1799_v3  ;;  %298 = vst.msk [vmem:[#allocation2 + $0xf8] sm:$0xff] %vm266_vm1, %v1799_v3  ;;  %v315_v29 = vld [vmem:[#allocation2 + $0x80] sm:$0xff]  ;;  %v316_v39 = vld [vmem:[#allocation2 + $0x88] sm:$0xff] }
  0x74   : > { %v317_v27 = vld [vmem:[#allocation2 + $0x90] sm:$0xff]  ;;  %v318_v33 = vld [vmem:[#allocation2 + $0x98] sm:$0xff] }
  0x75   : > { %1420 = vmatpush3.bf16.msra.mxu0 %v1572_v7  ;;  %1471 = vmatpush3.bf16.msra.mxu1 %v1572_v7  ;;  %v319_v53 = vld [vmem:[#allocation2 + $0xa0] sm:$0xff] }
  0x76   : > { %1421 = vmatprep.subr.bf16.mxu0 %v1573_v8  ;;  %1464 = vmatprep.subr.bf16.mxu1 %v1573_v8  ;;  %v321_v51 = vld [vmem:[#allocation2 + $0xb0] sm:$0xff] }
  0x79   : > { %1422 = vmatpush3.bf16.msra.mxu0 %v1573_v8  ;;  %1472 = vmatpush3.bf16.msra.mxu1 %v1573_v8 }
  0x7a   : > { %1423 = vmatprep.subr.bf16.mxu0 %v1574_v10  ;;  %1465 = vmatprep.subr.bf16.mxu1 %v1574_v10 }
  0x7d   : > { %1424 = vmatpush3.bf16.msra.mxu0 %v1574_v10  ;;  %1473 = vmatpush3.bf16.msra.mxu1 %v1574_v10 }
  0x7e   : > { %1425 = vmatprep.subr.bf16.mxu0 %v1575_v11  ;;  %1466 = vmatprep.subr.bf16.mxu1 %v1575_v11 }
  0x81   : > { %1426 = vmatpush3.bf16.msra.mxu0 %v1575_v11  ;;  %1474 = vmatpush3.bf16.msra.mxu1 %v1575_v11 }
  0x84   : > { %1428 = vmatmul.mubr.bf16.vlgmr.msra.gmra.mrb[0].mxu0 %v1577_v12  ;;  %1444 = vmatmul.mubr.bf16.vlgmr.msra.gmra.mrb[0].mxu1 %v1585_v13 }
  0x85   : > { %1431 = vmatprep.mubr.bf16.mxu0 %v1578_v14  ;;  %1447 = vmatprep.mubr.bf16.mxu1 %v1586_v15 }
  0x8c   : > { %1432 = vmatmul.mubr.bf16.gmra.mrb[4].mxu0 %v1579_v16  ;;  %1448 = vmatmul.mubr.bf16.gmra.mrb[4].mxu1 %v1587_v17 }
  0x8d   : > { %1435 = vmatprep.mubr.bf16.mxu0 %v1580_v18  ;;  %1451 = vmatprep.mubr.bf16.mxu1 %v1588_v19 }
  0x94   : > { %1436 = vmatmul.mubr.bf16.gmra.mrb[8].mxu0 %v1581_v20  ;;  %1452 = vmatmul.mubr.bf16.gmra.mrb[8].mxu1 %v1589_v21  ;;  %v309_v21 = vld [vmem:[#allocation2 + $0x50] sm:$0xff] }
  0x95   : > { %1439 = vmatprep.mubr.bf16.mxu0 %v1582_v22  ;;  %1455 = vmatprep.mubr.bf16.mxu1 %v1590_v23 }
  0x9c   : > { %1440 = vmatmul.mubr.bf16.gmra.mrb[12].mxu0 %v1583_v24  ;;  %1456 = vmatmul.mubr.bf16.gmra.mrb[12].mxu1 %v1591_v25  ;;  %v307_v25 = vld [vmem:[#allocation2 + $0x40] sm:$0xff] }
 0x157   : > { %v1429_v30 = vpop.f32.mrb[0].mxu0  ;;  %v1445_v32 = vpop.f32.mrb[0].mxu1 }
 0x158   : > { %v686_v34 = vadd.f32 %v1429_v30, %v301_v26  ;;  %v557_v35 = vpop.f32.mrb[1].mxu0  ;;  %v702_v37 = vadd.f32 %v1445_v32, %v317_v27  ;;  %v621_v38 = vpop.f32.mrb[1].mxu1 }
 0x159   : > { %v684_v40 = vadd.f32 %v557_v35, %v299_v28  ;;  %v1430_v41 = vpop.f32.mrb[2].mxu0  ;;  %v700_v42 = vadd.f32 %v621_v38, %v315_v29  ;;  %v1446_v43 = vpop.f32.mrb[2].mxu1 }
 0x15a   : > { %719 = vst.msk [vmem:[#allocation2 + $0x10] sm:$0xff] %vm266_vm1, %v686_v34  ;;  %v687_v44 = vadd.f32 %v1430_v41, %v302_v31  ;;  %v560_v45 = vpop.f32.mrb[3].mxu0  ;;  %735 = vst.msk [vmem:[#allocation2 + $0x90] sm:$0xff] %vm266_vm1, %v702_v37  ;;  %v703_v46 = vadd.f32 %v1446_v43, %v318_v33  ;;  %v624_v47 = vpop.f32.mrb[3].mxu1 }
 0x15b   : > { %717 = vst.msk [vmem:[#allocation2] sm:$0xff] %vm266_vm1, %v684_v40  ;;  %v685_v48 = vadd.f32 %v560_v45, %v300_v36  ;;  %733 = vst.msk [vmem:[#allocation2 + $0x80] sm:$0xff] %vm266_vm1, %v700_v42  ;;  %v701_v49 = vadd.f32 %v624_v47, %v316_v39 }
 0x15c   : > { %720 = vst.msk [vmem:[#allocation2 + $0x18] sm:$0xff] %vm266_vm1, %v687_v44  ;;  %736 = vst.msk [vmem:[#allocation2 + $0x98] sm:$0xff] %vm266_vm1, %v703_v46 }
 0x15d   : > { %718 = vst.msk [vmem:[#allocation2 + $0x8] sm:$0xff] %vm266_vm1, %v685_v48  ;;  %734 = vst.msk [vmem:[#allocation2 + $0x88] sm:$0xff] %vm266_vm1, %v701_v49 }
 0x15f   : > { %v1433_v54 = vpop.f32.mrb[4].mxu0  ;;  %v1449_v56 = vpop.f32.mrb[4].mxu1 }
 0x160   : > { %v690_v57 = vadd.f32 %v1433_v54, %v305_v50  ;;  %v573_v58 = vpop.f32.mrb[5].mxu0  ;;  %v706_v60 = vadd.f32 %v1449_v56, %v321_v51  ;;  %v637_v61 = vpop.f32.mrb[5].mxu1 }
 0x161   : > { %v754_v62 = vld [vmem:[#allocation2 + $0x10] sm:$0xff]  ;;  %v688_v63 = vadd.f32 %v573_v58, %v303_v52  ;;  %v1434_v0 = vpop.f32.mrb[6].mxu0  ;;  %v704_v1 = vadd.f32 %v637_v61, %v319_v53  ;;  %v2061_v2 = vpop.f32.mrb[6].mxu1  ;;  %v310_v58 = vld [vmem:[#allocation2 + $0x58] sm:$0xff] }
 0x162   : > { %v1356_v3 = vpack.c.bf16 %v754_v62, %v754_v62  ;;  %v752_v4 = vld [vmem:[#allocation2] sm:$0xff]  ;;  %723 = vst.msk [vmem:[#allocation2 + $0x30] sm:$0xff] %vm266_vm1, %v690_v57  ;;  %v691_v5 = vadd.f32 %v1434_v0, %v306_v55  ;;  %v576_v6 = vpop.f32.mrb[7].mxu0  ;;  %739 = vst.msk [vmem:[#allocation2 + $0xb0] sm:$0xff] %vm266_vm1, %v706_v60  ;;  %v2065_v7 = vpop.f32.mrb[7].mxu1  ;;  %v2068_v12 = vld [vmem:[#allocation2 + $0x90] sm:$0xff]  ;;  %v1021_v13 = vmul.f32 %v754_v62, %v754_v62 }
 0x163   : > { %v1354_v8 = vpack.c.bf16 %v752_v4, %v752_v4  ;;  %v1019_v9 = vmul.f32 %v752_v4, %v752_v4  ;;  %v755_v10 = vld [vmem:[#allocation2 + $0x18] sm:$0xff]  ;;  %721 = vst.msk [vmem:[#allocation2 + $0x20] sm:$0xff] %vm266_vm1, %v688_v63  ;;  %v689_v11 = vadd.f32 %v576_v6, %v304_v59  ;;  %737 = vst.msk [vmem:[#allocation2 + $0xa0] sm:$0xff] %vm266_vm1, %v704_v1  ;;  %v2074_v16 = vld [vmem:[#allocation2 + $0x80] sm:$0xff]  ;;  %v946_v17 = vsel %vm266_vm1, %v752_v4, 0.0 }
 0x164   : > { %915 = vst.msk [vmem:[%s2003_s27 + $0x8] sm:$0xf] %vm912_vm2, %v1356_v3  ;;  %v1357_v14 = vpack.c.bf16 %v755_v10, %v755_v10  ;;  %v753_v15 = vld [vmem:[#allocation2 + $0x8] sm:$0xff]  ;;  %v2081_v22 = vld [vmem:[#allocation2 + $0x98] sm:$0xff]  ;;  %v1022_v23 = vmul.f32 %v755_v10, %v755_v10  ;;  %v1372_v26 = vpack.c.bf16 %v2068_v12, %v2068_v12  ;;  %v949_v28 = vsel %vm266_vm1, %v754_v62, 0.0  ;;  %v313_v4 = vld [vmem:[#allocation2 + $0x70] sm:$0xff] }
 0x165   : > { %724 = vst.msk [vmem:[#allocation2 + $0x38] sm:$0xff] %vm266_vm1, %v691_v5  ;;  %v1355_v18 = vpack.c.bf16 %v753_v15, %v753_v15  ;;  %v947_v19 = vsel %vm266_vm1, %v753_v15, 0.0  ;;  %v1020_v20 = vmul.f32 %v753_v15, %v753_v15  ;;  %722 = vst.msk [vmem:[#allocation2 + $0x28] sm:$0xff] %vm266_vm1, %v689_v11  ;;  %v2087_v27 = vld [vmem:[#allocation2 + $0x88] sm:$0xff]  ;;  %v1051_v29 = vsel %vm266_vm1, %v1019_v9, 0.0  ;;  %v322_v5 = vld [vmem:[#allocation2 + $0xb8] sm:$0xff] }
 0x166   : > { %913 = vst.msk [vmem:[%s2003_s27] sm:$0xf] %vm912_vm2, %v1354_v8  ;;  %916 = vst.msk [vmem:[%s2003_s27 + $0xc] sm:$0xf] %vm912_vm2, %v1357_v14  ;;  %v948_v24 = vadd.f32 %v947_v19, %v946_v17  ;;  %v1370_v32 = vpack.c.bf16 %v2074_v16, %v2074_v16  ;;  %v1373_v38 = vpack.c.bf16 %v2081_v22, %v2081_v22  ;;  %v1054_v40 = vsel %vm266_vm1, %v1021_v13, 0.0  ;;  %v308_v62 = vld [vmem:[#allocation2 + $0x48] sm:$0xff] }
 0x167   : > { %914 = vst.msk [vmem:[%s2003_s27 + $0x4] sm:$0xf] %vm912_vm2, %v1355_v18  ;;  %v1052_v30 = vsel %vm266_vm1, %v1020_v20, 0.0  ;;  %v1437_v31 = vpop.f32.mrb[8].mxu0  ;;  %v2096_v33 = vpop.f32.mrb[8].mxu1  ;;  %v1371_v44 = vpack.c.bf16 %v2087_v27, %v2087_v27  ;;  %v951_v46 = vsel %vm266_vm1, %v755_v10, 0.0 }
 0x168   : > { %v950_v34 = vadd.f32 %v949_v28, %v948_v24  ;;  %v1053_v35 = vadd.f32 %v1052_v30, %v1051_v29  ;;  %v694_v36 = vadd.f32 %v1437_v31, %v309_v21  ;;  %v589_v37 = vpop.f32.mrb[9].mxu0  ;;  %931 = vst.msk [vmem:[%s2003_s27 + $0x48] sm:$0xf] %vm912_vm2, %v1372_v26  ;;  %v2102_v39 = vpop.f32.mrb[9].mxu1  ;;  %929 = vst.msk [vmem:[%s2003_s27 + $0x40] sm:$0xf] %vm912_vm2, %v1370_v32 }
 0x169   : > { %v758_v41 = vld [vmem:[#allocation2 + $0x30] sm:$0xff]  ;;  %v692_v42 = vadd.f32 %v589_v37, %v307_v25  ;;  %v1438_v43 = vpop.f32.mrb[10].mxu0  ;;  %v2109_v45 = vpop.f32.mrb[10].mxu1  ;;  %v1056_v47 = vsel %vm266_vm1, %v1022_v23, 0.0  ;;  %932 = vst.msk [vmem:[%s2003_s27 + $0x4c] sm:$0xf] %vm912_vm2, %v1373_v38  ;;  %v707_v26 = vadd.f32 %v2061_v2, %v322_v5 }
 0x16a   : > { %v1055_v48 = vadd.f32 %v1054_v40, %v1053_v35  ;;  %v1360_v49 = vpack.c.bf16 %v758_v41, %v758_v41  ;;  %v756_v50 = vld [vmem:[#allocation2 + $0x20] sm:$0xff]  ;;  %727 = vst.msk [vmem:[#allocation2 + $0x50] sm:$0xff] %vm266_vm1, %v694_v36  ;;  %v592_v51 = vpop.f32.mrb[11].mxu0  ;;  %v2116_v52 = vpop.f32.mrb[11].mxu1  ;;  %v952_v54 = vadd.f32 %v951_v46, %v950_v34  ;;  %v1025_v63 = vmul.f32 %v758_v41, %v758_v41  ;;  %v320_v13 = vld [vmem:[#allocation2 + $0xa8] sm:$0xff]  ;;  %v314_v19 = vld [vmem:[#allocation2 + $0x78] sm:$0xff] }
 0x16b   : > { %v1358_v53 = vpack.c.bf16 %v756_v50, %v756_v50  ;;  %v953_v55 = vsel %vm266_vm1, %v756_v50, 0.0  ;;  %v1023_v56 = vmul.f32 %v756_v50, %v756_v50  ;;  %725 = vst.msk [vmem:[#allocation2 + $0x40] sm:$0xff] %vm266_vm1, %v692_v42  ;;  %v695_v10 = vadd.f32 %v1438_v43, %v310_v58  ;;  %v311_v11 = vld [vmem:[#allocation2 + $0x60] sm:$0xff]  ;;  %v312_v35 = vld [vmem:[#allocation2 + $0x68] sm:$0xff]  ;;  %v325_v37 = vld [vmem:[#allocation2 + $0xd0] sm:$0xff] }
 0x16c   : > { %v759_v57 = vld [vmem:[#allocation2 + $0x38] sm:$0xff]  ;;  %930 = vst.msk [vmem:[%s2003_s27 + $0x44] sm:$0xf] %vm912_vm2, %v1371_v44  ;;  %919 = vst.msk [vmem:[%s2003_s27 + $0x18] sm:$0xf] %vm912_vm2, %v1360_v49  ;;  %v1057_v59 = vadd.f32 %v1056_v47, %v1055_v48  ;;  %v757_v61 = vld [vmem:[#allocation2 + $0x28] sm:$0xff]  ;;  %v954_v0 = vadd.f32 %v953_v55, %v952_v54  ;;  %v693_v17 = vadd.f32 %v592_v51, %v308_v62 }
 0x16d   : > { %v1361_v60 = vpack.c.bf16 %v759_v57, %v759_v57  ;;  %917 = vst.msk [vmem:[%s2003_s27 + $0x10] sm:$0xf] %vm912_vm2, %v1358_v53  ;;  %v1058_v1 = vsel %vm266_vm1, %v1023_v56, 0.0  ;;  %v1359_v3 = vpack.c.bf16 %v757_v61, %v757_v61  ;;  %v955_v8 = vsel %vm266_vm1, %v757_v61, 0.0  ;;  %v323_v46 = vld [vmem:[#allocation2 + $0xc0] sm:$0xff]  ;;  %v326_v51 = vld [vmem:[#allocation2 + $0xd8] sm:$0xff] }
 0x16e   : > { %v1059_v6 = vadd.f32 %v1058_v1, %v1057_v59  ;;  %v1024_v9 = vmul.f32 %v757_v61, %v757_v61  ;;  %v957_v14 = vsel %vm266_vm1, %v758_v41, 0.0  ;;  %v956_v15 = vadd.f32 %v955_v8, %v954_v0  ;;  %728 = vst.msk [vmem:[#allocation2 + $0x58] sm:$0xff] %vm266_vm1, %v695_v10  ;;  %726 = vst.msk [vmem:[#allocation2 + $0x48] sm:$0xff] %vm266_vm1, %v693_v17  ;;  %v324_v53 = vld [vmem:[#allocation2 + $0xc8] sm:$0xff]  ;;  %v329_v54 = vld [vmem:[#allocation2 + $0xf0] sm:$0xff] }
 0x16f   : > { %920 = vst.msk [vmem:[%s2003_s27 + $0x1c] sm:$0xf] %vm912_vm2, %v1361_v60  ;;  %918 = vst.msk [vmem:[%s2003_s27 + $0x14] sm:$0xf] %vm912_vm2, %v1359_v3  ;;  %v1441_v18 = vpop.f32.mrb[12].mxu0  ;;  %v1457_v20 = vpop.f32.mrb[12].mxu1  ;;  %v1026_v21 = vmul.f32 %v759_v57, %v759_v57  ;;  %v705_v36 = vadd.f32 %v2065_v7, %v320_v13  ;;  %v708_v0 = vadd.f32 %v2102_v39, %v323_v46 }
 0x170   : > { %v1060_v23 = vsel %vm266_vm1, %v1024_v9, 0.0  ;;  %v698_v24 = vadd.f32 %v1441_v18, %v313_v4  ;;  %v605_v25 = vpop.f32.mrb[13].mxu0  ;;  %v669_v28 = vpop.f32.mrb[13].mxu1  ;;  %v958_v29 = vadd.f32 %v957_v14, %v956_v15  ;;  %v1062_v40 = vsel %vm266_vm1, %v1025_v63, 0.0  ;;  %740 = vst.msk [vmem:[#allocation2 + $0xb8] sm:$0xff] %vm266_vm1, %v707_v26  ;;  %v327_v58 = vld [vmem:[#allocation2 + $0xe0] sm:$0xff] }
 0x171   : > { %v1061_v30 = vadd.f32 %v1060_v23, %v1059_v6  ;;  %v2136_v31 = vld [vmem:[#allocation2 + $0x50] sm:$0xff]  ;;  %v696_v32 = vadd.f32 %v605_v25, %v311_v11  ;;  %v1442_v34 = vpop.f32.mrb[14].mxu0  ;;  %v1458_v38 = vpop.f32.mrb[14].mxu1  ;;  %v959_v41 = vsel %vm266_vm1, %v759_v57, 0.0  ;;  %738 = vst.msk [vmem:[#allocation2 + $0xa8] sm:$0xff] %vm266_vm1, %v705_v36  ;;  %v1064_v55 = vsel %vm266_vm1, %v1026_v21, 0.0 }
 0x172   : > { %v1364_v2 = vpack.c.bf16 %v2136_v31, %v2136_v31  ;;  %v760_v42 = vld [vmem:[#allocation2 + $0x40] sm:$0xff]  ;;  %731 = vst.msk [vmem:[#allocation2 + $0x70] sm:$0xff] %vm266_vm1, %v698_v24  ;;  %v699_v43 = vadd.f32 %v1442_v34, %v314_v19  ;;  %v608_v44 = vpop.f32.mrb[15].mxu0  ;;  %v672_v47 = vpop.f32.mrb[15].mxu1  ;;  %v960_v49 = vadd.f32 %v959_v41, %v958_v29  ;;  %v330_v59 = vld [vmem:[#allocation2 + $0xf8] sm:$0xff]  ;;  %v328_v60 = vld [vmem:[#allocation2 + $0xe8] sm:$0xff]  ;;  %v710_v63 = vadd.f32 %v2096_v33, %v325_v37 }
 0x173   : > { %v1063_v7 = vadd.f32 %v1062_v40, %v1061_v30  ;;  %v1362_v48 = vpack.c.bf16 %v760_v42, %v760_v42  ;;  %v961_v50 = vsel %vm266_vm1, %v760_v42, 0.0  ;;  %729 = vst.msk [vmem:[#allocation2 + $0x60] sm:$0xff] %vm266_vm1, %v696_v32  ;;  %v1027_v56 = vmul.f32 %v760_v42, %v760_v42  ;;  %v2157_v1 = vld [vmem:[#allocation2 + $0xa0] sm:$0xff]  ;;  %v2163_v8 = vld [vmem:[#allocation2 + $0xb0] sm:$0xff]  ;;  %741 = vst.msk [vmem:[#allocation2 + $0xc0] sm:$0xff] %vm266_vm1, %v708_v0 }
 0x174   : > { %923 = vst.msk [vmem:[%s2003_s27 + $0x28] sm:$0xf] %vm912_vm2, %v1364_v2  ;;  %v697_v57 = vadd.f32 %v608_v44, %v312_v35  ;;  %v962_v61 = vadd.f32 %v961_v50, %v960_v49  ;;  %v711_v4 = vadd.f32 %v2109_v45, %v326_v51  ;;  %v709_v5 = vadd.f32 %v2116_v52, %v324_v53 }
 0x175   : > { %732 = vst.msk [vmem:[#allocation2 + $0x78] sm:$0xff] %vm266_vm1, %v699_v43  ;;  %v1065_v62 = vadd.f32 %v1064_v55, %v1063_v7  ;;  %v1066_v3 = vsel %vm266_vm1, %v1027_v56, 0.0  ;;  %v714_v6 = vadd.f32 %v1457_v20, %v329_v54  ;;  %v1029_v9 = vmul.f32 %v2136_v31, %v2136_v31  ;;  %v763_v10 = vld [vmem:[#allocation2 + $0x58] sm:$0xff]  ;;  %743 = vst.msk [vmem:[#allocation2 + $0xd0] sm:$0xff] %vm266_vm1, %v710_v63  ;;  %v761_v15 = vld [vmem:[#allocation2 + $0x48] sm:$0xff] }
 0x176   : > { %921 = vst.msk [vmem:[%s2003_s27 + $0x20] sm:$0xf] %vm912_vm2, %v1362_v48  ;;  %v712_v33 = vadd.f32 %v669_v28, %v327_v58  ;;  %v715_v39 = vadd.f32 %v1458_v38, %v330_v59  ;;  %v713_v11 = vadd.f32 %v672_v47, %v328_v60  ;;  %v1365_v14 = vpack.c.bf16 %v763_v10, %v763_v10 }
 0x177   : > { %730 = vst.msk [vmem:[#allocation2 + $0x68] sm:$0xff] %vm266_vm1, %v697_v57  ;;  %v1067_v13 = vadd.f32 %v1066_v3, %v1065_v62  ;;  %v1030_v45 = vmul.f32 %v763_v10, %v763_v10  ;;  %744 = vst.msk [vmem:[#allocation2 + $0xd8] sm:$0xff] %vm266_vm1, %v711_v4  ;;  %v1374_v52 = vpack.c.bf16 %v2157_v1, %v2157_v1  ;;  %v963_v18 = vsel %vm266_vm1, %v761_v15, 0.0  ;;  %v2204_v38 = vld [vmem:[#allocation2 + $0xb8] sm:$0xff] }
 0x178   : > { %742 = vst.msk [vmem:[#allocation2 + $0xc8] sm:$0xff] %vm266_vm1, %v709_v5  ;;  %747 = vst.msk [vmem:[#allocation2 + $0xf0] sm:$0xff] %vm266_vm1, %v714_v6  ;;  %v1363_v17 = vpack.c.bf16 %v761_v15, %v761_v15  ;;  %v1028_v19 = vmul.f32 %v761_v15, %v761_v15  ;;  %v1376_v21 = vpack.c.bf16 %v2163_v8, %v2163_v8  ;;  %v2186_v26 = vld [vmem:[#allocation2 + $0xa8] sm:$0xff]  ;;  %v965_v28 = vsel %vm266_vm1, %v2136_v31, 0.0 }
 0x179   : > { %v2175_v20 = vld [vmem:[#allocation2 + $0x70] sm:$0xff]  ;;  %745 = vst.msk [vmem:[#allocation2 + $0xe0] sm:$0xff] %vm266_vm1, %v712_v33  ;;  %748 = vst.msk [vmem:[#allocation2 + $0xf8] sm:$0xff] %vm266_vm1, %v715_v39  ;;  %v964_v23 = vadd.f32 %v963_v18, %v962_v61  ;;  %v1070_v29 = vsel %vm266_vm1, %v1029_v9, 0.0  ;;  %v967_v40 = vsel %vm266_vm1, %v763_v10, 0.0  ;;  %v1072_v41 = vsel %vm266_vm1, %v1030_v45, 0.0 }
 0x17a   : > { %746 = vst.msk [vmem:[#allocation2 + $0xe8] sm:$0xff] %vm266_vm1, %v713_v11  ;;  %v1368_v24 = vpack.c.bf16 %v2175_v20, %v2175_v20  ;;  %v764_v25 = vld [vmem:[#allocation2 + $0x60] sm:$0xff]  ;;  %v1068_v30 = vsel %vm266_vm1, %v1028_v19, 0.0  ;;  %v1375_v43 = vpack.c.bf16 %v2186_v26, %v2186_v26  ;;  %v1033_v46 = vmul.f32 %v2175_v20, %v2175_v20 }
 0x17b   : > { %924 = vst.msk [vmem:[%s2003_s27 + $0x2c] sm:$0xf] %vm912_vm2, %v1365_v14  ;;  %933 = vst.msk [vmem:[%s2003_s27 + $0x50] sm:$0xf] %vm912_vm2, %v1374_v52  ;;  %v1366_v32 = vpack.c.bf16 %v764_v25, %v764_v25  ;;  %v966_v35 = vadd.f32 %v965_v28, %v964_v23  ;;  %v1069_v36 = vadd.f32 %v1068_v30, %v1067_v13  ;;  %v969_v2 = vsel %vm266_vm1, %v764_v25, 0.0  ;;  %v2217_v48 = vld [vmem:[#allocation2 + $0xc0] sm:$0xff] }
 0x17c   : > { %922 = vst.msk [vmem:[%s2003_s27 + $0x24] sm:$0xf] %vm912_vm2, %v1363_v17  ;;  %v2196_v34 = vld [vmem:[#allocation2 + $0x78] sm:$0xff]  ;;  %935 = vst.msk [vmem:[%s2003_s27 + $0x58] sm:$0xf] %vm912_vm2, %v1376_v21  ;;  %v1031_v37 = vmul.f32 %v764_v25, %v764_v25  ;;  %v2219_v49 = vld [vmem:[#allocation2 + $0xd0] sm:$0xff]  ;;  %v1377_v57 = vpack.c.bf16 %v2204_v38, %v2204_v38  ;;  %v1378_v63 = vpack.c.bf16 %v2217_v48, %v2217_v48 }
 0x17d   : > { %927 = vst.msk [vmem:[%s2003_s27 + $0x38] sm:$0xf] %vm912_vm2, %v1368_v24  ;;  %v1369_v31 = vpack.c.bf16 %v2196_v34, %v2196_v34  ;;  %925 = vst.msk [vmem:[%s2003_s27 + $0x30] sm:$0xf] %vm912_vm2, %v1366_v32  ;;  %v1071_v44 = vadd.f32 %v1070_v29, %v1069_v36  ;;  %v968_v47 = vadd.f32 %v967_v40, %v966_v35  ;;  %v973_v11 = vsel %vm266_vm1, %v2175_v20, 0.0 }
 0x17e   : > { %v765_v42 = vld [vmem:[#allocation2 + $0x68] sm:$0xff]  ;;  %v1074_v50 = vsel %vm266_vm1, %v1031_v37, 0.0  ;;  %v2226_v55 = vld [vmem:[#allocation2 + $0xd8] sm:$0xff]  ;;  %934 = vst.msk [vmem:[%s2003_s27 + $0x54] sm:$0xf] %vm912_vm2, %v1375_v43  ;;  %v1380_v4 = vpack.c.bf16 %v2219_v49, %v2219_v49  ;;  %v1034_v13 = vmul.f32 %v2196_v34, %v2196_v34  ;;  %v1035_v14 = vmul.f32 %v2074_v16, %v2074_v16 }
 0x17f   : > { %928 = vst.msk [vmem:[%s2003_s27 + $0x3c] sm:$0xf] %vm912_vm2, %v1369_v31  ;;  %v1367_v7 = vpack.c.bf16 %v765_v42, %v765_v42  ;;  %v971_v51 = vsel %vm266_vm1, %v765_v42, 0.0  ;;  %v1032_v53 = vmul.f32 %v765_v42, %v765_v42  ;;  %v2224_v54 = vld [vmem:[#allocation2 + $0xc8] sm:$0xff]  ;;  %v2228_v56 = vld [vmem:[#allocation2 + $0xf0] sm:$0xff]  ;;  %v970_v58 = vadd.f32 %v969_v2, %v968_v47 }
 0x180   : > { %v1073_v59 = vadd.f32 %v1072_v41, %v1071_v44  ;;  %v2237_v60 = vld [vmem:[#allocation2 + $0xe0] sm:$0xff]  ;;  %v2241_v62 = vld [vmem:[#allocation2 + $0xf8] sm:$0xff]  ;;  %v1379_v0 = vpack.c.bf16 %v2224_v54, %v2224_v54  ;;  %v1381_v5 = vpack.c.bf16 %v2226_v55, %v2226_v55  ;;  %936 = vst.msk [vmem:[%s2003_s27 + $0x5c] sm:$0xf] %vm912_vm2, %v1377_v57  ;;  %v1384_v39 = vpack.c.bf16 %v2228_v56, %v2228_v56 }
 0x181   : > { %926 = vst.msk [vmem:[%s2003_s27 + $0x34] sm:$0xf] %vm912_vm2, %v1367_v7  ;;  %v2239_v61 = vld [vmem:[#allocation2 + $0xe8] sm:$0xff]  ;;  %v1076_v3 = vsel %vm266_vm1, %v1032_v53, 0.0  ;;  %v1382_v6 = vpack.c.bf16 %v2237_v60, %v2237_v60  ;;  %v972_v10 = vadd.f32 %v971_v51, %v970_v58  ;;  %937 = vst.msk [vmem:[%s2003_s27 + $0x60] sm:$0xf] %vm912_vm2, %v1378_v63  ;;  %v1385_v45 = vpack.c.bf16 %v2241_v62, %v2241_v62 }
 0x182   : > { %v1075_v9 = vadd.f32 %v1074_v50, %v1073_v59  ;;  %v1383_v33 = vpack.c.bf16 %v2239_v61, %v2239_v61  ;;  %938 = vst.msk [vmem:[%s2003_s27 + $0x64] sm:$0xf] %vm912_vm2, %v1379_v0  ;;  %939 = vst.msk [vmem:[%s2003_s27 + $0x68] sm:$0xf] %vm912_vm2, %v1380_v4  ;;  %v1078_v17 = vsel %vm266_vm1, %v1033_v46, 0.0  ;;  %v975_v18 = vsel %vm266_vm1, %v2196_v34, 0.0 }
 0x183   : > { %940 = vst.msk [vmem:[%s2003_s27 + $0x6c] sm:$0xf] %vm912_vm2, %v1381_v5  ;;  %941 = vst.msk [vmem:[%s2003_s27 + $0x70] sm:$0xf] %vm912_vm2, %v1382_v6  ;;  %v974_v15 = vadd.f32 %v973_v11, %v972_v10  ;;  %v977_v19 = vsel %vm266_vm1, %v2074_v16, 0.0 }
 0x184   : > { %v1077_v52 = vadd.f32 %v1076_v3, %v1075_v9  ;;  %942 = vst.msk [vmem:[%s2003_s27 + $0x74] sm:$0xf] %vm912_vm2, %v1383_v33  ;;  %943 = vst.msk [vmem:[%s2003_s27 + $0x78] sm:$0xf] %vm912_vm2, %v1384_v39 }
 0x185   : > { %944 = vst.msk [vmem:[%s2003_s27 + $0x7c] sm:$0xf] %vm912_vm2, %v1385_v45  ;;  %v976_v21 = vadd.f32 %v975_v18, %v974_v15 }
 0x186   : > { %v1079_v20 = vadd.f32 %v1078_v17, %v1077_v52 }
 0x187   : > { %1663 = shalt.err (!%p1660_p9)
}
 0x188   : > { %s1664_s12 = scalar_lea.hbm %s2269_s22, 2048  ;;  %s1668_s9 = scalar_lea.hbm %s2474_s2, 4096 }
 0x189   : > { %p1665_p1 = scmp.ne.s32.totalorder %s2269_s22, %s1664_s12  ;;  %p1669_p7 = scmp.lt.u32.totalorder %s2269_s22, %s2474_s2 }
 0x18a   : > { %p1670_p13 = scmp.lt.u32.totalorder %s1668_s9, %s1664_s12  ;;  %p1672_p6 = scmp.lt.u32.totalorder %s1664_s12, %s2269_s22 }
 0x18b   : > { %p1666_p2 = pnand %p1665_p1, %p1929_p10 }
 0x18c   : > { %p1671_p4 = por %p1670_p13, %p1669_p7 }
 0x18d   : > { %p1667_p3 = pneg %p1666_p2 }
 0x18e   : > { %p1673_p8 = por %p1672_p6, %p1671_p4 }
 0x190   : > { %p1674_p12 = pnand %p1673_p8, %p1667_p3 }
 0x192   : > { %1677 = shalt.err (!%p1674_p12)
}
 0x193   : > { %s1801_s14 = smov 64   ;;  %s1802_s21 = smov 4   ;;  %v1080_v16 = vsel %vm266_vm1, %v1034_v13, 0.0  ;;  %v1082_v23 = vsel %vm266_vm1, %v1035_v14, 0.0  ;;  %v1036_v24 = vmul.f32 %v2087_v27, %v2087_v27  ;;  %v978_v25 = vadd.f32 %v977_v19, %v976_v21 }
 0x194   : > { %1481 = dma.vmem_to_hbm [thread:$0]  (%p1929_p10), %s2271_s25, 2048, %s2269_s22, %s1123_s18, %s1801_s14, %s1801_s14, %s1802_s21   ;;  %v1081_v28 = vadd.f32 %v1080_v16, %v1079_v20  ;;  %v1037_v29 = vmul.f32 %v2068_v12, %v2068_v12  ;;  %v979_v30 = vsel %vm266_vm1, %v2087_v27, 0.0  ;;  %v1038_v35 = vmul.f32 %v2081_v22, %v2081_v22 }
 0x195   : > { %v980_v34 = vadd.f32 %v979_v30, %v978_v25  ;;  %v1084_v36 = vsel %vm266_vm1, %v1036_v24, 0.0  ;;  %v981_v37 = vsel %vm266_vm1, %v2068_v12, 0.0  ;;  %v1039_v31 = vmul.f32 %v2157_v1, %v2157_v1  ;;  %s1803_s30 = smov [#allocation9]   ;;  %s1804_s25 = smov [#allocation11]  }
 0x196   : > { %v1083_v32 = vadd.f32 %v1082_v23, %v1081_v28  ;;  %v983_v2 = vsel %vm266_vm1, %v2081_v22, 0.0  ;;  %v985_v27 = vsel %vm266_vm1, %v2157_v1, 0.0  ;;  %v1086_v42 = vsel %vm266_vm1, %v1037_v29, 0.0  ;;  %s1150_s7 = sshll.u32 %s1803_s30, 4  ;;  %s1161_s22 = sshll.u32 %s1804_s25, 4  ;;  %s1151_s7 = int_to_ptr.vmem [resolvable:$true] %s1150_s7  ;;  %s2400_s22 = int_to_ptr.vmem [resolvable:$true] %s1161_s22 }
 0x197   : > { %v982_v40 = vadd.f32 %v981_v37, %v980_v34  ;;  %v1040_v46 = vmul.f32 %v2186_v26, %v2186_v26  ;;  %v1088_v12 = vsel %vm266_vm1, %v1038_v35, 0.0  ;;  %v1090_v47 = vsel %vm266_vm1, %v1039_v31, 0.0  ;;  %s1678_s18 = scalar_lea.vmem %s1151_s7, 16  ;;  %p2497_p11 = scmp.ne.s32.totalorder %s2484_s24, 0 }
 0x198   : > { %v1085_v41 = vadd.f32 %v1084_v36, %v1083_v32  ;;  %v987_v51 = vsel %vm266_vm1, %v2186_v26, 0.0  ;;  %v1041_v22 = vmul.f32 %v2163_v8, %v2163_v8  ;;  %v989_v57 = vsel %vm266_vm1, %v2163_v8, 0.0  ;;  %p1679_p10 = scmp.ne.s32.totalorder %s1151_s7, %s1678_s18  ;;  %s1684_s8 = scalar_lea.vmem %s1151_s7, 32 }
 0x199   : > { %v984_v43 = vadd.f32 %v983_v2, %v982_v40  ;;  %v1042_v58 = vmul.f32 %v2204_v38, %v2204_v38  ;;  %v1043_v59 = vmul.f32 %v2217_v48, %v2217_v48  ;;  %v1092_v63 = vsel %vm266_vm1, %v1040_v46, 0.0  ;;  %p1685_p9 = scmp.lt.s32.totalorder %s1151_s7, %s1151_s7  ;;  %p1686_p1 = scmp.lt.s32.totalorder %s1684_s8, %s1678_s18 }
 0x19a   : > { %v1087_v44 = vadd.f32 %v1086_v42, %v1085_v41  ;;  %v991_v26 = vsel %vm266_vm1, %v2204_v38, 0.0  ;;  %v993_v4 = vsel %vm266_vm1, %v2217_v48, 0.0  ;;  %v1094_v5 = vsel %vm266_vm1, %v1041_v22, 0.0  ;;  %v945_v22 = vld [vmem:[#allocation9] sm:$0x1]  ;;  %p1680_p0 = pnand %p1679_p10, %p2497_p11 }
 0x19b   : > { %v986_v7 = vadd.f32 %v985_v27, %v984_v43  ;;  %v1044_v9 = vmul.f32 %v2224_v54, %v2224_v54  ;;  %v1096_v10 = vsel %vm266_vm1, %v1042_v58, 0.0  ;;  %v1098_v33 = vsel %vm266_vm1, %v1043_v59, 0.0  ;;  %p1687_p2 = por %p1686_p1, %p1685_p9 }
 0x19c   : > { %v1089_v50 = vadd.f32 %v1088_v12, %v1087_v44  ;;  %v995_v13 = vsel %vm266_vm1, %v2224_v54, 0.0  ;;  %v1045_v38 = vmul.f32 %v2219_v49, %v2219_v49  ;;  %v997_v45 = vsel %vm266_vm1, %v2219_v49, 0.0  ;;  %p1681_p5 = pneg %p1680_p0 }
 0x19d   : > { %v988_v1 = vadd.f32 %v987_v51, %v986_v7  ;;  %v1046_v15 = vmul.f32 %v2226_v55, %v2226_v55  ;;  %v1047_v52 = vmul.f32 %v2237_v60, %v2237_v60  ;;  %v1100_v17 = vsel %vm266_vm1, %v1044_v9, 0.0 }
 0x19e   : > { %v1091_v53 = vadd.f32 %v1090_v47, %v1089_v50  ;;  %v999_v54 = vsel %vm266_vm1, %v2226_v55, 0.0  ;;  %v1001_v20 = vsel %vm266_vm1, %v2237_v60, 0.0  ;;  %v1102_v21 = vsel %vm266_vm1, %v1045_v38, 0.0  ;;  %p1688_p3 = pnand %p1687_p2, %p1681_p5 }
 0x19f   : > { %v990_v0 = vadd.f32 %v989_v57, %v988_v1  ;;  %v1048_v23 = vmul.f32 %v2239_v61, %v2239_v61  ;;  %v1104_v24 = vsel %vm266_vm1, %v1046_v15, 0.0  ;;  %v1106_v25 = vsel %vm266_vm1, %v1047_v52, 0.0 }
 0x1a0   : > { %v1093_v3 = vadd.f32 %v1092_v63, %v1091_v53  ;;  %v1003_v30 = vsel %vm266_vm1, %v2239_v61, 0.0  ;;  %v1049_v55 = vmul.f32 %v2228_v56, %v2228_v56  ;;  %v1005_v34 = vsel %vm266_vm1, %v2228_v56, 0.0  ;;  %v1018_v53 = vld [vmem:[#allocation11] sm:$0x1] }
 0x1a1   : > { %v992_v6 = vadd.f32 %v991_v26, %v990_v0  ;;  %v1050_v35 = vmul.f32 %v2241_v62, %v2241_v62  ;;  %v1108_v36 = vsel %vm266_vm1, %v1048_v23, 0.0  ;;  %v1007_v40 = vsel %vm266_vm1, %v2241_v62, 0.0 }
 0x1a2   : > { %v1095_v8 = vadd.f32 %v1094_v5, %v1093_v3  ;;  %v1110_v61 = vsel %vm266_vm1, %v1049_v55, 0.0  ;;  %vm1016_vm3 = vcmask 122880  }
 0x1a3   : > { %v994_v39 = vadd.f32 %v993_v4, %v992_v6  ;;  %v1112_v27 = vsel %vm266_vm1, %v1050_v35, 0.0 }
 0x1a4   : > { %v1097_v11 = vadd.f32 %v1096_v10, %v1095_v8 }
 0x1a5   : > { %v996_v48 = vadd.f32 %v995_v13, %v994_v39 }
 0x1a6   : > { %v1099_v14 = vadd.f32 %v1098_v33, %v1097_v11 }
 0x1a7   : > { %v998_v18 = vadd.f32 %v997_v45, %v996_v48 }
 0x1a8   : > { %v1101_v19 = vadd.f32 %v1100_v17, %v1099_v14 }
 0x1a9   : > { %v1000_v16 = vadd.f32 %v999_v54, %v998_v18 }
 0x1aa   : > { %v1103_v49 = vadd.f32 %v1102_v21, %v1101_v19 }
 0x1ab   : > { %v1002_v28 = vadd.f32 %v1001_v20, %v1000_v16 }
 0x1ac   : > { %v1105_v29 = vadd.f32 %v1104_v24, %v1103_v49 }
 0x1ad   : > { %v1004_v60 = vadd.f32 %v1003_v30, %v1002_v28 }
 0x1ae   : > { %v1107_v32 = vadd.f32 %v1106_v25, %v1105_v29 }
 0x1af   : > { %v1006_v37 = vadd.f32 %v1005_v34, %v1004_v60 }
 0x1b0   : > { %v1109_v31 = vadd.f32 %v1108_v36, %v1107_v32 }
 0x1b1   : > { %v1008_v41 = vadd.f32 %v1007_v40, %v1006_v37 }
 0x1b2   : > { %v1111_v2 = vadd.f32 %v1110_v61, %v1109_v31 }
 0x1b3   : > { %v1009_v42 = vrot.slane %v1008_v41, 4 }
 0x1b4   : > { %v1113_v43 = vadd.f32 %v1112_v27, %v1111_v2 }
 0x1b5   : > { %v1010_v44 = vadd.f32 %v1009_v42, %v1008_v41 }
 0x1b6   : > { %v1114_v56 = vrot.slane %v1113_v43, 4 }
 0x1b7   : > { %v1011_v46 = vrot.slane %v1010_v44, 2 }
 0x1b8   : > { %v1115_v12 = vadd.f32 %v1114_v56, %v1113_v43 }
 0x1b9   : > { %v1012_v47 = vadd.f32 %v1011_v46, %v1010_v44 }
 0x1ba   : > { %v1116_v7 = vrot.slane %v1115_v12, 2 }
 0x1bb   : > { %v1013_v50 = vrot.slane %v1012_v47, 1 }
 0x1bc   : > { %v1117_v51 = vadd.f32 %v1116_v7, %v1115_v12 }
 0x1bd   : > { %v1014_v62 = vadd.f32 %v1013_v50, %v1012_v47 }
 0x1be   : > { %v1118_v1 = vrot.slane %v1117_v51, 1 }
 0x1bf   : > { %v1015_v57 = vadd.f32 %v1014_v62, %v945_v22 }
 0x1c0   : > { %v1119_v58 = vadd.f32 %v1118_v1, %v1117_v51 }
 0x1c1   : > { %1017 = vst.msk [vmem:[#allocation9] sm:$0x1] %vm1016_vm3, %v1015_v57 }
 0x1c2   : > { %v1120_v59 = vadd.f32 %v1119_v58, %v1018_v53 }
 0x1c3   : > { %1691 = shalt.err (!%p1688_p3)
}
 0x1c4   : > { %s1692_s13 = scalar_lea.hbm %s2475_s3, 16 }
 0x1c5   : > { %p1693_p7 = scmp.ne.s32.totalorder %s2475_s3, %s1692_s13  ;;  %p1698_p6 = scmp.lt.u32.totalorder %s1692_s13, %s2475_s3 }
 0x1c7   : > { %p1694_p13 = pnand %p1693_p7, %p2497_p11 }
 0x1c9   : > { %p1695_p4 = pneg %p1694_p13 }
 0x1cb   : > { %p1700_p8 = pnand %p1698_p6, %p1695_p4 }
 0x1cd   : > { %1703 = shalt.err (!%p1700_p8)
}
 0x1ce   : > { %1483 = dma.vmem_to_hbm [thread:$0]  (%p2497_p11), %s1151_s7, 16, %s2475_s3, [#allocation10]   ;;  %1121 = vst.msk [vmem:[#allocation11] sm:$0x1] %vm1016_vm3, %v1120_v59 }
 0x1cf   : > { %s1704_s14 = scalar_lea.vmem %s2400_s22, 16  ;;  %s1710_s21 = scalar_lea.vmem %s2400_s22, 32 }
 0x1d0   : > { %p1705_p12 = scmp.ne.s32.totalorder %s2400_s22, %s1704_s14  ;;  %p1711_p5 = scmp.lt.s32.totalorder %s2400_s22, %s2400_s22 }
 0x1d1   : > { %p1712_p9 = scmp.lt.s32.totalorder %s1710_s21, %s1704_s14 }
 0x1d2   : > { %p1706_p10 = pnand %p1705_p12, %p2497_p11 }
 0x1d3   : > { %p1713_p1 = por %p1712_p9, %p1711_p5 }
 0x1d4   : > { %p1707_p0 = pneg %p1706_p10 }
 0x1d6   : > { %p1714_p2 = pnand %p1713_p1, %p1707_p0 }
 0x1d8   : > { %1717 = shalt.err (!%p1714_p2)
}
 0x1d9   : > { %s1718_s18 = scalar_lea.hbm %s2476_s4, 16 }
 0x1da   : > { %p1719_p3 = scmp.ne.s32.totalorder %s2476_s4, %s1718_s18  ;;  %p1724_p4 = scmp.lt.u32.totalorder %s1718_s18, %s2476_s4 }
 0x1dc   : > { %p1720_p7 = pnand %p1719_p3, %p2497_p11 }
 0x1de   : > { %p1721_p13 = pneg %p1720_p7 }
 0x1e0   : > { %p1726_p6 = pnand %p1724_p4, %p1721_p13 }
 0x1e2   : > { %1729 = shalt.err (!%p1726_p6)
}
 0x1e3   : > { %1485 = dma.vmem_to_hbm [thread:$0]  (%p2497_p11), %s2400_s22, 16, %s2476_s4, [#allocation10]  }
 0x1e4   : > { %1763 = dma.done.wait (%p2497_p11), [#allocation10], 32  }
 0x1e5   : > { %1765 = vsyncadd (%p2497_p11), [#allocation10], 4294967264 }
 0x1e6 PF: > { %s1181_s28 = sand.u32 1, %s1772_s15   ;;  %p2498_p8 = scmp.ne.s32.totalorder %s2486_s26, 0 }
 0x1e7   : > { %p2499_p12 = scmp.ge.s32.totalorder %s1792_s20, 2  ;;  %s1182_s29 = scalar_lea.sflag [#allocation5], %s1181_s28 }
 0x1e9   : > { %p1500_p10 = pnand %p2499_p12, %p2498_p8 }
 0x1eb   : > { %1767 = dma.done.wait (!%p1500_p10), %s1182_s29, 2048  }
 0x1ec   : > { %1769 = vsyncadd (!%p1500_p10), %s1182_s29, 4294965248  ;;  %s23_s20 = sadd.s32 1, %s1792_s20   ;;  %s2500_s15 = smov %s1776_s16 }
 0x1ed   : > { %p20_p0 = scmp.ge.s32.totalorder %s23_s20, 4   ;;  %s2501_s16 = smov %s1780_s17 }
 0x1ee   : > { %s2502_s17 = smov %s1938_s10  ;;  %s2503_s18 = smov %s1788_s19 }
 0x1ef   : > { %s2504_s19 = smov %s2506_s5  ;;  %22 = sbr.rel (!%p20_p0) target bundleno = 8 (0x8), region = 106 }
 0x1f6   :  { %1187 = vsyncpa [#allocation4], 1 }
 0x1f7   :  { %1189 = vsyncpa [#allocation4 + $0x1], 1 }
 0x1f8   :  { %1190 = vsyncpa [#allocation7], 1 }
 0x1f9   :  { %1191 = vsyncpa [#allocation5], 1 }
 0x1fa   :  { %1193 = vsyncpa [#allocation5 + $0x1], 1 }
 0x1fb   :  { %1194 = vsyncpa [#allocation10], 1 }

// kernel: discriminator_forward.10
= control target key start
LH: loop header
LB: loop body
LE: loop exit
PB: predicated region body
PF: predicated region fallthrough
CT: control target
= control target key end

     0   :  { %8 = vsyncpa [#allocation3], 0  ;;  %s1533_s0 = inlined_call_operand.hbm [shape: bf16[512,16], index: 0, kind: input, shape index: {}]   ;;  %s1534_s1 = inlined_call_operand.hbm [shape: f32[1,16], index: 1, kind: input, shape index: {}]   ;;  %s1535_s2 = inlined_call_operand.hbm [shape: f32[1,16], index: 2, kind: input, shape index: {}]   ;;  %s1536_s3 = inlined_call_operand.hbm [shape: bf16[512,16], index: 3, kind: output, shape index: {}]  }
   0x1   :  { %10 = vsyncpa [#allocation3 + $0x1], 0 }
   0x2   :  { %11 = vsyncpa [#allocation6], 0 }
   0x3   :  { %12 = vsyncpa [#allocation4], 0 }
   0x4   :  { %14 = vsyncpa [#allocation4 + $0x1], 0  ;;  %s1143_s12 = smov 0   ;;  %s1145_s13 = smov 0  }
   0x5   :  { %s1147_s14 = smov 0   ;;  %s1149_s15 = smov 0  }
   0x6 LB: > { %s1164_s16 = sadd.s32 4294967295, %s1113_s15   ;;  %s721_s17 = sadd.s32 4294967294, %s1113_s15   ;;  %s1113_s15 = sphi %s1149_s15, %s1561_s15   ;;  %s1109_s14 = sphi %s1147_s14, %s1560_s14   ;;  %s1105_s13 = sphi %s1145_s13, %s1559_s13   ;;  %s1101_s12 = sphi %s1143_s12, %s1558_s12  }
   0x7   : > { %s1168_s18 = sadd.s32 1, %s1113_s15   ;;  %s27_s19 = sadd.s32 1, %s1109_s14 }
   0x8   : > { %s24_s20 = ssub.s32 %s1113_s15, %s1168_s18  ;;  %p34_p0 = scmp.ne.s32.totalorder %s1109_s14, %s1105_s13 }
   0x9   : > { %p25_p1 = scmp.eq.s32.totalorder %s24_s20, 0  ;;  %p35_p2 = scmp.eq.s32.totalorder %s1113_s15, 0 }
   0xa   : > { %p40_p3 = scmp.ne.s32.totalorder %s1105_s13, %s1101_s12  ;;  %p1537_p4 = scmp.eq.s32.totalorder %s1164_s16, 0 }
   0xb   : > { %s1180_s21 = scalar_select %p25_p1, %s1109_s14, %s27_s19  }
   0xc   : > { %p1182_p5 = por %p35_p2, %p34_p0  ;;  %p1188_p6 = por %p1537_p4, %p40_p3 }
   0xd   : > { %p106_p7 = scmp.eq.s32.totalorder %s1164_s16, 1  ;;  %p112_p8 = scmp.eq.s32.totalorder %s721_s17, 1 }
   0xe   : > { %s1543_s23 = scalar_select %p1188_p6, 1, 0 }
   0xf   : > { %p722_p9 = scmp.ge.s32.totalorder %s1113_s15, 1  ;;  %p119_p10 = scmp.lt.s32.totalorder %s1113_s15, 3 }
  0x10   : > { %p1195_p11 = por %p106_p7, %p34_p0  ;;  %p1199_p12 = por %p112_p8, %p40_p3 }
  0x11   : > { %p1203_p13 = pnand %p722_p9, %p119_p10  ;;  %s1115_s27 = smov [#allocation5]  }
  0x12   : > { %s1544_s24 = scalar_select %p1195_p11, 1, 0 }
  0x13   : > { %s1545_s25 = scalar_select %p1199_p12, 1, 0 }
  0x14   : > { %s1546_s26 = scalar_select %p1203_p13, 1, 0 }
  0x15   : > { %p898_p2 = pneg %p1203_p13  ;;  %s132_s28 = sshll.u32 %s1115_s27, 4  ;;  %s133_s28 = int_to_ptr.vmem [resolvable:$true] %s132_s28 }
  0x16   : > { %p915_p4 = scmp.lt.s32.totalorder %s1113_s15, 2  ;;  %p1547_p0 = scmp.eq.s32.totalorder %s1164_s16, 0 }
  0x17   : > { %s1116_s4 = smov [#allocation7]   ;;  %s957_s8 = scalar_lea.hbm %s1534_s1, 16 }
  0x18   : > { %p1213_p7 = pnand %p898_p2, %p1547_p0  ;;  %p1219_p3 = pnand %p915_p4, %p1182_p5 }
  0x19   : > { %s143_s5 = sshll.u32 %s1116_s4, 4  ;;  %p958_p8 = scmp.ne.s32.totalorder %s1534_s1, %s957_s8  ;;  %s1223_s5 = int_to_ptr.vmem [resolvable:$true] %s143_s5 }
  0x1a   : > { %s1549_s30 = scalar_select %p1219_p3, 1, 0 }
  0x1b   : > { %p959_p9 = pneg %p1213_p7  ;;  %p964_p10 = scmp.lt.u32.totalorder %s957_s8, %s1534_s1 }
  0x1d   : > { %p960_p4 = pnand %p959_p9, %p958_p8 }
  0x1f   : > { %p961_p5 = pneg %p960_p4 }
  0x21   : > { %p966_p2 = pnand %p964_p10, %p961_p5 }
  0x23   : > { %969 = shalt.err (!%p966_p2)
}
  0x24   : > { %s970_s19 = scalar_lea.vmem %s133_s28, 16  ;;  %s977_s20 = scalar_lea.vmem %s133_s28, 32 }
  0x25   : > { %p971_p0 = scmp.ne.s32.totalorder %s133_s28, %s970_s19  ;;  %p978_p11 = scmp.lt.s32.totalorder %s133_s28, %s133_s28 }
  0x26   : > { %p979_p6 = scmp.lt.s32.totalorder %s977_s20, %s970_s19 }
  0x27   : > { %p973_p1 = pnand %p971_p0, %p959_p9 }
  0x28   : > { %p980_p13 = por %p979_p6, %p978_p11 }
  0x29   : > { %p974_p12 = pneg %p973_p1 }
  0x2b   : > { %p981_p3 = pnand %p980_p13, %p974_p12 }
  0x2d   : > { %984 = shalt.err (!%p981_p3)
}
  0x2e   : > { %901 = dma.hbm_to_vmem [thread:$0]  (!%p1213_p7), %s1534_s1, 16, %s133_s28, [#allocation6]  }
  0x2f   : > { %s154_s4 = sand.u32 1, %s1109_s14   ;;  %s985_s8 = scalar_lea.hbm %s1535_s2, 16 }
  0x30   : > { %p986_p1 = scmp.ne.s32.totalorder %s1535_s2, %s985_s8  ;;  %p992_p12 = scmp.lt.u32.totalorder %s985_s8, %s1535_s2 }
  0x32   : > { %p988_p6 = pnand %p986_p1, %p959_p9 }
  0x34   : > { %p989_p11 = pneg %p988_p6 }
  0x36   : > { %p994_p13 = pnand %p992_p12, %p989_p11 }
  0x38   : > { %997 = shalt.err (!%p994_p13)
}
  0x39   : > { %s998_s28 = scalar_lea.vmem %s1223_s5, 16  ;;  %s1005_s19 = scalar_lea.vmem %s1223_s5, 32 }
  0x3a   : > { %p999_p3 = scmp.ne.s32.totalorder %s1223_s5, %s998_s28  ;;  %p1006_p5 = scmp.lt.s32.totalorder %s1223_s5, %s1223_s5 }
  0x3b   : > { %p1007_p10 = scmp.lt.s32.totalorder %s1005_s19, %s998_s28 }
  0x3c   : > { %p1001_p8 = pnand %p999_p3, %p959_p9 }
  0x3d   : > { %p1008_p2 = por %p1007_p10, %p1006_p5 }
  0x3e   : > { %p1002_p4 = pneg %p1001_p8 }
  0x40   : > { %p1009_p0 = pnand %p1008_p2, %p1002_p4 }
  0x42   : > { %1012 = shalt.err (!%p1009_p0)
}
  0x43   : > { %904 = dma.hbm_to_vmem [thread:$0]  (!%p1213_p7), %s1535_s2, 16, %s1223_s5, [#allocation6]  }
  0x44   : > { %s726_s27 = sshll.u32 %s154_s4, 7  ;;  %s773_s6 = sshll.u32 %s1113_s15, 11 }
  0x45   : > { %s1278_s9 = scalar_lea.hbm %s1533_s0, %s773_s6  ;;  %s158_s29 = scalar_lea.vmem [#allocation2], %s726_s27 }
  0x46   : > { %s165_s10 = sshll.u32 %s158_s29, 4  ;;  %s1282_s11 = scalar_lea.sflag [#allocation3], %s154_s4  ;;  %s1280_s10 = int_to_ptr.vmem [resolvable:$true] %s165_s10 }
  0x47   : > { %s1013_s17 = scalar_lea.hbm %s1278_s9, 2048  ;;  %p1550_p7 = scmp.ne.s32.totalorder %s1549_s30, 0 }
  0x48   : > { %p1014_p9 = scmp.ne.s32.totalorder %s1278_s9, %s1013_s17  ;;  %s1018_s19 = scalar_lea.hbm %s1533_s0, 4096 }
  0x49   : > { %p1015_p1 = pneg %p1550_p7  ;;  %p1019_p12 = scmp.lt.u32.totalorder %s1278_s9, %s1533_s0 }
  0x4a   : > { %p1020_p13 = scmp.lt.u32.totalorder %s1018_s19, %s1013_s17  ;;  %p1022_p8 = scmp.lt.u32.totalorder %s1013_s17, %s1278_s9 }
  0x4b   : > { %p1016_p6 = pnand %p1015_p1, %p1014_p9 }
  0x4c   : > { %p1021_p3 = por %p1020_p13, %p1019_p12 }
  0x4d   : > { %p1017_p11 = pneg %p1016_p6 }
  0x4e   : > { %p1023_p4 = por %p1022_p8, %p1021_p3 }
  0x50   : > { %p1024_p5 = pnand %p1023_p4, %p1017_p11 }
  0x52   : > { %1027 = shalt.err (!%p1024_p5)
}
  0x53   : > { %s1028_s4 = scalar_lea.vmem %s1280_s10, 2048  ;;  %s1117_s27 = smov [#allocation2]  }
  0x54   : > { %p1029_p10 = scmp.ne.s32.totalorder %s1280_s10, %s1028_s4  ;;  %s1033_s6 = sshll.u32 %s1117_s27, 4  ;;  %s1034_s6 = int_to_ptr.vmem [resolvable:$false] %s1033_s6 }
  0x55   : > { %s1035_s7 = scalar_lea.vmem %s1034_s6, 4096  ;;  %p1036_p9 = scmp.lt.s32.totalorder %s1280_s10, %s1034_s6 }
  0x56   : > { %p1031_p2 = pnand %p1029_p10, %p1015_p1  ;;  %p1037_p6 = scmp.lt.s32.totalorder %s1035_s7, %s1028_s4 }
  0x58   : > { %p1032_p0 = pneg %p1031_p2  ;;  %p1038_p12 = por %p1037_p6, %p1036_p9 }
  0x5a   : > { %p1039_p13 = pnand %p1038_p12, %p1032_p0 }
  0x5c   : > { %1042 = shalt.err (!%p1039_p13)
}
  0x5d   : > { %s1118_s8 = smov 64   ;;  %s1119_s29 = smov 4  }
  0x5e   : > { %908 = dma.hbm_to_vmem [thread:$0]  (!%p1550_p7), %s1278_s9, 2048, %s1280_s10, %s1282_s11, %s1118_s8, %s1118_s8, %s1119_s29  }
  0x5f   : > { %p1551_p1 = scmp.ne.s32.totalorder %s1546_s26, 0 }
  0x60   : > { %s1313_s17 = sand.u32 (!%p1551_p1), 1, %s1105_s13   ;;  %p1552_p11 = scmp.ne.s32.totalorder (!%p1551_p1), %s1543_s23, 0 }
  0x61   : > { %177 = sbr.rel (%p1551_p1) target bundleno = 183 (0xb7), region = 32  ;;  %s730_s5 = sshll.u32 (!%p1551_p1), %s1313_s17, 7 }
  0x62   : > { %s180_s28 = scalar_lea.sflag (!%p1551_p1), [#allocation3], %s1313_s17  ;;  %s1319_s19 = scalar_lea.vmem (!%p1551_p1), [#allocation2], %s730_s5 }
  0x68   : > { %1088 = dma.done.wait (%p1552_p11), %s180_s28, 2048  }
  0x69   : > { %1090 = vsyncadd (%p1552_p11), %s180_s28, 4294965248  ;;  %p1553_p7 = scmp.eq.s32.totalorder %s1164_s16, 0 }
  0x6b   : > { %1092 = dma.done.wait (%p1553_p7), [#allocation6], 32   ;;  %p1554_p3 = pmov %p1553_p7 }
  0x6c   : > { %v808_v0 = vld [vmem:[%s1319_s19] sm:$0xff]   ;;  %vm582_vm0 = vcmask 125952   ;;  %v871_v4 = vld [vmem:[%s1319_s19 + $0x8] sm:$0xff]   ;;  %v872_v5 = vld [vmem:[%s1319_s19 + $0x10] sm:$0xff]   ;;  %s1355_s23 = scalar_lea.vmem [#allocation8], %s730_s5  ;;  %s806_s26 = sshll.u32 %s1164_s16, 11 }
  0x6d   : > { %1094 = vsyncadd (%p1554_p3), [#allocation6], 4294967264  ;;  %v1330_v1 = vld [vmem:[#allocation5] ss:$0 sm:$0xff]  ;;  %v809_v2 = vunpack.c.l.bf16 %v808_v0  ;;  %v810_v3 = vunpack.c.h.bf16 %v808_v0  ;;  %v873_v6 = vld [vmem:[%s1319_s19 + $0x18] sm:$0xff]   ;;  %v813_v8 = vunpack.c.l.bf16 %v871_v4  ;;  %v814_v9 = vunpack.c.h.bf16 %v871_v4  ;;  %s629_s30 = sshll.u32 %s1355_s23, 4  ;;  %s1479_s10 = scalar_lea.hbm %s1536_s3, %s806_s26  ;;  %s1481_s30 = int_to_ptr.vmem [resolvable:$true] %s629_s30 }
  0x6e   : > { %v1335_v7 = vld [vmem:[#allocation7] ss:$0 sm:$0xff]  ;;  %v817_v10 = vunpack.c.l.bf16 %v872_v5  ;;  %v818_v11 = vunpack.c.h.bf16 %v872_v5  ;;  %v821_v14 = vunpack.c.l.bf16 %v873_v6  ;;  %v822_v15 = vunpack.c.h.bf16 %v873_v6  ;;  %v875_v40 = vld [vmem:[%s1319_s19 + $0x28] sm:$0xff]   ;;  %v876_v52 = vld [vmem:[%s1319_s19 + $0x30] sm:$0xff]   ;;  %s616_s11 = scalar_lea.sflag [#allocation4], %s1313_s17  ;;  %s1043_s20 = scalar_lea.vmem %s1481_s30, 2048 }
  0x6f   : > { %v287_v12 = vmul.f32 %v809_v2, %v1330_v1  ;;  %v288_v13 = vmul.f32 %v810_v3, %v1330_v1  ;;  %v289_v16 = vmul.f32 %v813_v8, %v1330_v1  ;;  %v290_v17 = vmul.f32 %v814_v9, %v1330_v1  ;;  %v874_v39 = vld [vmem:[%s1319_s19 + $0x20] sm:$0xff]   ;;  %p1044_p8 = scmp.ne.s32.totalorder %s1481_s30, %s1043_s20  ;;  %p1555_p4 = scmp.ne.s32.totalorder %s1544_s24, 0 }
  0x70   : > { %v291_v18 = vmul.f32 %v817_v10, %v1330_v1  ;;  %v292_v19 = vmul.f32 %v818_v11, %v1330_v1  ;;  %v293_v22 = vmul.f32 %v821_v14, %v1330_v1  ;;  %v294_v23 = vmul.f32 %v822_v15, %v1330_v1  ;;  %s1120_s22 = smov [#allocation8]  }
  0x71   : > { %v326_v20 = vadd.f32 %v1335_v7, %v287_v12  ;;  %v327_v21 = vadd.f32 %v1335_v7, %v288_v13  ;;  %v328_v24 = vadd.f32 %v1335_v7, %v289_v16  ;;  %v329_v25 = vadd.f32 %v1335_v7, %v290_v17  ;;  %v877_v17 = vld [vmem:[%s1319_s19 + $0x38] sm:$0xff]   ;;  %p1045_p5 = pnand %p1044_p8, %p1555_p4  ;;  %s1047_s4 = sshll.u32 %s1120_s22, 4  ;;  %s1048_s4 = int_to_ptr.vmem [resolvable:$false] %s1047_s4 }
  0x72   : > { %v330_v26 = vadd.f32 %v1335_v7, %v291_v18  ;;  %v331_v27 = vadd.f32 %v1335_v7, %v292_v19  ;;  %v332_v46 = vadd.f32 %v1335_v7, %v293_v22  ;;  %v333_v47 = vadd.f32 %v1335_v7, %v294_v23  ;;  %v878_v18 = vld [vmem:[%s1319_s19 + $0x40] sm:$0xff]   ;;  %v879_v23 = vld [vmem:[%s1319_s19 + $0x48] sm:$0xff]   ;;  %s1049_s27 = scalar_lea.vmem %s1048_s4, 4096  ;;  %p1050_p2 = scmp.lt.s32.totalorder %s1481_s30, %s1048_s4 }
  0x73   : > { %vm358_vm1 = vcmp.ge.f32.partialorder %v326_v20, 0.0  ;;  %v390_v28 = vmul.f32 0.2, %v326_v20  ;;  %vm359_vm2 = vcmp.ge.f32.partialorder %v327_v21, 0.0  ;;  %v391_v29 = vmul.f32 0.2, %v327_v21  ;;  %p1046_p10 = pneg %p1045_p5  ;;  %p1051_p0 = scmp.lt.s32.totalorder %s1049_s27, %s1043_s20 }
  0x74   : > { %vm360_vm3 = vcmp.ge.f32.partialorder %v328_v24, 0.0  ;;  %v392_v30 = vmul.f32 0.2, %v328_v24  ;;  %vm361_vm4 = vcmp.ge.f32.partialorder %v329_v25, 0.0  ;;  %v393_v31 = vmul.f32 0.2, %v329_v25 }
  0x75   : > { %v422_v32 = vsel %vm358_vm1, %v326_v20, %v390_v28  ;;  %v423_v33 = vsel %vm359_vm2, %v327_v21, %v391_v29  ;;  %vm362_vm5 = vcmp.ge.f32.partialorder %v330_v26, 0.0  ;;  %v394_v34 = vmul.f32 0.2, %v330_v26  ;;  %p1052_p9 = por %p1051_p0, %p1050_p2 }
  0x76   : > { %v774_v35 = vpack.c.bf16 %v422_v32, %v422_v32  ;;  %v775_v36 = vpack.c.bf16 %v423_v33, %v423_v33  ;;  %v424_v37 = vsel %vm360_vm3, %v328_v24, %v392_v30  ;;  %v425_v38 = vsel %vm361_vm4, %v329_v25, %v393_v31 }
  0x77   : > { %v776_v41 = vpack.c.bf16 %v424_v37, %v424_v37  ;;  %v777_v42 = vpack.c.bf16 %v425_v38, %v425_v38  ;;  %v426_v43 = vsel %vm362_vm5, %v330_v26, %v394_v34  ;;  %vm363_vm6 = vcmp.ge.f32.partialorder %v331_v27, 0.0  ;;  %p1053_p6 = pnand %p1052_p9, %p1046_p10 }
  0x78   : > { %583 = vst.msk [vmem:[%s1355_s23] sm:$0xf] %vm582_vm0, %v774_v35  ;;  %584 = vst.msk [vmem:[%s1355_s23 + $0x4] sm:$0xf] %vm582_vm0, %v775_v36  ;;  %v778_v44 = vpack.c.bf16 %v426_v43, %v426_v43  ;;  %v395_v45 = vmul.f32 0.2, %v331_v27  ;;  %v825_v48 = vunpack.c.l.bf16 %v874_v39  ;;  %v826_v49 = vunpack.c.h.bf16 %v874_v39 }
  0x79   : > { %585 = vst.msk [vmem:[%s1355_s23 + $0x8] sm:$0xf] %vm582_vm0, %v776_v41  ;;  %586 = vst.msk [vmem:[%s1355_s23 + $0xc] sm:$0xf] %vm582_vm0, %v777_v42  ;;  %v829_v50 = vunpack.c.l.bf16 %v875_v40  ;;  %v830_v51 = vunpack.c.h.bf16 %v875_v40  ;;  %vm364_vm7 = vcmp.ge.f32.partialorder %v332_v46, 0.0  ;;  %vm365_vm8 = vcmp.ge.f32.partialorder %v333_v47, 0.0 }
  0x7a   : > { %587 = vst.msk [vmem:[%s1355_s23 + $0x10] sm:$0xf] %vm582_vm0, %v778_v44  ;;  %v427_v53 = vsel %vm363_vm6, %v331_v27, %v395_v45  ;;  %v396_v54 = vmul.f32 0.2, %v332_v46  ;;  %v397_v56 = vmul.f32 0.2, %v333_v47  ;;  %v295_v57 = vmul.f32 %v825_v48, %v1330_v1 }
  0x7b   : > { %v779_v55 = vpack.c.bf16 %v427_v53, %v427_v53  ;;  %v296_v58 = vmul.f32 %v826_v49, %v1330_v1  ;;  %v297_v60 = vmul.f32 %v829_v50, %v1330_v1  ;;  %v298_v61 = vmul.f32 %v830_v51, %v1330_v1 }
  0x7c   : > { %v428_v59 = vsel %vm364_vm7, %v332_v46, %v396_v54  ;;  %v833_v62 = vunpack.c.l.bf16 %v876_v52  ;;  %v429_v0 = vsel %vm365_vm8, %v333_v47, %v397_v56  ;;  %v334_v2 = vadd.f32 %v1335_v7, %v295_v57  ;;  %v880_v57 = vld [vmem:[%s1319_s19 + $0x50] sm:$0xff]  }
  0x7d   : > { %588 = vst.msk [vmem:[%s1355_s23 + $0x14] sm:$0xf] %vm582_vm0, %v779_v55  ;;  %v780_v63 = vpack.c.bf16 %v428_v59, %v428_v59  ;;  %v335_v3 = vadd.f32 %v1335_v7, %v296_v58  ;;  %v781_v4 = vpack.c.bf16 %v429_v0, %v429_v0  ;;  %v336_v5 = vadd.f32 %v1335_v7, %v297_v60 }
  0x7e   : > { %v337_v6 = vadd.f32 %v1335_v7, %v298_v61  ;;  %v299_v8 = vmul.f32 %v833_v62, %v1330_v1  ;;  %vm366_vm9 = vcmp.ge.f32.partialorder %v334_v2, 0.0  ;;  %v398_v9 = vmul.f32 0.2, %v334_v2  ;;  %v881_v62 = vld [vmem:[%s1319_s19 + $0x58] sm:$0xff]  }
  0x7f   : > { %589 = vst.msk [vmem:[%s1355_s23 + $0x18] sm:$0xf] %vm582_vm0, %v780_v63  ;;  %vm367_vm10 = vcmp.ge.f32.partialorder %v335_v3, 0.0  ;;  %v399_v10 = vmul.f32 0.2, %v335_v3  ;;  %vm368_vm11 = vcmp.ge.f32.partialorder %v336_v5, 0.0  ;;  %v834_v16 = vunpack.c.h.bf16 %v876_v52 }
  0x80   : > { %590 = vst.msk [vmem:[%s1355_s23 + $0x1c] sm:$0xf] %vm582_vm0, %v781_v4  ;;  %v400_v11 = vmul.f32 0.2, %v336_v5  ;;  %vm369_vm12 = vcmp.ge.f32.partialorder %v337_v6, 0.0  ;;  %v430_v13 = vsel %vm366_vm9, %v334_v2, %v398_v9  ;;  %v338_v15 = vadd.f32 %v1335_v7, %v299_v8 }
  0x81   : > { %v401_v12 = vmul.f32 0.2, %v337_v6  ;;  %v431_v14 = vsel %vm367_vm10, %v335_v3, %v399_v10  ;;  %v782_v19 = vpack.c.bf16 %v430_v13, %v430_v13  ;;  %v300_v27 = vmul.f32 %v834_v16, %v1330_v1  ;;  %v882_v3 = vld [vmem:[%s1319_s19 + $0x60] sm:$0xff]   ;;  %v883_v13 = vld [vmem:[%s1319_s19 + $0x68] sm:$0xff]  }
  0x82   : > { %v783_v20 = vpack.c.bf16 %v431_v14, %v431_v14  ;;  %v432_v21 = vsel %vm368_vm11, %v336_v5, %v400_v11  ;;  %vm370_vm13 = vcmp.ge.f32.partialorder %v338_v15, 0.0  ;;  %v402_v26 = vmul.f32 0.2, %v338_v15 }
  0x83   : > { %v433_v22 = vsel %vm369_vm12, %v337_v6, %v401_v12  ;;  %v784_v24 = vpack.c.bf16 %v432_v21, %v432_v21  ;;  %591 = vst.msk [vmem:[%s1355_s23 + $0x20] sm:$0xf] %vm582_vm0, %v782_v19  ;;  %v837_v28 = vunpack.c.l.bf16 %v877_v17  ;;  %v838_v29 = vunpack.c.h.bf16 %v877_v17 }
  0x84   : > { %v785_v25 = vpack.c.bf16 %v433_v22, %v433_v22  ;;  %592 = vst.msk [vmem:[%s1355_s23 + $0x24] sm:$0xf] %vm582_vm0, %v783_v20  ;;  %v841_v30 = vunpack.c.l.bf16 %v878_v18  ;;  %v434_v31 = vsel %vm370_vm13, %v338_v15, %v402_v26  ;;  %v842_v32 = vunpack.c.h.bf16 %v878_v18 }
  0x85   : > { %593 = vst.msk [vmem:[%s1355_s23 + $0x28] sm:$0xf] %vm582_vm0, %v784_v24  ;;  %v845_v33 = vunpack.c.l.bf16 %v879_v23  ;;  %v846_v34 = vunpack.c.h.bf16 %v879_v23  ;;  %v786_v35 = vpack.c.bf16 %v434_v31, %v434_v31  ;;  %v339_v36 = vadd.f32 %v1335_v7, %v300_v27 }
  0x86   : > { %594 = vst.msk [vmem:[%s1355_s23 + $0x2c] sm:$0xf] %vm582_vm0, %v785_v25  ;;  %v301_v37 = vmul.f32 %v837_v28, %v1330_v1  ;;  %v302_v38 = vmul.f32 %v838_v29, %v1330_v1  ;;  %v303_v39 = vmul.f32 %v841_v30, %v1330_v1  ;;  %v304_v40 = vmul.f32 %v842_v32, %v1330_v1 }
  0x87   : > { %v305_v41 = vmul.f32 %v845_v33, %v1330_v1  ;;  %v306_v42 = vmul.f32 %v846_v34, %v1330_v1  ;;  %595 = vst.msk [vmem:[%s1355_s23 + $0x30] sm:$0xf] %vm582_vm0, %v786_v35  ;;  %vm371_vm14 = vcmp.ge.f32.partialorder %v339_v36, 0.0  ;;  %v403_v43 = vmul.f32 0.2, %v339_v36 }
  0x88   : > { %v340_v44 = vadd.f32 %v1335_v7, %v301_v37  ;;  %v341_v45 = vadd.f32 %v1335_v7, %v302_v38  ;;  %v342_v46 = vadd.f32 %v1335_v7, %v303_v39  ;;  %v343_v47 = vadd.f32 %v1335_v7, %v304_v40 }
  0x89   : > { %v344_v48 = vadd.f32 %v1335_v7, %v305_v41  ;;  %v345_v49 = vadd.f32 %v1335_v7, %v306_v42  ;;  %v435_v50 = vsel %vm371_vm14, %v339_v36, %v403_v43  ;;  %v849_v8 = vunpack.c.l.bf16 %v880_v57  ;;  %v884_v41 = vld [vmem:[%s1319_s19 + $0x70] sm:$0xff]  }
  0x8a   : > { %vm372_vm15 = vcmp.ge.f32.partialorder %v340_v44, 0.0  ;;  %v404_v51 = vmul.f32 0.2, %v340_v44  ;;  %vm373_vm1 = vcmp.ge.f32.partialorder %v341_v45, 0.0  ;;  %v787_v52 = vpack.c.bf16 %v435_v50, %v435_v50 }
  0x8b   : > { %v405_v53 = vmul.f32 0.2, %v341_v45  ;;  %vm374_vm2 = vcmp.ge.f32.partialorder %v342_v46, 0.0  ;;  %v406_v54 = vmul.f32 0.2, %v342_v46  ;;  %vm375_vm3 = vcmp.ge.f32.partialorder %v343_v47, 0.0 }
  0x8c   : > { %v436_v55 = vsel %vm372_vm15, %v340_v44, %v404_v51  ;;  %v407_v56 = vmul.f32 0.2, %v343_v47  ;;  %vm376_vm4 = vcmp.ge.f32.partialorder %v344_v48, 0.0  ;;  %596 = vst.msk [vmem:[%s1355_s23 + $0x34] sm:$0xf] %vm582_vm0, %v787_v52  ;;  %vm377_vm5 = vcmp.ge.f32.partialorder %v345_v49, 0.0 }
  0x8d   : > { %v788_v58 = vpack.c.bf16 %v436_v55, %v436_v55  ;;  %v437_v59 = vsel %vm373_vm1, %v341_v45, %v405_v53  ;;  %v438_v60 = vsel %vm374_vm2, %v342_v46, %v406_v54  ;;  %v408_v61 = vmul.f32 0.2, %v344_v48  ;;  %v885_v45 = vld [vmem:[%s1319_s19 + $0x78] sm:$0xff]  }
  0x8e   : > { %v789_v63 = vpack.c.bf16 %v437_v59, %v437_v59  ;;  %v790_v0 = vpack.c.bf16 %v438_v60, %v438_v60  ;;  %v439_v2 = vsel %vm375_vm3, %v343_v47, %v407_v56  ;;  %v409_v6 = vmul.f32 0.2, %v345_v49 }
  0x8f   : > { %597 = vst.msk [vmem:[%s1355_s23 + $0x38] sm:$0xf] %vm582_vm0, %v788_v58  ;;  %v791_v4 = vpack.c.bf16 %v439_v2, %v439_v2  ;;  %v440_v5 = vsel %vm376_vm4, %v344_v48, %v408_v61  ;;  %v850_v10 = vunpack.c.h.bf16 %v880_v57  ;;  %v853_v11 = vunpack.c.l.bf16 %v881_v62 }
  0x90   : > { %598 = vst.msk [vmem:[%s1355_s23 + $0x3c] sm:$0xf] %vm582_vm0, %v789_v63  ;;  %599 = vst.msk [vmem:[%s1355_s23 + $0x40] sm:$0xf] %vm582_vm0, %v790_v0  ;;  %v792_v9 = vpack.c.bf16 %v440_v5, %v440_v5  ;;  %v854_v12 = vunpack.c.h.bf16 %v881_v62  ;;  %v441_v14 = vsel %vm377_vm5, %v345_v49, %v409_v6  ;;  %v307_v15 = vmul.f32 %v849_v8, %v1330_v1 }
  0x91   : > { %600 = vst.msk [vmem:[%s1355_s23 + $0x44] sm:$0xf] %vm582_vm0, %v791_v4  ;;  %v857_v16 = vunpack.c.l.bf16 %v882_v3  ;;  %v858_v17 = vunpack.c.h.bf16 %v882_v3  ;;  %v793_v18 = vpack.c.bf16 %v441_v14, %v441_v14  ;;  %v308_v19 = vmul.f32 %v850_v10, %v1330_v1 }
  0x92   : > { %601 = vst.msk [vmem:[%s1355_s23 + $0x48] sm:$0xf] %vm582_vm0, %v792_v9  ;;  %v309_v20 = vmul.f32 %v853_v11, %v1330_v1  ;;  %v310_v21 = vmul.f32 %v854_v12, %v1330_v1  ;;  %v346_v22 = vadd.f32 %v1335_v7, %v307_v15  ;;  %v861_v25 = vunpack.c.l.bf16 %v883_v13 }
  0x93   : > { %v311_v23 = vmul.f32 %v857_v16, %v1330_v1  ;;  %v312_v24 = vmul.f32 %v858_v17, %v1330_v1  ;;  %602 = vst.msk [vmem:[%s1355_s23 + $0x4c] sm:$0xf] %vm582_vm0, %v793_v18  ;;  %v347_v26 = vadd.f32 %v1335_v7, %v308_v19  ;;  %v862_v29 = vunpack.c.h.bf16 %v883_v13 }
  0x94   : > { %v348_v27 = vadd.f32 %v1335_v7, %v309_v20  ;;  %v349_v28 = vadd.f32 %v1335_v7, %v310_v21  ;;  %vm378_vm6 = vcmp.ge.f32.partialorder %v346_v22, 0.0  ;;  %v410_v30 = vmul.f32 0.2, %v346_v22 }
  0x95   : > { %v350_v31 = vadd.f32 %v1335_v7, %v311_v23  ;;  %v351_v32 = vadd.f32 %v1335_v7, %v312_v24  ;;  %vm379_vm7 = vcmp.ge.f32.partialorder %v347_v26, 0.0  ;;  %v411_v33 = vmul.f32 0.2, %v347_v26 }
  0x96   : > { %vm380_vm8 = vcmp.ge.f32.partialorder %v348_v27, 0.0  ;;  %v412_v34 = vmul.f32 0.2, %v348_v27  ;;  %v442_v35 = vsel %vm378_vm6, %v346_v22, %v410_v30  ;;  %vm381_vm9 = vcmp.ge.f32.partialorder %v349_v28, 0.0 }
  0x97   : > { %v413_v36 = vmul.f32 0.2, %v349_v28  ;;  %vm382_vm10 = vcmp.ge.f32.partialorder %v350_v31, 0.0  ;;  %v794_v37 = vpack.c.bf16 %v442_v35, %v442_v35  ;;  %v443_v38 = vsel %vm379_vm7, %v347_v26, %v411_v33 }
  0x98   : > { %v444_v39 = vsel %vm380_vm8, %v348_v27, %v412_v34  ;;  %v414_v40 = vmul.f32 0.2, %v350_v31  ;;  %v795_v42 = vpack.c.bf16 %v443_v38, %v443_v38  ;;  %vm383_vm11 = vcmp.ge.f32.partialorder %v351_v32, 0.0 }
  0x99   : > { %v796_v43 = vpack.c.bf16 %v444_v39, %v444_v39  ;;  %v445_v44 = vsel %vm381_vm9, %v349_v28, %v413_v36  ;;  %603 = vst.msk [vmem:[%s1355_s23 + $0x50] sm:$0xf] %vm582_vm0, %v794_v37  ;;  %v415_v48 = vmul.f32 0.2, %v351_v32  ;;  %v313_v49 = vmul.f32 %v861_v25, %v1330_v1 }
  0x9a   : > { %v797_v46 = vpack.c.bf16 %v445_v44, %v445_v44  ;;  %v446_v47 = vsel %vm382_vm10, %v350_v31, %v414_v40  ;;  %604 = vst.msk [vmem:[%s1355_s23 + $0x54] sm:$0xf] %vm582_vm0, %v795_v42  ;;  %v314_v51 = vmul.f32 %v862_v29, %v1330_v1  ;;  %v865_v52 = vunpack.c.l.bf16 %v884_v41 }
  0x9b   : > { %605 = vst.msk [vmem:[%s1355_s23 + $0x58] sm:$0xf] %vm582_vm0, %v796_v43  ;;  %v798_v50 = vpack.c.bf16 %v446_v47, %v446_v47  ;;  %v866_v53 = vunpack.c.h.bf16 %v884_v41  ;;  %v447_v54 = vsel %vm383_vm11, %v351_v32, %v415_v48  ;;  %v352_v55 = vadd.f32 %v1335_v7, %v313_v49 }
  0x9c   : > { %606 = vst.msk [vmem:[%s1355_s23 + $0x5c] sm:$0xf] %vm582_vm0, %v797_v46  ;;  %v869_v56 = vunpack.c.l.bf16 %v885_v45  ;;  %v870_v57 = vunpack.c.h.bf16 %v885_v45  ;;  %v799_v58 = vpack.c.bf16 %v447_v54, %v447_v54  ;;  %v353_v59 = vadd.f32 %v1335_v7, %v314_v51 }
  0x9d   : > { %607 = vst.msk [vmem:[%s1355_s23 + $0x60] sm:$0xf] %vm582_vm0, %v798_v50  ;;  %v315_v60 = vmul.f32 %v865_v52, %v1330_v1  ;;  %v316_v61 = vmul.f32 %v866_v53, %v1330_v1  ;;  %vm384_vm12 = vcmp.ge.f32.partialorder %v352_v55, 0.0  ;;  %v416_v62 = vmul.f32 0.2, %v352_v55 }
  0x9e   : > { %v317_v63 = vmul.f32 %v869_v56, %v1330_v1  ;;  %v318_v0 = vmul.f32 %v870_v57, %v1330_v1  ;;  %608 = vst.msk [vmem:[%s1355_s23 + $0x64] sm:$0xf] %vm582_vm0, %v799_v58  ;;  %vm385_vm13 = vcmp.ge.f32.partialorder %v353_v59, 0.0  ;;  %v417_v2 = vmul.f32 0.2, %v353_v59 }
  0x9f   : > { %v354_v3 = vadd.f32 %v1335_v7, %v315_v60  ;;  %v355_v4 = vadd.f32 %v1335_v7, %v316_v61  ;;  %v448_v5 = vsel %vm384_vm12, %v352_v55, %v416_v62 }
  0xa0   : > { %v356_v6 = vadd.f32 %v1335_v7, %v317_v63  ;;  %v357_v8 = vadd.f32 %v1335_v7, %v318_v0  ;;  %v800_v9 = vpack.c.bf16 %v448_v5, %v448_v5  ;;  %v449_v10 = vsel %vm385_vm13, %v353_v59, %v417_v2 }
  0xa1   : > { %vm386_vm14 = vcmp.ge.f32.partialorder %v354_v3, 0.0  ;;  %v418_v1 = vmul.f32 0.2, %v354_v3  ;;  %v801_v11 = vpack.c.bf16 %v449_v10, %v449_v10  ;;  %vm387_vm15 = vcmp.ge.f32.partialorder %v355_v4, 0.0 }
  0xa2   : > { %v419_v12 = vmul.f32 0.2, %v355_v4  ;;  %vm388_vm1 = vcmp.ge.f32.partialorder %v356_v6, 0.0  ;;  %609 = vst.msk [vmem:[%s1355_s23 + $0x68] sm:$0xf] %vm582_vm0, %v800_v9  ;;  %vm389_vm2 = vcmp.ge.f32.partialorder %v357_v8, 0.0 }
  0xa3   : > { %v450_v13 = vsel %vm386_vm14, %v354_v3, %v418_v1  ;;  %v420_v14 = vmul.f32 0.2, %v356_v6  ;;  %v421_v7 = vmul.f32 0.2, %v357_v8  ;;  %610 = vst.msk [vmem:[%s1355_s23 + $0x6c] sm:$0xf] %vm582_vm0, %v801_v11 }
  0xa4   : > { %v802_v15 = vpack.c.bf16 %v450_v13, %v450_v13  ;;  %v451_v16 = vsel %vm387_vm15, %v355_v4, %v419_v12 }
  0xa5   : > { %v803_v17 = vpack.c.bf16 %v451_v16, %v451_v16  ;;  %v452_v18 = vsel %vm388_vm1, %v356_v6, %v420_v14  ;;  %v453_v19 = vsel %vm389_vm2, %v357_v8, %v421_v7 }
  0xa6   : > { %611 = vst.msk [vmem:[%s1355_s23 + $0x70] sm:$0xf] %vm582_vm0, %v802_v15  ;;  %v804_v20 = vpack.c.bf16 %v452_v18, %v452_v18  ;;  %v805_v21 = vpack.c.bf16 %v453_v19, %v453_v19 }
  0xa7   : > { %612 = vst.msk [vmem:[%s1355_s23 + $0x74] sm:$0xf] %vm582_vm0, %v803_v17 }
  0xa8   : > { %613 = vst.msk [vmem:[%s1355_s23 + $0x78] sm:$0xf] %vm582_vm0, %v804_v20  ;;  %614 = vst.msk [vmem:[%s1355_s23 + $0x7c] sm:$0xf] %vm582_vm0, %v805_v21 }
  0xa9   : > { %1056 = shalt.err (!%p1053_p6)
}
  0xaa   : > { %s1057_s6 = scalar_lea.hbm %s1479_s10, 2048  ;;  %s1061_s29 = scalar_lea.hbm %s1536_s3, 4096 }
  0xab   : > { %p1058_p12 = scmp.ne.s32.totalorder %s1479_s10, %s1057_s6  ;;  %p1062_p11 = scmp.lt.u32.totalorder %s1479_s10, %s1536_s3 }
  0xac   : > { %p1063_p7 = scmp.lt.u32.totalorder %s1061_s29, %s1057_s6  ;;  %p1065_p8 = scmp.lt.u32.totalorder %s1057_s6, %s1479_s10 }
  0xad   : > { %p1059_p13 = pnand %p1058_p12, %p1555_p4 }
  0xae   : > { %p1064_p3 = por %p1063_p7, %p1062_p11 }
  0xaf   : > { %p1060_p1 = pneg %p1059_p13 }
  0xb0   : > { %p1066_p5 = por %p1065_p8, %p1064_p3 }
  0xb2   : > { %p1067_p10 = pnand %p1066_p5, %p1060_p1 }
  0xb4   : > { %1070 = shalt.err (!%p1067_p10)
}
  0xb5   : > { %s1121_s19 = smov 64   ;;  %s1122_s23 = smov 4  }
  0xb6   : > { %896 = dma.vmem_to_hbm [thread:$0]  (%p1555_p4), %s1481_s30, 2048, %s1479_s10, %s616_s11, %s1121_s19, %s1121_s19, %s1122_s23  }
  0xb7 PF: > { %s644_s26 = sand.u32 1, %s1101_s12   ;;  %p1556_p2 = scmp.ne.s32.totalorder %s1545_s25, 0 }
  0xb8   : > { %p1557_p0 = scmp.ge.s32.totalorder %s1113_s15, 2  ;;  %s645_s16 = scalar_lea.sflag [#allocation4], %s644_s26 }
  0xba   : > { %p910_p9 = pnand %p1557_p0, %p1556_p2 }
  0xbc   : > { %1096 = dma.done.wait (!%p910_p9), %s645_s16, 2048  }
  0xbd   : > { %1098 = vsyncadd (!%p910_p9), %s645_s16, 4294965248  ;;  %p17_p6 = scmp.ge.s32.totalorder %s1168_s18, 4   ;;  %s1558_s12 = smov %s1105_s13 }
  0xbe   : > { %s1559_s13 = smov %s1109_s14  ;;  %s1560_s14 = smov %s1180_s21 }
  0xbf   : > { %s1561_s15 = smov %s1168_s18  ;;  %19 = sbr.rel (!%p17_p6) target bundleno = 6 (0x6), region = 85 }
  0xc6   :  { %650 = vsyncpa [#allocation3], 1 }
  0xc7   :  { %652 = vsyncpa [#allocation3 + $0x1], 1 }
  0xc8   :  { %653 = vsyncpa [#allocation6], 1 }
  0xc9   :  { %654 = vsyncpa [#allocation4], 1 }
  0xca   :  { %656 = vsyncpa [#allocation4 + $0x1], 1 }

// kernel: discriminator_forward.12
= control target key start
LH: loop header
LB: loop body
LE: loop exit
PB: predicated region body
PF: predicated region fallthrough
CT: control target
= control target key end

     0   :  { %8 = vsyncpa [#allocation3], 0  ;;  %s589_s0 = inlined_call_operand.hbm [shape: bf16[128,32], index: 0, kind: input, shape index: {}]   ;;  %s590_s1 = inlined_call_operand.hbm [shape: f32[1,32], index: 1, kind: input, shape index: {}]   ;;  %s591_s2 = inlined_call_operand.hbm [shape: f32[1,32], index: 2, kind: input, shape index: {}]   ;;  %s592_s3 = inlined_call_operand.hbm [shape: bf16[128,32], index: 3, kind: output, shape index: {}]  }
   0x1   :  { %9 = vsyncpa [#allocation6], 0 }
   0x2   :  { %10 = vsyncpa [#allocation4], 0  ;;  %s450_s12 = smov [#allocation5]   ;;  %s451_s14 = smov [#allocation2]  }
   0x3   :  { %s29_s13 = sshll.u32 %s450_s12, 4  ;;  %s16_s15 = sshll.u32 %s451_s14, 4  ;;  %s30_s13 = int_to_ptr.vmem [resolvable:$true] %s29_s13  ;;  %s476_s15 = int_to_ptr.vmem [resolvable:$true] %s16_s15 }
   0x4   :  { %s356_s18 = scalar_lea.hbm %s590_s1, 16 }
   0x5   :  { %p357_p0 = scmp.ne.s32.totalorder %s590_s1, %s356_s18  ;;  %p360_p1 = scmp.lt.u32.totalorder %s356_s18, %s590_s1 }
   0x7   :  { %p362_p2 = pnand %p360_p1, %p357_p0 }
   0x9   :  { %365 = shalt.err (!%p362_p2)
}
   0xa   :  { %s366_s23 = scalar_lea.vmem %s30_s13, 16  ;;  %s370_s24 = scalar_lea.vmem %s30_s13, 32 }
   0xb   :  { %p367_p3 = scmp.ne.s32.totalorder %s30_s13, %s366_s23  ;;  %p371_p4 = scmp.lt.s32.totalorder %s30_s13, %s30_s13 }
   0xc   :  { %p372_p5 = scmp.lt.s32.totalorder %s370_s24, %s366_s23 }
   0xe   :  { %p373_p6 = por %p372_p5, %p371_p4 }
  0x10   :  { %p374_p7 = pnand %p373_p6, %p367_p3 }
  0x12   :  { %377 = shalt.err (!%p374_p7)
}
  0x13   :  { %32 = dma.hbm_to_vmem [thread:$0]  %s590_s1, 16, %s30_s13, [#allocation6]  }
  0x14   :  { %s378_s29 = scalar_lea.hbm %s589_s0, 1024 }
  0x15   :  { %p379_p8 = scmp.ne.s32.totalorder %s589_s0, %s378_s29  ;;  %p382_p9 = scmp.lt.u32.totalorder %s378_s29, %s589_s0 }
  0x17   :  { %p384_p10 = pnand %p382_p9, %p379_p8 }
  0x19   :  { %387 = shalt.err (!%p384_p10)
}
  0x1a   :  { %s388_s7 = scalar_lea.vmem %s476_s15, 1024  ;;  %p393_p12 = scmp.lt.s32.totalorder %s476_s15, %s476_s15 }
  0x1b   :  { %p389_p11 = scmp.ne.s32.totalorder %s476_s15, %s388_s7  ;;  %p394_p13 = scmp.lt.s32.totalorder %s388_s7, %s388_s7 }
  0x1d   :  { %p395_p0 = por %p394_p13, %p393_p12 }
  0x1f   :  { %p396_p1 = pnand %p395_p0, %p389_p11 }
  0x21   :  { %399 = shalt.err (!%p396_p1)
}
  0x22   :  { %s452_s1 = smov 64   ;;  %s453_s8 = smov 4  }
  0x23   :  { %22 = dma.hbm_to_vmem [thread:$0]  %s589_s0, 1024, %s476_s15, [#allocation3], %s452_s1, %s452_s1, %s453_s8  }
  0x24   :  { %s454_s11 = smov [#allocation7]   ;;  %s400_s16 = scalar_lea.hbm %s591_s2, 16 }
  0x25   :  { %s39_s12 = sshll.u32 %s454_s11, 4  ;;  %p401_p2 = scmp.ne.s32.totalorder %s591_s2, %s400_s16  ;;  %s40_s12 = int_to_ptr.vmem [resolvable:$true] %s39_s12 }
  0x26   :  { %p404_p3 = scmp.lt.u32.totalorder %s400_s16, %s591_s2 }
  0x28   :  { %p406_p4 = pnand %p404_p3, %p401_p2 }
  0x2a   :  { %409 = shalt.err (!%p406_p4)
}
  0x2b   :  { %s410_s21 = scalar_lea.vmem %s40_s12, 16  ;;  %s414_s0 = scalar_lea.vmem %s40_s12, 32 }
  0x2c   :  { %p411_p5 = scmp.ne.s32.totalorder %s40_s12, %s410_s21  ;;  %p415_p6 = scmp.lt.s32.totalorder %s40_s12, %s40_s12 }
  0x2d   :  { %p416_p7 = scmp.lt.s32.totalorder %s414_s0, %s410_s21 }
  0x2f   :  { %p417_p8 = por %p416_p7, %p415_p6 }
  0x31   :  { %p418_p9 = pnand %p417_p8, %p411_p5 }
  0x33   :  { %421 = shalt.err (!%p418_p9)
}
  0x34   :  { %42 = dma.hbm_to_vmem [thread:$0]  %s591_s2, 16, %s40_s12, [#allocation6]  }
  0x35   :  { %444 = dma.done.wait [#allocation3], 1024  }
  0x36   :  { %445 = vsyncadd [#allocation3], 4294966272 }
  0x37   :  { %446 = dma.done.wait [#allocation6], 32  }
  0x38   :  { %447 = vsyncadd [#allocation6], 4294967264  ;;  %v312_v0 = vld [vmem:[#allocation2] sm:$0xff]   ;;  %vm242_vm0 = vcmask 257024   ;;  %v343_v4 = vld [vmem:[#allocation2 + $0x8] sm:$0xff]   ;;  %s455_s2 = smov [#allocation8]  }
  0x39   :  { %v522_v1 = vld [vmem:[#allocation5] ss:$0 sm:$0xff]  ;;  %v313_v2 = vunpack.c.l.bf16 %v312_v0  ;;  %v314_v3 = vunpack.c.h.bf16 %v312_v0  ;;  %v344_v5 = vld [vmem:[#allocation2 + $0x10] sm:$0xff]   ;;  %v345_v6 = vld [vmem:[#allocation2 + $0x18] sm:$0xff]   ;;  %v317_v8 = vunpack.c.l.bf16 %v343_v4  ;;  %v318_v9 = vunpack.c.h.bf16 %v343_v4  ;;  %s264_s23 = sshll.u32 %s455_s2, 4  ;;  %s265_s23 = int_to_ptr.vmem [resolvable:$true] %s264_s23 }
  0x3a   :  { %v524_v7 = vld [vmem:[#allocation7] ss:$0 sm:$0xff]  ;;  %v321_v10 = vunpack.c.l.bf16 %v344_v5  ;;  %v322_v11 = vunpack.c.h.bf16 %v344_v5  ;;  %v325_v14 = vunpack.c.l.bf16 %v345_v6  ;;  %v326_v15 = vunpack.c.h.bf16 %v345_v6  ;;  %v347_v40 = vld [vmem:[#allocation2 + $0x28] sm:$0xff]   ;;  %v348_v52 = vld [vmem:[#allocation2 + $0x30] sm:$0xff]   ;;  %s422_s24 = scalar_lea.vmem %s265_s23, 1024  ;;  %p427_p11 = scmp.lt.s32.totalorder %s265_s23, %s265_s23 }
  0x3b   :  { %v91_v12 = vmul.f32 %v313_v2, %v522_v1  ;;  %v92_v13 = vmul.f32 %v314_v3, %v522_v1  ;;  %v93_v16 = vmul.f32 %v317_v8, %v522_v1  ;;  %v94_v17 = vmul.f32 %v318_v9, %v522_v1  ;;  %v346_v39 = vld [vmem:[#allocation2 + $0x20] sm:$0xff]   ;;  %p423_p10 = scmp.ne.s32.totalorder %s265_s23, %s422_s24  ;;  %p428_p12 = scmp.lt.s32.totalorder %s422_s24, %s422_s24 }
  0x3c   :  { %v95_v18 = vmul.f32 %v321_v10, %v522_v1  ;;  %v96_v19 = vmul.f32 %v322_v11, %v522_v1  ;;  %v97_v22 = vmul.f32 %v325_v14, %v522_v1  ;;  %v98_v23 = vmul.f32 %v326_v15, %v522_v1 }
  0x3d   :  { %v114_v20 = vadd.f32 %v524_v7, %v91_v12  ;;  %v115_v21 = vadd.f32 %v524_v7, %v92_v13  ;;  %v116_v24 = vadd.f32 %v524_v7, %v93_v16  ;;  %v117_v25 = vadd.f32 %v524_v7, %v94_v17  ;;  %v349_v17 = vld [vmem:[#allocation2 + $0x38] sm:$0xff]   ;;  %p429_p13 = por %p428_p12, %p427_p11 }
  0x3e   :  { %v118_v26 = vadd.f32 %v524_v7, %v95_v18  ;;  %v119_v27 = vadd.f32 %v524_v7, %v96_v19  ;;  %v120_v46 = vadd.f32 %v524_v7, %v97_v22  ;;  %v121_v47 = vadd.f32 %v524_v7, %v98_v23 }
  0x3f   :  { %vm130_vm1 = vcmp.ge.f32.partialorder %v114_v20, 0.0  ;;  %v146_v28 = vmul.f32 0.2, %v114_v20  ;;  %vm131_vm2 = vcmp.ge.f32.partialorder %v115_v21, 0.0  ;;  %v147_v29 = vmul.f32 0.2, %v115_v21  ;;  %p430_p0 = pnand %p429_p13, %p423_p10 }
  0x40   :  { %vm132_vm3 = vcmp.ge.f32.partialorder %v116_v24, 0.0  ;;  %v148_v30 = vmul.f32 0.2, %v116_v24  ;;  %vm133_vm4 = vcmp.ge.f32.partialorder %v117_v25, 0.0  ;;  %v149_v31 = vmul.f32 0.2, %v117_v25 }
  0x41   :  { %v162_v32 = vsel %vm130_vm1, %v114_v20, %v146_v28  ;;  %v163_v33 = vsel %vm131_vm2, %v115_v21, %v147_v29  ;;  %vm134_vm5 = vcmp.ge.f32.partialorder %v118_v26, 0.0  ;;  %v150_v34 = vmul.f32 0.2, %v118_v26 }
  0x42   :  { %v295_v35 = vpack.c.bf16 %v162_v32, %v162_v32  ;;  %v296_v36 = vpack.c.bf16 %v163_v33, %v163_v33  ;;  %v164_v37 = vsel %vm132_vm3, %v116_v24, %v148_v30  ;;  %v165_v38 = vsel %vm133_vm4, %v117_v25, %v149_v31 }
  0x43   :  { %v297_v41 = vpack.c.bf16 %v164_v37, %v164_v37  ;;  %v298_v42 = vpack.c.bf16 %v165_v38, %v165_v38  ;;  %v166_v43 = vsel %vm134_vm5, %v118_v26, %v150_v34  ;;  %vm135_vm6 = vcmp.ge.f32.partialorder %v119_v27, 0.0 }
  0x44   :  { %243 = vst.msk [vmem:[#allocation8] sm:$0xf] %vm242_vm0, %v295_v35  ;;  %244 = vst.msk [vmem:[#allocation8 + $0x4] sm:$0xf] %vm242_vm0, %v296_v36  ;;  %v299_v44 = vpack.c.bf16 %v166_v43, %v166_v43  ;;  %v151_v45 = vmul.f32 0.2, %v119_v27  ;;  %v329_v48 = vunpack.c.l.bf16 %v346_v39  ;;  %v330_v49 = vunpack.c.h.bf16 %v346_v39 }
  0x45   :  { %245 = vst.msk [vmem:[#allocation8 + $0x8] sm:$0xf] %vm242_vm0, %v297_v41  ;;  %246 = vst.msk [vmem:[#allocation8 + $0xc] sm:$0xf] %vm242_vm0, %v298_v42  ;;  %v333_v50 = vunpack.c.l.bf16 %v347_v40  ;;  %v334_v51 = vunpack.c.h.bf16 %v347_v40  ;;  %vm136_vm7 = vcmp.ge.f32.partialorder %v120_v46, 0.0  ;;  %vm137_vm8 = vcmp.ge.f32.partialorder %v121_v47, 0.0 }
  0x46   :  { %247 = vst.msk [vmem:[#allocation8 + $0x10] sm:$0xf] %vm242_vm0, %v299_v44  ;;  %v167_v53 = vsel %vm135_vm6, %v119_v27, %v151_v45  ;;  %v152_v54 = vmul.f32 0.2, %v120_v46  ;;  %v153_v56 = vmul.f32 0.2, %v121_v47  ;;  %v99_v57 = vmul.f32 %v329_v48, %v522_v1 }
  0x47   :  { %v300_v55 = vpack.c.bf16 %v167_v53, %v167_v53  ;;  %v100_v58 = vmul.f32 %v330_v49, %v522_v1  ;;  %v101_v60 = vmul.f32 %v333_v50, %v522_v1  ;;  %v102_v61 = vmul.f32 %v334_v51, %v522_v1 }
  0x48   :  { %v168_v59 = vsel %vm136_vm7, %v120_v46, %v152_v54  ;;  %v337_v62 = vunpack.c.l.bf16 %v348_v52  ;;  %v169_v0 = vsel %vm137_vm8, %v121_v47, %v153_v56  ;;  %v122_v2 = vadd.f32 %v524_v7, %v99_v57 }
  0x49   :  { %248 = vst.msk [vmem:[#allocation8 + $0x14] sm:$0xf] %vm242_vm0, %v300_v55  ;;  %v301_v63 = vpack.c.bf16 %v168_v59, %v168_v59  ;;  %v123_v3 = vadd.f32 %v524_v7, %v100_v58  ;;  %v302_v4 = vpack.c.bf16 %v169_v0, %v169_v0  ;;  %v124_v5 = vadd.f32 %v524_v7, %v101_v60 }
  0x4a   :  { %v125_v6 = vadd.f32 %v524_v7, %v102_v61  ;;  %v103_v8 = vmul.f32 %v337_v62, %v522_v1  ;;  %vm138_vm9 = vcmp.ge.f32.partialorder %v122_v2, 0.0  ;;  %v154_v9 = vmul.f32 0.2, %v122_v2 }
  0x4b   :  { %249 = vst.msk [vmem:[#allocation8 + $0x18] sm:$0xf] %vm242_vm0, %v301_v63  ;;  %vm139_vm10 = vcmp.ge.f32.partialorder %v123_v3, 0.0  ;;  %v155_v10 = vmul.f32 0.2, %v123_v3  ;;  %vm140_vm11 = vcmp.ge.f32.partialorder %v124_v5, 0.0  ;;  %v338_v16 = vunpack.c.h.bf16 %v348_v52 }
  0x4c   :  { %250 = vst.msk [vmem:[#allocation8 + $0x1c] sm:$0xf] %vm242_vm0, %v302_v4  ;;  %v156_v11 = vmul.f32 0.2, %v124_v5  ;;  %vm141_vm12 = vcmp.ge.f32.partialorder %v125_v6, 0.0  ;;  %v170_v13 = vsel %vm138_vm9, %v122_v2, %v154_v9  ;;  %v126_v15 = vadd.f32 %v524_v7, %v103_v8 }
  0x4d   :  { %v157_v12 = vmul.f32 0.2, %v125_v6  ;;  %v171_v14 = vsel %vm139_vm10, %v123_v3, %v155_v10  ;;  %v303_v18 = vpack.c.bf16 %v170_v13, %v170_v13  ;;  %v104_v25 = vmul.f32 %v338_v16, %v522_v1 }
  0x4e   :  { %v304_v19 = vpack.c.bf16 %v171_v14, %v171_v14  ;;  %v172_v20 = vsel %vm140_vm11, %v124_v5, %v156_v11  ;;  %vm142_vm13 = vcmp.ge.f32.partialorder %v126_v15, 0.0  ;;  %v158_v24 = vmul.f32 0.2, %v126_v15 }
  0x4f   :  { %v173_v21 = vsel %vm141_vm12, %v125_v6, %v157_v12  ;;  %v305_v22 = vpack.c.bf16 %v172_v20, %v172_v20  ;;  %251 = vst.msk [vmem:[#allocation8 + $0x20] sm:$0xf] %vm242_vm0, %v303_v18  ;;  %v341_v26 = vunpack.c.l.bf16 %v349_v17  ;;  %v342_v27 = vunpack.c.h.bf16 %v349_v17 }
  0x50   :  { %v306_v23 = vpack.c.bf16 %v173_v21, %v173_v21  ;;  %252 = vst.msk [vmem:[#allocation8 + $0x24] sm:$0xf] %vm242_vm0, %v304_v19  ;;  %v174_v28 = vsel %vm142_vm13, %v126_v15, %v158_v24  ;;  %v127_v30 = vadd.f32 %v524_v7, %v104_v25 }
  0x51   :  { %253 = vst.msk [vmem:[#allocation8 + $0x28] sm:$0xf] %vm242_vm0, %v305_v22  ;;  %v307_v29 = vpack.c.bf16 %v174_v28, %v174_v28  ;;  %v105_v31 = vmul.f32 %v341_v26, %v522_v1  ;;  %v106_v32 = vmul.f32 %v342_v27, %v522_v1 }
  0x52   :  { %254 = vst.msk [vmem:[#allocation8 + $0x2c] sm:$0xf] %vm242_vm0, %v306_v23  ;;  %vm143_vm14 = vcmp.ge.f32.partialorder %v127_v30, 0.0  ;;  %v159_v33 = vmul.f32 0.2, %v127_v30 }
  0x53   :  { %255 = vst.msk [vmem:[#allocation8 + $0x30] sm:$0xf] %vm242_vm0, %v307_v29  ;;  %v128_v34 = vadd.f32 %v524_v7, %v105_v31  ;;  %v129_v35 = vadd.f32 %v524_v7, %v106_v32 }
  0x54   :  { %v175_v36 = vsel %vm143_vm14, %v127_v30, %v159_v33 }
  0x55   :  { %vm144_vm15 = vcmp.ge.f32.partialorder %v128_v34, 0.0  ;;  %v160_v37 = vmul.f32 0.2, %v128_v34  ;;  %vm145_vm1 = vcmp.ge.f32.partialorder %v129_v35, 0.0  ;;  %v308_v38 = vpack.c.bf16 %v175_v36, %v175_v36 }
  0x56   :  { %v161_v39 = vmul.f32 0.2, %v129_v35 }
  0x57   :  { %v176_v40 = vsel %vm144_vm15, %v128_v34, %v160_v37  ;;  %256 = vst.msk [vmem:[#allocation8 + $0x34] sm:$0xf] %vm242_vm0, %v308_v38 }
  0x58   :  { %v309_v1 = vpack.c.bf16 %v176_v40, %v176_v40  ;;  %v177_v41 = vsel %vm145_vm1, %v129_v35, %v161_v39 }
  0x59   :  { %v310_v42 = vpack.c.bf16 %v177_v41, %v177_v41 }
  0x5a   :  { %257 = vst.msk [vmem:[#allocation8 + $0x38] sm:$0xf] %vm242_vm0, %v309_v1 }
  0x5b   :  { %258 = vst.msk [vmem:[#allocation8 + $0x3c] sm:$0xf] %vm242_vm0, %v310_v42 }
  0x5c   :  { %433 = shalt.err (!%p430_p0)
}
  0x5d   :  { %s434_s27 = scalar_lea.hbm %s592_s3, 1024 }
  0x5e   :  { %p435_p1 = scmp.ne.s32.totalorder %s592_s3, %s434_s27  ;;  %p438_p2 = scmp.lt.u32.totalorder %s434_s27, %s592_s3 }
  0x60   :  { %p440_p3 = pnand %p438_p2, %p435_p1 }
  0x62   :  { %443 = shalt.err (!%p440_p3)
}
  0x63   :  { %270 = dma.vmem_to_hbm [thread:$0]  %s265_s23, 1024, %s592_s3, [#allocation4], %s452_s1, %s452_s1, %s453_s8  }
  0x64   :  { %448 = dma.done.wait [#allocation4], 1024  }
  0x65   :  { %449 = vsyncadd [#allocation4], 4294966272 }
  0x66   :  { %274 = vsyncpa [#allocation3], 1 }
  0x67   :  { %275 = vsyncpa [#allocation6], 1 }
  0x68   :  { %276 = vsyncpa [#allocation4], 1 }

// kernel: discriminator_forward.11
= control target key start
LH: loop header
LB: loop body
LE: loop exit
PB: predicated region body
PF: predicated region fallthrough
CT: control target
= control target key end

     0   :  { %10 = vsyncpa [#allocation4], 0  ;;  %s1247_s0 = inlined_call_operand.hbm [shape: bf16[128,256], index: 0, kind: input, shape index: {}]   ;;  %s1248_s1 = inlined_call_operand.hbm [shape: bf16[256,32], index: 1, kind: input, shape index: {}]   ;;  %s1249_s2 = inlined_call_operand.hbm [shape: bf16[128,32], index: 2, kind: output, shape index: {0}]   ;;  %s1250_s3 = inlined_call_operand.hbm [shape: f32[1,32], index: 3, kind: output, shape index: {1}]   ;;  %s1251_s4 = inlined_call_operand.hbm [shape: f32[1,32], index: 4, kind: output, shape index: {2}]  }
   0x1   :  { %11 = vsyncpa [#allocation7], 0 }
   0x2   :  { %12 = vsyncpa [#allocation5], 0 }
   0x3   :  { %13 = vsyncpa [#allocation10], 0  ;;  %s998_s15 = smov [#allocation3]   ;;  %s880_s19 = scalar_lea.hbm %s1247_s0, 2048 }
   0x4   :  { %s19_s16 = sshll.u32 %s998_s15, 4  ;;  %p881_p0 = scmp.ne.s32.totalorder %s1247_s0, %s880_s19  ;;  %s20_s16 = int_to_ptr.vmem [resolvable:$true] %s19_s16 }
   0x5   :  { %p884_p1 = scmp.lt.u32.totalorder %s880_s19, %s1247_s0 }
   0x7   :  { %p886_p2 = pnand %p884_p1, %p881_p0 }
   0x9   :  { %889 = shalt.err (!%p886_p2)
}
   0xa   :  { %s890_s24 = scalar_lea.vmem %s20_s16, 2048  ;;  %p895_p4 = scmp.lt.s32.totalorder %s20_s16, %s20_s16 }
   0xb   :  { %p891_p3 = scmp.ne.s32.totalorder %s20_s16, %s890_s24  ;;  %p896_p5 = scmp.lt.s32.totalorder %s890_s24, %s890_s24 }
   0xd   :  { %p897_p6 = por %p896_p5, %p895_p4 }
   0xf   :  { %p898_p7 = pnand %p897_p6, %p891_p3 }
  0x11   :  { %901 = shalt.err (!%p898_p7)
}
  0x12   :  { %s999_s25 = smov 128   ;;  %s1000_s26 = smov 8  }
  0x13   :  { %25 = dma.hbm_to_vmem [thread:$0]  %s1247_s0, 2048, %s20_s16, [#allocation4], %s999_s25, %s999_s25, %s1000_s26  }
  0x14   :  { %s1001_s29 = smov [#allocation6]   ;;  %s902_s7 = scalar_lea.hbm %s1248_s1, 2048 }
  0x15   :  { %s31_s30 = sshll.u32 %s1001_s29, 4  ;;  %p903_p8 = scmp.ne.s32.totalorder %s1248_s1, %s902_s7  ;;  %s32_s30 = int_to_ptr.vmem [resolvable:$true] %s31_s30 }
  0x16   :  { %p906_p9 = scmp.lt.u32.totalorder %s902_s7, %s1248_s1 }
  0x18   :  { %p908_p10 = pnand %p906_p9, %p903_p8 }
  0x1a   :  { %911 = shalt.err (!%p908_p10)
}
  0x1b   :  { %s912_s12 = scalar_lea.vmem %s32_s30, 2048  ;;  %p917_p12 = scmp.lt.s32.totalorder %s32_s30, %s32_s30 }
  0x1c   :  { %p913_p11 = scmp.ne.s32.totalorder %s32_s30, %s912_s12  ;;  %p918_p13 = scmp.lt.s32.totalorder %s912_s12, %s912_s12 }
  0x1e   :  { %p919_p0 = por %p918_p13, %p917_p12 }
  0x20   :  { %p920_p1 = pnand %p919_p0, %p913_p11 }
  0x22   :  { %923 = shalt.err (!%p920_p1)
}
  0x23   :  { %s1002_s0 = smov 64   ;;  %s1003_s13 = smov 4  }
  0x24   :  { %37 = dma.hbm_to_vmem [thread:$0]  %s1248_s1, 2048, %s32_s30, [#allocation7], %s1002_s0, %s1002_s0, %s1003_s13  }
  0x25   :  { %990 = dma.done.wait [#allocation4], 2048  }
  0x26   :  { %991 = vsyncadd [#allocation4], 4294965248 }
  0x27   :  { %992 = dma.done.wait [#allocation7], 2048  }
  0x28   :  { %993 = vsyncadd [#allocation7], 4294965248  ;;  %v840_v0 = vld [vmem:[#allocation6 + $0x40] sm:$0xff]   ;;  %v842_v2 = vld [vmem:[#allocation6 + $0x48] sm:$0xff]   ;;  %vm57_vm0 = vcmask 261120   ;;  %v1004_v32 = vmov 0.0  }
  0x29   :  { %v841_v1 = vld [vmem:[#allocation6] sm:$0xff]   ;;  %750 = vmatprep.subr.bf16.mxu0 %v840_v0  ;;  %814 = vmatprep.subr.bf16.mxu1 %v840_v0  ;;  %v843_v3 = vld [vmem:[#allocation6 + $0x8] sm:$0xff]   ;;  %v844_v4 = vld [vmem:[#allocation6 + $0x50] sm:$0xff]   ;;  %58 = vst.msk [vmem:[#allocation2] sm:$0xff] %vm57_vm0, %v1004_v32  ;;  %vm51_vm1 = vcmask 253952   ;;  %vm527_vm2 = vcmask 257024  }
  0x2a   :  { %751 = vmatpush3.bf16.msra.mxu0 %v841_v1  ;;  %822 = vmatpush3.bf16.msra.mxu1 %v841_v1  ;;  %v845_v5 = vld [vmem:[#allocation6 + $0x10] sm:$0xff]   ;;  %v846_v6 = vld [vmem:[#allocation6 + $0x58] sm:$0xff]   ;;  %v848_v8 = vld [vmem:[#allocation6 + $0x60] sm:$0xff]   ;;  %59 = vst.msk [vmem:[#allocation2 + $0x8] sm:$0xff] %vm57_vm0, %v1004_v32  ;;  %s1005_s1 = smov [#allocation8]  }
  0x2b   :  { %752 = vmatprep.subr.bf16.mxu0 %v842_v2  ;;  %815 = vmatprep.subr.bf16.mxu1 %v842_v2  ;;  %v847_v7 = vld [vmem:[#allocation6 + $0x18] sm:$0xff]   ;;  %v849_v9 = vld [vmem:[#allocation6 + $0x20] sm:$0xff]   ;;  %v850_v10 = vld [vmem:[#allocation6 + $0x68] sm:$0xff]   ;;  %60 = vst.msk [vmem:[#allocation2 + $0x10] sm:$0xff] %vm57_vm0, %v1004_v32  ;;  %s646_s16 = sshll.u32 %s1005_s1, 4  ;;  %s647_s16 = int_to_ptr.vmem [resolvable:$true] %s646_s16 }
  0x2c   :  { %v858_v11 = vld [vmem:[#allocation3 + $0x4] ss:$8 sps:$4 sm:$0xff]   ;;  %v852_v14 = vld [vmem:[#allocation6 + $0x70] sm:$0xff]   ;;  %v854_v16 = vld [vmem:[#allocation6 + $0x78] sm:$0xff]   ;;  %61 = vst.msk [vmem:[#allocation2 + $0x18] sm:$0xff] %vm57_vm0, %v1004_v32  ;;  %s924_s17 = scalar_lea.vmem %s647_s16, 1024  ;;  %p929_p3 = scmp.lt.s32.totalorder %s647_s16, %s647_s16 }
  0x2d   :  { %v851_v12 = vld [vmem:[#allocation6 + $0x28] sm:$0xff]   ;;  %346 = vmatprep.mubr.bf16.mxu0 %v858_v11  ;;  %v853_v15 = vld [vmem:[#allocation6 + $0x30] sm:$0xff]   ;;  %v855_v17 = vld [vmem:[#allocation6 + $0x38] sm:$0xff]   ;;  %62 = vst.msk [vmem:[#allocation2 + $0x20] sm:$0xff] %vm57_vm0, %v1004_v32  ;;  %p925_p2 = scmp.ne.s32.totalorder %s647_s16, %s924_s17  ;;  %p930_p4 = scmp.lt.s32.totalorder %s924_s17, %s924_s17 }
  0x2e   :  { %753 = vmatpush3.bf16.msra.mxu0 %v843_v3  ;;  %823 = vmatpush3.bf16.msra.mxu1 %v843_v3  ;;  %v864_v13 = vld [vmem:[#allocation3 + $0x44] ss:$8 sps:$4 sm:$0xff]   ;;  %v856_v18 = vld [vmem:[#allocation3] ss:$8 sps:$4 sm:$0xff]   ;;  %v859_v20 = vld [vmem:[#allocation3 + $0x14] ss:$8 sps:$4 sm:$0xff]  }
  0x2f   :  { %754 = vmatprep.subr.bf16.mxu0 %v844_v4  ;;  %816 = vmatprep.subr.bf16.mxu1 %v844_v4  ;;  %v862_v19 = vld [vmem:[#allocation3 + $0x40] ss:$8 sps:$4 sm:$0xff]   ;;  %v868_v21 = vld [vmem:[#allocation3 + $0x54] ss:$8 sps:$4 sm:$0xff]   ;;  %v861_v22 = vld [vmem:[#allocation3 + $0x10] ss:$8 sps:$4 sm:$0xff]   ;;  %p931_p5 = por %p930_p4, %p929_p3 }
  0x30   :  { %378 = vmatprep.mubr.bf16.mxu1 %v864_v13  ;;  %v870_v23 = vld [vmem:[#allocation3 + $0x50] ss:$8 sps:$4 sm:$0xff]   ;;  %v865_v24 = vld [vmem:[#allocation3 + $0x24] ss:$8 sps:$4 sm:$0xff]   ;;  %v867_v26 = vld [vmem:[#allocation3 + $0x20] ss:$8 sps:$4 sm:$0xff]  }
  0x31   :  { %v874_v25 = vld [vmem:[#allocation3 + $0x64] ss:$8 sps:$4 sm:$0xff]   ;;  %v876_v27 = vld [vmem:[#allocation3 + $0x60] ss:$8 sps:$4 sm:$0xff]   ;;  %v871_v28 = vld [vmem:[#allocation3 + $0x34] ss:$8 sps:$4 sm:$0xff]   ;;  %p932_p6 = pnand %p931_p5, %p925_p2 }
  0x32   :  { %755 = vmatpush3.bf16.msra.mxu0 %v845_v5  ;;  %824 = vmatpush3.bf16.msra.mxu1 %v845_v5  ;;  %v877_v29 = vld [vmem:[#allocation3 + $0x74] ss:$8 sps:$4 sm:$0xff]   ;;  %v873_v30 = vld [vmem:[#allocation3 + $0x30] ss:$8 sps:$4 sm:$0xff]   ;;  %63 = vst.msk [vmem:[#allocation2 + $0x28] sm:$0xff] %vm57_vm0, %v1004_v32  ;;  %64 = vst.msk [vmem:[#allocation2 + $0x30] sm:$0xff] %vm57_vm0, %v1004_v32 }
  0x33   :  { %756 = vmatprep.subr.bf16.mxu0 %v846_v6  ;;  %817 = vmatprep.subr.bf16.mxu1 %v846_v6  ;;  %v879_v31 = vld [vmem:[#allocation3 + $0x70] ss:$8 sps:$4 sm:$0xff]   ;;  %65 = vst.msk [vmem:[#allocation2 + $0x38] sm:$0xff] %vm57_vm0, %v1004_v32  ;;  %66 = vst.msk [vmem:[#allocation2 + $0x40] sm:$0xff] %vm57_vm0, %v1004_v32  ;;  %v74_v35 = vld [vmem:[#allocation2] sm:$0xff] }
  0x34   :  { %67 = vst.msk [vmem:[#allocation2 + $0x48] sm:$0xff] %vm57_vm0, %v1004_v32  ;;  %68 = vst.msk [vmem:[#allocation2 + $0x50] sm:$0xff] %vm57_vm0, %v1004_v32  ;;  %v75_v43 = vld [vmem:[#allocation2 + $0x8] sm:$0xff]  ;;  %v76_v55 = vld [vmem:[#allocation2 + $0x10] sm:$0xff] }
  0x35   :  { %69 = vst.msk [vmem:[#allocation2 + $0x58] sm:$0xff] %vm57_vm0, %v1004_v32  ;;  %70 = vst.msk [vmem:[#allocation2 + $0x60] sm:$0xff] %vm57_vm0, %v1004_v32  ;;  %v77_v63 = vld [vmem:[#allocation2 + $0x18] sm:$0xff] }
  0x36   :  { %757 = vmatpush3.bf16.msra.mxu0 %v847_v7  ;;  %825 = vmatpush3.bf16.msra.mxu1 %v847_v7  ;;  %71 = vst.msk [vmem:[#allocation2 + $0x68] sm:$0xff] %vm57_vm0, %v1004_v32  ;;  %72 = vst.msk [vmem:[#allocation2 + $0x70] sm:$0xff] %vm57_vm0, %v1004_v32 }
  0x37   :  { %758 = vmatprep.subr.bf16.mxu0 %v848_v8  ;;  %818 = vmatprep.subr.bf16.mxu1 %v848_v8  ;;  %73 = vst.msk [vmem:[#allocation2 + $0x78] sm:$0xff] %vm57_vm0, %v1004_v32 }
  0x38   :  { %52 = vst.msk [vmem:[#allocation9] sm:$0x1] %vm51_vm1, %v1004_v32  ;;  %53 = vst.msk [vmem:[#allocation11] sm:$0x1] %vm51_vm1, %v1004_v32 }
  0x3a   :  { %759 = vmatpush3.bf16.msra.mxu0 %v849_v9  ;;  %826 = vmatpush3.bf16.msra.mxu1 %v849_v9  ;;  %v82_v37 = vld [vmem:[#allocation2 + $0x40] sm:$0xff] }
  0x3b   :  { %760 = vmatprep.subr.bf16.mxu0 %v850_v10  ;;  %819 = vmatprep.subr.bf16.mxu1 %v850_v10  ;;  %v83_v45 = vld [vmem:[#allocation2 + $0x48] sm:$0xff]  ;;  %v84_v57 = vld [vmem:[#allocation2 + $0x50] sm:$0xff] }
  0x3c   :  { %v85_v5 = vld [vmem:[#allocation2 + $0x58] sm:$0xff] }
  0x3e   :  { %761 = vmatpush3.bf16.msra.mxu0 %v851_v12  ;;  %827 = vmatpush3.bf16.msra.mxu1 %v851_v12 }
  0x3f   :  { %762 = vmatprep.subr.bf16.mxu0 %v852_v14  ;;  %820 = vmatprep.subr.bf16.mxu1 %v852_v14 }
  0x42   :  { %763 = vmatpush3.bf16.msra.mxu0 %v853_v15  ;;  %828 = vmatpush3.bf16.msra.mxu1 %v853_v15 }
  0x43   :  { %764 = vmatprep.subr.bf16.mxu0 %v854_v16  ;;  %821 = vmatprep.subr.bf16.mxu1 %v854_v16 }
  0x46   :  { %765 = vmatpush3.bf16.msra.mxu0 %v855_v17  ;;  %829 = vmatpush3.bf16.msra.mxu1 %v855_v17 }
  0x49   :  { %347 = vmatmul.mubr.bf16.vlgmr.msra.gmra.mrb[0].mxu0 %v856_v18  ;;  %379 = vmatmul.mubr.bf16.vlgmr.msra.gmra.mrb[0].mxu1 %v862_v19  ;;  %v78_v18 = vld [vmem:[#allocation2 + $0x20] sm:$0xff] }
  0x4a   :  { %354 = vmatprep.mubr.bf16.mxu0 %v859_v20  ;;  %386 = vmatprep.mubr.bf16.mxu1 %v868_v21  ;;  %v86_v20 = vld [vmem:[#allocation2 + $0x60] sm:$0xff] }
  0x51   :  { %355 = vmatmul.mubr.bf16.gmra.mrb[4].mxu0 %v861_v22  ;;  %387 = vmatmul.mubr.bf16.gmra.mrb[4].mxu1 %v870_v23 }
  0x52   :  { %362 = vmatprep.mubr.bf16.mxu0 %v865_v24  ;;  %394 = vmatprep.mubr.bf16.mxu1 %v874_v25 }
  0x59   :  { %363 = vmatmul.mubr.bf16.gmra.mrb[8].mxu0 %v867_v26  ;;  %395 = vmatmul.mubr.bf16.gmra.mrb[8].mxu1 %v876_v27 }
  0x5a   :  { %370 = vmatprep.mubr.bf16.mxu0 %v871_v28  ;;  %402 = vmatprep.mubr.bf16.mxu1 %v877_v29  ;;  %v79_v28 = vld [vmem:[#allocation2 + $0x28] sm:$0xff] }
  0x61   :  { %371 = vmatmul.mubr.bf16.gmra.mrb[12].mxu0 %v873_v30  ;;  %403 = vmatmul.mubr.bf16.gmra.mrb[12].mxu1 %v879_v31  ;;  %v87_v30 = vld [vmem:[#allocation2 + $0x68] sm:$0xff] }
 0x11c   :  { %v766_v33 = vpop.f32.mrb[0].mxu0  ;;  %v790_v34 = vpop.f32.mrb[0].mxu1 }
 0x11d   :  { %v767_v36 = vpop.f32.mrb[1].mxu0  ;;  %v791_v38 = vpop.f32.mrb[1].mxu1 }
 0x11e   :  { %v768_v39 = vadd.f32 %v767_v36, %v766_v33  ;;  %v769_v40 = vpop.f32.mrb[2].mxu0  ;;  %v792_v41 = vadd.f32 %v791_v38, %v790_v34  ;;  %v793_v42 = vpop.f32.mrb[2].mxu1 }
 0x11f   :  { %v770_v44 = vpop.f32.mrb[3].mxu0  ;;  %v794_v46 = vpop.f32.mrb[3].mxu1 }
 0x120   :  { %v411_v47 = vadd.f32 %v768_v39, %v74_v35  ;;  %v771_v48 = vadd.f32 %v770_v44, %v769_v40  ;;  %v419_v49 = vadd.f32 %v792_v41, %v82_v37  ;;  %v795_v50 = vadd.f32 %v794_v46, %v793_v42 }
 0x122   :  { %428 = vst.msk [vmem:[#allocation2] sm:$0xff] %vm57_vm0, %v411_v47  ;;  %v412_v51 = vadd.f32 %v771_v48, %v75_v43  ;;  %436 = vst.msk [vmem:[#allocation2 + $0x40] sm:$0xff] %vm57_vm0, %v419_v49  ;;  %v420_v52 = vadd.f32 %v795_v50, %v83_v45 }
 0x124   :  { %429 = vst.msk [vmem:[#allocation2 + $0x8] sm:$0xff] %vm57_vm0, %v412_v51  ;;  %v772_v53 = vpop.f32.mrb[4].mxu0  ;;  %437 = vst.msk [vmem:[#allocation2 + $0x48] sm:$0xff] %vm57_vm0, %v420_v52  ;;  %v796_v54 = vpop.f32.mrb[4].mxu1 }
 0x125   :  { %v773_v56 = vpop.f32.mrb[5].mxu0  ;;  %v797_v58 = vpop.f32.mrb[5].mxu1 }
 0x126   :  { %v774_v59 = vadd.f32 %v773_v56, %v772_v53  ;;  %v775_v60 = vpop.f32.mrb[6].mxu0  ;;  %v798_v61 = vadd.f32 %v797_v58, %v796_v54  ;;  %v799_v62 = vpop.f32.mrb[6].mxu1  ;;  %v80_v53 = vld [vmem:[#allocation2 + $0x30] sm:$0xff] }
 0x127   :  { %v776_v0 = vpop.f32.mrb[7].mxu0  ;;  %v800_v1 = vpop.f32.mrb[7].mxu1 }
 0x128   :  { %v413_v2 = vadd.f32 %v774_v59, %v76_v55  ;;  %v777_v3 = vadd.f32 %v776_v0, %v775_v60  ;;  %v421_v4 = vadd.f32 %v798_v61, %v84_v57  ;;  %v801_v6 = vadd.f32 %v800_v1, %v799_v62  ;;  %v88_v55 = vld [vmem:[#allocation2 + $0x70] sm:$0xff] }
 0x129   :  { %v447_v7 = vld [vmem:[#allocation2] sm:$0xff] }
 0x12a   :  { %v1082_v8 = vld [vmem:[#allocation2 + $0x40] sm:$0xff]  ;;  %v734_v9 = vpack.c.bf16 %v447_v7, %v447_v7  ;;  %430 = vst.msk [vmem:[#allocation2 + $0x10] sm:$0xff] %vm57_vm0, %v413_v2  ;;  %v414_v10 = vadd.f32 %v777_v3, %v77_v63  ;;  %438 = vst.msk [vmem:[#allocation2 + $0x50] sm:$0xff] %vm57_vm0, %v421_v4  ;;  %v422_v12 = vadd.f32 %v801_v6, %v85_v5  ;;  %v545_v46 = vsel %vm57_vm0, %v447_v7, 0.0  ;;  %v81_v2 = vld [vmem:[#allocation2 + $0x38] sm:$0xff] }
 0x12b   :  { %v448_v11 = vld [vmem:[#allocation2 + $0x8] sm:$0xff]  ;;  %v742_v14 = vpack.c.bf16 %v1082_v8, %v1082_v8  ;;  %v586_v36 = vmul.f32 %v447_v7, %v447_v7  ;;  %v89_v4 = vld [vmem:[#allocation2 + $0x78] sm:$0xff] }
 0x12c   :  { %v1086_v13 = vld [vmem:[#allocation2 + $0x48] sm:$0xff]  ;;  %528 = vst.msk [vmem:[#allocation8] sm:$0xf] %vm527_vm2, %v734_v9  ;;  %v735_v15 = vpack.c.bf16 %v448_v11, %v448_v11  ;;  %v778_v16 = vpop.f32.mrb[8].mxu0  ;;  %v802_v17 = vpop.f32.mrb[8].mxu1  ;;  %v587_v27 = vmul.f32 %v448_v11, %v448_v11  ;;  %v546_v37 = vsel %vm57_vm0, %v448_v11, 0.0 }
 0x12d   :  { %431 = vst.msk [vmem:[#allocation2 + $0x18] sm:$0xff] %vm57_vm0, %v414_v10  ;;  %v779_v19 = vpop.f32.mrb[9].mxu0  ;;  %439 = vst.msk [vmem:[#allocation2 + $0x58] sm:$0xff] %vm57_vm0, %v422_v12  ;;  %v803_v21 = vpop.f32.mrb[9].mxu1  ;;  %v743_v22 = vpack.c.bf16 %v1086_v13, %v1086_v13  ;;  %v547_v58 = vadd.f32 %v546_v37, %v545_v46  ;;  %v602_v59 = vsel %vm57_vm0, %v586_v36, 0.0 }
 0x12e   :  { %536 = vst.msk [vmem:[#allocation8 + $0x20] sm:$0xf] %vm527_vm2, %v742_v14  ;;  %529 = vst.msk [vmem:[#allocation8 + $0x4] sm:$0xf] %vm527_vm2, %v735_v15  ;;  %v780_v23 = vadd.f32 %v779_v19, %v778_v16  ;;  %v781_v24 = vpop.f32.mrb[10].mxu0  ;;  %v804_v25 = vadd.f32 %v803_v21, %v802_v17  ;;  %v805_v26 = vpop.f32.mrb[10].mxu1 }
 0x12f   :  { %v782_v29 = vpop.f32.mrb[11].mxu0  ;;  %v806_v31 = vpop.f32.mrb[11].mxu1  ;;  %537 = vst.msk [vmem:[#allocation8 + $0x24] sm:$0xf] %vm527_vm2, %v743_v22  ;;  %v603_v47 = vsel %vm57_vm0, %v587_v27, 0.0 }
 0x130   :  { %v415_v32 = vadd.f32 %v780_v23, %v78_v18  ;;  %v783_v33 = vadd.f32 %v782_v29, %v781_v24  ;;  %v423_v34 = vadd.f32 %v804_v25, %v86_v20  ;;  %v807_v35 = vadd.f32 %v806_v31, %v805_v26 }
 0x131   :  { %v449_v38 = vld [vmem:[#allocation2 + $0x10] sm:$0xff]  ;;  %v604_v9 = vadd.f32 %v603_v47, %v602_v59 }
 0x132   :  { %v1099_v39 = vld [vmem:[#allocation2 + $0x50] sm:$0xff]  ;;  %v736_v40 = vpack.c.bf16 %v449_v38, %v449_v38  ;;  %v588_v41 = vmul.f32 %v449_v38, %v449_v38  ;;  %432 = vst.msk [vmem:[#allocation2 + $0x20] sm:$0xff] %vm57_vm0, %v415_v32  ;;  %v416_v42 = vadd.f32 %v783_v33, %v79_v28  ;;  %440 = vst.msk [vmem:[#allocation2 + $0x60] sm:$0xff] %vm57_vm0, %v423_v34  ;;  %v548_v52 = vsel %vm57_vm0, %v449_v38, 0.0 }
 0x133   :  { %v424_v43 = vadd.f32 %v807_v35, %v87_v30  ;;  %v744_v45 = vpack.c.bf16 %v1099_v39, %v1099_v39  ;;  %v549_v6 = vadd.f32 %v548_v52, %v547_v58 }
 0x134   :  { %v450_v44 = vld [vmem:[#allocation2 + $0x18] sm:$0xff]  ;;  %530 = vst.msk [vmem:[#allocation8 + $0x8] sm:$0xf] %vm527_vm2, %v736_v40  ;;  %v784_v49 = vpop.f32.mrb[12].mxu0  ;;  %v808_v50 = vpop.f32.mrb[12].mxu1  ;;  %v605_v0 = vsel %vm57_vm0, %v588_v41, 0.0 }
 0x135   :  { %v737_v48 = vpack.c.bf16 %v450_v44, %v450_v44  ;;  %433 = vst.msk [vmem:[#allocation2 + $0x28] sm:$0xff] %vm57_vm0, %v416_v42  ;;  %441 = vst.msk [vmem:[#allocation2 + $0x68] sm:$0xff] %vm57_vm0, %v424_v43  ;;  %v1110_v51 = vld [vmem:[#allocation2 + $0x58] sm:$0xff]  ;;  %v785_v54 = vpop.f32.mrb[13].mxu0  ;;  %v809_v56 = vpop.f32.mrb[13].mxu1  ;;  %v589_v1 = vmul.f32 %v450_v44, %v450_v44  ;;  %v550_v7 = vsel %vm57_vm0, %v450_v44, 0.0  ;;  %v606_v17 = vadd.f32 %v605_v0, %v604_v9 }
 0x136   :  { %v745_v57 = vpack.c.bf16 %v1110_v51, %v1110_v51  ;;  %538 = vst.msk [vmem:[#allocation8 + $0x28] sm:$0xf] %vm527_vm2, %v744_v45  ;;  %v786_v60 = vadd.f32 %v785_v54, %v784_v49  ;;  %v787_v61 = vpop.f32.mrb[14].mxu0  ;;  %v810_v62 = vadd.f32 %v809_v56, %v808_v50  ;;  %v811_v63 = vpop.f32.mrb[14].mxu1  ;;  %v551_v24 = vadd.f32 %v550_v7, %v549_v6 }
 0x137   :  { %531 = vst.msk [vmem:[#allocation8 + $0xc] sm:$0xf] %vm527_vm2, %v737_v48  ;;  %v788_v3 = vpop.f32.mrb[15].mxu0  ;;  %v812_v5 = vpop.f32.mrb[15].mxu1  ;;  %v607_v27 = vsel %vm57_vm0, %v589_v1, 0.0 }
 0x138   :  { %539 = vst.msk [vmem:[#allocation8 + $0x2c] sm:$0xf] %vm527_vm2, %v745_v57  ;;  %v417_v10 = vadd.f32 %v786_v60, %v80_v53  ;;  %v789_v11 = vadd.f32 %v788_v3, %v787_v61  ;;  %v425_v12 = vadd.f32 %v810_v62, %v88_v55  ;;  %v813_v14 = vadd.f32 %v812_v5, %v811_v63 }
 0x139   :  { %v451_v15 = vld [vmem:[#allocation2 + $0x20] sm:$0xff]  ;;  %v608_v34 = vadd.f32 %v607_v27, %v606_v17  ;;  %v594_v55 = vmul.f32 %v1082_v8, %v1082_v8  ;;  %v560_v57 = vsel %vm57_vm0, %v1082_v8, 0.0 }
 0x13a   :  { %v1121_v16 = vld [vmem:[#allocation2 + $0x60] sm:$0xff]  ;;  %v738_v18 = vpack.c.bf16 %v451_v15, %v451_v15  ;;  %434 = vst.msk [vmem:[#allocation2 + $0x30] sm:$0xff] %vm57_vm0, %v417_v10  ;;  %v418_v19 = vadd.f32 %v789_v11, %v81_v2  ;;  %442 = vst.msk [vmem:[#allocation2 + $0x70] sm:$0xff] %vm57_vm0, %v425_v12  ;;  %v426_v20 = vadd.f32 %v813_v14, %v89_v4  ;;  %v552_v25 = vsel %vm57_vm0, %v451_v15, 0.0 }
 0x13b   :  { %v746_v21 = vpack.c.bf16 %v1121_v16, %v1121_v16  ;;  %v590_v26 = vmul.f32 %v451_v15, %v451_v15  ;;  %v553_v30 = vadd.f32 %v552_v25, %v551_v24 }
 0x13c   :  { %v452_v22 = vld [vmem:[#allocation2 + $0x28] sm:$0xff]  ;;  %532 = vst.msk [vmem:[#allocation8 + $0x10] sm:$0xf] %vm527_vm2, %v738_v18 }
 0x13d   :  { %v1127_v23 = vld [vmem:[#allocation2 + $0x68] sm:$0xff]  ;;  %435 = vst.msk [vmem:[#allocation2 + $0x38] sm:$0xff] %vm57_vm0, %v418_v19  ;;  %443 = vst.msk [vmem:[#allocation2 + $0x78] sm:$0xff] %vm57_vm0, %v426_v20  ;;  %v739_v28 = vpack.c.bf16 %v452_v22, %v452_v22  ;;  %v591_v31 = vmul.f32 %v452_v22, %v452_v22  ;;  %v609_v32 = vsel %vm57_vm0, %v590_v26, 0.0  ;;  %v554_v33 = vsel %vm57_vm0, %v452_v22, 0.0 }
 0x13e   :  { %v747_v29 = vpack.c.bf16 %v1127_v23, %v1127_v23  ;;  %540 = vst.msk [vmem:[#allocation8 + $0x30] sm:$0xf] %vm527_vm2, %v746_v21  ;;  %v610_v35 = vadd.f32 %v609_v32, %v608_v34  ;;  %v555_v38 = vadd.f32 %v554_v33, %v553_v30 }
 0x13f   :  { %533 = vst.msk [vmem:[#allocation8 + $0x14] sm:$0xf] %vm527_vm2, %v739_v28  ;;  %v611_v40 = vsel %vm57_vm0, %v591_v31, 0.0 }
 0x140   :  { %541 = vst.msk [vmem:[#allocation8 + $0x34] sm:$0xf] %vm527_vm2, %v747_v29  ;;  %v612_v52 = vadd.f32 %v611_v40, %v610_v35 }
 0x141   :  { %v453_v36 = vld [vmem:[#allocation2 + $0x30] sm:$0xff] }
 0x142   :  { %v1141_v37 = vld [vmem:[#allocation2 + $0x70] sm:$0xff]  ;;  %v740_v41 = vpack.c.bf16 %v453_v36, %v453_v36  ;;  %v556_v43 = vsel %vm57_vm0, %v453_v36, 0.0  ;;  %v592_v47 = vmul.f32 %v453_v36, %v453_v36 }
 0x143   :  { %v748_v42 = vpack.c.bf16 %v1141_v37, %v1141_v37  ;;  %v557_v46 = vadd.f32 %v556_v43, %v555_v38 }
 0x144   :  { %v454_v44 = vld [vmem:[#allocation2 + $0x38] sm:$0xff]  ;;  %534 = vst.msk [vmem:[#allocation8 + $0x18] sm:$0xf] %vm527_vm2, %v740_v41  ;;  %v613_v56 = vsel %vm57_vm0, %v592_v47, 0.0 }
 0x145   :  { %v1147_v45 = vld [vmem:[#allocation2 + $0x78] sm:$0xff]  ;;  %v741_v48 = vpack.c.bf16 %v454_v44, %v454_v44  ;;  %542 = vst.msk [vmem:[#allocation8 + $0x38] sm:$0xf] %vm527_vm2, %v748_v42  ;;  %v558_v50 = vsel %vm57_vm0, %v454_v44, 0.0  ;;  %v593_v54 = vmul.f32 %v454_v44, %v454_v44  ;;  %v614_v58 = vadd.f32 %v613_v56, %v612_v52 }
 0x146   :  { %v749_v49 = vpack.c.bf16 %v1147_v45, %v1147_v45  ;;  %v559_v53 = vadd.f32 %v558_v50, %v557_v46 }
 0x147   :  { %535 = vst.msk [vmem:[#allocation8 + $0x1c] sm:$0xf] %vm527_vm2, %v741_v48 }
 0x148   :  { %543 = vst.msk [vmem:[#allocation8 + $0x3c] sm:$0xf] %vm527_vm2, %v749_v49  ;;  %v561_v59 = vadd.f32 %v560_v57, %v559_v53 }
 0x149   :  { %935 = shalt.err (!%p932_p6)
}
 0x14a   :  { %s936_s20 = scalar_lea.hbm %s1249_s2, 1024 }
 0x14b   :  { %p937_p7 = scmp.ne.s32.totalorder %s1249_s2, %s936_s20  ;;  %p940_p8 = scmp.lt.u32.totalorder %s936_s20, %s1249_s2 }
 0x14d   :  { %p942_p9 = pnand %p940_p8, %p937_p7 }
 0x14f   :  { %945 = shalt.err (!%p942_p9)
}
 0x150   :  { %652 = dma.vmem_to_hbm [thread:$0]  %s647_s16, 1024, %s1249_s2, [#allocation5], %s1002_s0, %s1002_s0, %s1003_s13   ;;  %v595_v8 = vmul.f32 %v1086_v13, %v1086_v13  ;;  %v615_v60 = vsel %vm57_vm0, %v593_v54, 0.0  ;;  %v562_v61 = vsel %vm57_vm0, %v1086_v13, 0.0  ;;  %v596_v0 = vmul.f32 %v1099_v39, %v1099_v39  ;;  %v544_v42 = vld [vmem:[#allocation9] sm:$0x1] }
 0x151   :  { %v616_v62 = vadd.f32 %v615_v60, %v614_v58  ;;  %v563_v63 = vadd.f32 %v562_v61, %v561_v59  ;;  %v617_v1 = vsel %vm57_vm0, %v594_v55, 0.0  ;;  %v564_v2 = vsel %vm57_vm0, %v1099_v39, 0.0  ;;  %s1006_s2 = smov [#allocation9]   ;;  %s1007_s28 = smov [#allocation11]   ;;  %v585_v47 = vld [vmem:[#allocation11] sm:$0x1] }
 0x152   :  { %v597_v5 = vmul.f32 %v1110_v51, %v1110_v51  ;;  %v619_v6 = vsel %vm57_vm0, %v595_v8, 0.0  ;;  %v566_v13 = vsel %vm57_vm0, %v1110_v51, 0.0  ;;  %v598_v10 = vmul.f32 %v1121_v16, %v1121_v16  ;;  %s659_s27 = sshll.u32 %s1006_s2, 4  ;;  %s669_s29 = sshll.u32 %s1007_s28, 4  ;;  %s660_s27 = int_to_ptr.vmem [resolvable:$true] %s659_s27  ;;  %s1214_s29 = int_to_ptr.vmem [resolvable:$true] %s669_s29 }
 0x153   :  { %v618_v3 = vadd.f32 %v617_v1, %v616_v62  ;;  %v565_v4 = vadd.f32 %v564_v2, %v563_v63  ;;  %v621_v11 = vsel %vm57_vm0, %v596_v0, 0.0  ;;  %v568_v39 = vsel %vm57_vm0, %v1121_v16, 0.0  ;;  %s946_s30 = scalar_lea.vmem %s660_s27, 16  ;;  %s950_s5 = scalar_lea.vmem %s660_s27, 32 }
 0x154   :  { %v599_v15 = vmul.f32 %v1127_v23, %v1127_v23  ;;  %v600_v17 = vmul.f32 %v1141_v37, %v1141_v37  ;;  %v623_v51 = vsel %vm57_vm0, %v597_v5, 0.0  ;;  %v570_v18 = vsel %vm57_vm0, %v1127_v23, 0.0  ;;  %p947_p10 = scmp.ne.s32.totalorder %s660_s27, %s946_s30  ;;  %p951_p11 = scmp.lt.s32.totalorder %s660_s27, %s660_s27 }
 0x155   :  { %v620_v7 = vadd.f32 %v619_v6, %v618_v3  ;;  %v567_v9 = vadd.f32 %v566_v13, %v565_v4  ;;  %v572_v19 = vsel %vm57_vm0, %v1141_v37, 0.0  ;;  %v625_v16 = vsel %vm57_vm0, %v598_v10, 0.0  ;;  %p952_p12 = scmp.lt.s32.totalorder %s950_s5, %s946_s30 }
 0x156   :  { %v601_v25 = vmul.f32 %v1147_v45, %v1147_v45  ;;  %v627_v26 = vsel %vm57_vm0, %v599_v15, 0.0  ;;  %v629_v27 = vsel %vm57_vm0, %v600_v17, 0.0  ;;  %v574_v28 = vsel %vm57_vm0, %v1147_v45, 0.0 }
 0x157   :  { %v622_v12 = vadd.f32 %v621_v11, %v620_v7  ;;  %v569_v14 = vadd.f32 %v568_v39, %v567_v9  ;;  %p953_p13 = por %p952_p12, %p951_p11 }
 0x158   :  { %v631_v32 = vsel %vm57_vm0, %v601_v25, 0.0 }
 0x159   :  { %v624_v20 = vadd.f32 %v623_v51, %v622_v12  ;;  %v571_v21 = vadd.f32 %v570_v18, %v569_v14  ;;  %p954_p0 = pnand %p953_p13, %p947_p10 }
 0x15b   :  { %v626_v22 = vadd.f32 %v625_v16, %v624_v20  ;;  %v573_v24 = vadd.f32 %v572_v19, %v571_v21 }
 0x15d   :  { %v628_v23 = vadd.f32 %v627_v26, %v626_v22  ;;  %v575_v29 = vadd.f32 %v574_v28, %v573_v24 }
 0x15f   :  { %v630_v30 = vadd.f32 %v629_v27, %v628_v23  ;;  %v576_v31 = vrot.slane %v575_v29, 4 }
 0x161   :  { %v632_v33 = vadd.f32 %v631_v32, %v630_v30  ;;  %v577_v34 = vadd.f32 %v576_v31, %v575_v29 }
 0x163   :  { %v633_v35 = vrot.slane %v632_v33, 4  ;;  %v578_v36 = vrot.slane %v577_v34, 2 }
 0x165   :  { %v634_v37 = vadd.f32 %v633_v35, %v632_v33  ;;  %v579_v38 = vadd.f32 %v578_v36, %v577_v34 }
 0x167   :  { %v635_v40 = vrot.slane %v634_v37, 2  ;;  %v580_v41 = vrot.slane %v579_v38, 1 }
 0x169   :  { %v636_v43 = vadd.f32 %v635_v40, %v634_v37  ;;  %v581_v44 = vadd.f32 %v580_v41, %v579_v38 }
 0x16b   :  { %v637_v45 = vrot.slane %v636_v43, 1  ;;  %v582_v46 = vadd.f32 %v581_v44, %v544_v42 }
 0x16d   :  { %v638_v48 = vadd.f32 %v637_v45, %v636_v43  ;;  %584 = vst.msk [vmem:[#allocation9] sm:$0x1] %vm51_vm1, %v582_v46 }
 0x16e   :  { %957 = shalt.err (!%p954_p0)
}
 0x16f   :  { %s958_s8 = scalar_lea.hbm %s1250_s3, 16 }
 0x170   :  { %p959_p1 = scmp.ne.s32.totalorder %s1250_s3, %s958_s8  ;;  %p962_p2 = scmp.lt.u32.totalorder %s958_s8, %s1250_s3 }
 0x172   :  { %p964_p3 = pnand %p962_p2, %p959_p1 }
 0x174   :  { %967 = shalt.err (!%p964_p3)
}
 0x175   :  { %662 = dma.vmem_to_hbm [thread:$0]  %s660_s27, 16, %s1250_s3, [#allocation10]   ;;  %v639_v49 = vadd.f32 %v638_v48, %v585_v47 }
 0x176   :  { %s968_s14 = scalar_lea.vmem %s1214_s29, 16  ;;  %s972_s15 = scalar_lea.vmem %s1214_s29, 32 }
 0x177   :  { %640 = vst.msk [vmem:[#allocation11] sm:$0x1] %vm51_vm1, %v639_v49  ;;  %p969_p4 = scmp.ne.s32.totalorder %s1214_s29, %s968_s14  ;;  %p973_p5 = scmp.lt.s32.totalorder %s1214_s29, %s1214_s29 }
 0x178   :  { %p974_p6 = scmp.lt.s32.totalorder %s972_s15, %s968_s14 }
 0x17a   :  { %p975_p7 = por %p974_p6, %p973_p5 }
 0x17c   :  { %p976_p8 = pnand %p975_p7, %p969_p4 }
 0x17e   :  { %979 = shalt.err (!%p976_p8)
}
 0x17f   :  { %s980_s17 = scalar_lea.hbm %s1251_s4, 16 }
 0x180   :  { %p981_p9 = scmp.ne.s32.totalorder %s1251_s4, %s980_s17  ;;  %p984_p10 = scmp.lt.u32.totalorder %s980_s17, %s1251_s4 }
 0x182   :  { %p986_p11 = pnand %p984_p10, %p981_p9 }
 0x184   :  { %989 = shalt.err (!%p986_p11)
}
 0x185   :  { %672 = dma.vmem_to_hbm [thread:$0]  %s1214_s29, 16, %s1251_s4, [#allocation10]  }
 0x186   :  { %994 = dma.done.wait [#allocation5], 1024  }
 0x187   :  { %995 = vsyncadd [#allocation5], 4294966272 }
 0x188   :  { %996 = dma.done.wait [#allocation10], 32  }
 0x189   :  { %997 = vsyncadd [#allocation10], 4294967264 }
 0x18a   :  { %682 = vsyncpa [#allocation4], 1 }
 0x18b   :  { %683 = vsyncpa [#allocation7], 1 }
 0x18c   :  { %684 = vsyncpa [#allocation5], 1 }
 0x18d   :  { %685 = vsyncpa [#allocation10], 1 }

// kernel: discriminator_forward.14
= control target key start
LH: loop header
LB: loop body
LE: loop exit
PB: predicated region body
PF: predicated region fallthrough
CT: control target
= control target key end

     0   :  { %8 = vsyncpa [#allocation3], 0  ;;  %s339_s0 = inlined_call_operand.hbm [shape: bf16[32,64], index: 0, kind: input, shape index: {}]   ;;  %s340_s1 = inlined_call_operand.hbm [shape: f32[1,64], index: 1, kind: input, shape index: {}]   ;;  %s341_s2 = inlined_call_operand.hbm [shape: f32[1,64], index: 2, kind: input, shape index: {}]   ;;  %s342_s3 = inlined_call_operand.hbm [shape: bf16[32,64], index: 3, kind: output, shape index: {}]  }
   0x1   :  { %9 = vsyncpa [#allocation6], 0 }
   0x2   :  { %10 = vsyncpa [#allocation4], 0  ;;  %s252_s12 = smov [#allocation5]   ;;  %s253_s14 = smov [#allocation2]  }
   0x3   :  { %s29_s13 = sshll.u32 %s252_s12, 4  ;;  %s16_s15 = sshll.u32 %s253_s14, 4  ;;  %s30_s13 = int_to_ptr.vmem [resolvable:$true] %s29_s13  ;;  %s278_s15 = int_to_ptr.vmem [resolvable:$true] %s16_s15 }
   0x4   :  { %s158_s18 = scalar_lea.hbm %s340_s1, 16 }
   0x5   :  { %p159_p0 = scmp.ne.s32.totalorder %s340_s1, %s158_s18  ;;  %p162_p1 = scmp.lt.u32.totalorder %s158_s18, %s340_s1 }
   0x7   :  { %p164_p2 = pnand %p162_p1, %p159_p0 }
   0x9   :  { %167 = shalt.err (!%p164_p2)
}
   0xa   :  { %s168_s23 = scalar_lea.vmem %s30_s13, 16  ;;  %s172_s24 = scalar_lea.vmem %s30_s13, 32 }
   0xb   :  { %p169_p3 = scmp.ne.s32.totalorder %s30_s13, %s168_s23  ;;  %p173_p4 = scmp.lt.s32.totalorder %s30_s13, %s30_s13 }
   0xc   :  { %p174_p5 = scmp.lt.s32.totalorder %s172_s24, %s168_s23 }
   0xe   :  { %p175_p6 = por %p174_p5, %p173_p4 }
  0x10   :  { %p176_p7 = pnand %p175_p6, %p169_p3 }
  0x12   :  { %179 = shalt.err (!%p176_p7)
}
  0x13   :  { %32 = dma.hbm_to_vmem [thread:$0]  %s340_s1, 16, %s30_s13, [#allocation6]  }
  0x14   :  { %s180_s29 = scalar_lea.hbm %s339_s0, 256 }
  0x15   :  { %p181_p8 = scmp.ne.s32.totalorder %s339_s0, %s180_s29  ;;  %p184_p9 = scmp.lt.u32.totalorder %s180_s29, %s339_s0 }
  0x17   :  { %p186_p10 = pnand %p184_p9, %p181_p8 }
  0x19   :  { %189 = shalt.err (!%p186_p10)
}
  0x1a   :  { %s190_s7 = scalar_lea.vmem %s278_s15, 256  ;;  %p195_p12 = scmp.lt.s32.totalorder %s278_s15, %s278_s15 }
  0x1b   :  { %p191_p11 = scmp.ne.s32.totalorder %s278_s15, %s190_s7  ;;  %p196_p13 = scmp.lt.s32.totalorder %s190_s7, %s190_s7 }
  0x1d   :  { %p197_p0 = por %p196_p13, %p195_p12 }
  0x1f   :  { %p198_p1 = pnand %p197_p0, %p191_p11 }
  0x21   :  { %201 = shalt.err (!%p198_p1)
}
  0x22   :  { %s254_s1 = smov 64   ;;  %s255_s8 = smov 4  }
  0x23   :  { %22 = dma.hbm_to_vmem [thread:$0]  %s339_s0, 256, %s278_s15, [#allocation3], %s254_s1, %s254_s1, %s255_s8  }
  0x24   :  { %s256_s11 = smov [#allocation7]   ;;  %s202_s16 = scalar_lea.hbm %s341_s2, 16 }
  0x25   :  { %s39_s12 = sshll.u32 %s256_s11, 4  ;;  %p203_p2 = scmp.ne.s32.totalorder %s341_s2, %s202_s16  ;;  %s40_s12 = int_to_ptr.vmem [resolvable:$true] %s39_s12 }
  0x26   :  { %p206_p3 = scmp.lt.u32.totalorder %s202_s16, %s341_s2 }
  0x28   :  { %p208_p4 = pnand %p206_p3, %p203_p2 }
  0x2a   :  { %211 = shalt.err (!%p208_p4)
}
  0x2b   :  { %s212_s21 = scalar_lea.vmem %s40_s12, 16  ;;  %s216_s0 = scalar_lea.vmem %s40_s12, 32 }
  0x2c   :  { %p213_p5 = scmp.ne.s32.totalorder %s40_s12, %s212_s21  ;;  %p217_p6 = scmp.lt.s32.totalorder %s40_s12, %s40_s12 }
  0x2d   :  { %p218_p7 = scmp.lt.s32.totalorder %s216_s0, %s212_s21 }
  0x2f   :  { %p219_p8 = por %p218_p7, %p217_p6 }
  0x31   :  { %p220_p9 = pnand %p219_p8, %p213_p5 }
  0x33   :  { %223 = shalt.err (!%p220_p9)
}
  0x34   :  { %42 = dma.hbm_to_vmem [thread:$0]  %s341_s2, 16, %s40_s12, [#allocation6]  }
  0x35   :  { %246 = dma.done.wait [#allocation3], 256  }
  0x36   :  { %247 = vsyncadd [#allocation3], 4294967040 }
  0x37   :  { %248 = dma.done.wait [#allocation6], 32  }
  0x38   :  { %249 = vsyncadd [#allocation6], 4294967264  ;;  %v144_v0 = vld [vmem:[#allocation2] sm:$0xff]   ;;  %v133_v1 = vld [vmem:[#allocation5] ss:$0 sm:$0xff]  ;;  %s257_s2 = smov [#allocation8]  }
  0x39   :  { %v145_v2 = vunpack.c.l.bf16 %v144_v0  ;;  %v146_v3 = vunpack.c.h.bf16 %v144_v0  ;;  %v151_v4 = vld [vmem:[#allocation2 + $0x8] sm:$0xff]   ;;  %v134_v5 = vld [vmem:[#allocation7] ss:$0 sm:$0xff]  ;;  %s120_s23 = sshll.u32 %s257_s2, 4  ;;  %vm110_vm4 = vcmask 519168   ;;  %s121_s23 = int_to_ptr.vmem [resolvable:$true] %s120_s23 }
  0x3a   :  { %v149_v6 = vunpack.c.l.bf16 %v151_v4  ;;  %v150_v7 = vunpack.c.h.bf16 %v151_v4  ;;  %s224_s24 = scalar_lea.vmem %s121_s23, 256  ;;  %p229_p11 = scmp.lt.s32.totalorder %s121_s23, %s121_s23 }
  0x3b   :  { %v67_v8 = vmul.f32 %v145_v2, %v133_v1  ;;  %v68_v9 = vmul.f32 %v146_v3, %v133_v1  ;;  %p225_p10 = scmp.ne.s32.totalorder %s121_s23, %s224_s24  ;;  %p230_p12 = scmp.lt.s32.totalorder %s224_s24, %s224_s24 }
  0x3c   :  { %v69_v10 = vmul.f32 %v149_v6, %v133_v1  ;;  %v70_v11 = vmul.f32 %v150_v7, %v133_v1 }
  0x3d   :  { %v78_v12 = vadd.f32 %v134_v5, %v67_v8  ;;  %v79_v13 = vadd.f32 %v134_v5, %v68_v9  ;;  %p231_p13 = por %p230_p12, %p229_p11 }
  0x3e   :  { %v80_v14 = vadd.f32 %v134_v5, %v69_v10  ;;  %v81_v15 = vadd.f32 %v134_v5, %v70_v11 }
  0x3f   :  { %vm82_vm0 = vcmp.ge.f32.partialorder %v78_v12, 0.0  ;;  %v86_v16 = vmul.f32 0.2, %v78_v12  ;;  %vm83_vm1 = vcmp.ge.f32.partialorder %v79_v13, 0.0  ;;  %v87_v17 = vmul.f32 0.2, %v79_v13  ;;  %p232_p0 = pnand %p231_p13, %p225_p10 }
  0x40   :  { %vm84_vm2 = vcmp.ge.f32.partialorder %v80_v14, 0.0  ;;  %v88_v18 = vmul.f32 0.2, %v80_v14  ;;  %vm85_vm3 = vcmp.ge.f32.partialorder %v81_v15, 0.0  ;;  %v89_v19 = vmul.f32 0.2, %v81_v15 }
  0x41   :  { %v90_v20 = vsel %vm82_vm0, %v78_v12, %v86_v16  ;;  %v91_v21 = vsel %vm83_vm1, %v79_v13, %v87_v17 }
  0x42   :  { %v139_v22 = vpack.c.bf16 %v90_v20, %v90_v20  ;;  %v140_v23 = vpack.c.bf16 %v91_v21, %v91_v21  ;;  %v92_v24 = vsel %vm84_vm2, %v80_v14, %v88_v18  ;;  %v93_v25 = vsel %vm85_vm3, %v81_v15, %v89_v19 }
  0x43   :  { %v141_v26 = vpack.c.bf16 %v92_v24, %v92_v24  ;;  %v142_v27 = vpack.c.bf16 %v93_v25, %v93_v25 }
  0x44   :  { %111 = vst.msk [vmem:[#allocation8] sm:$0xf] %vm110_vm4, %v139_v22  ;;  %112 = vst.msk [vmem:[#allocation8 + $0x4] sm:$0xf] %vm110_vm4, %v140_v23 }
  0x45   :  { %113 = vst.msk [vmem:[#allocation8 + $0x8] sm:$0xf] %vm110_vm4, %v141_v26  ;;  %114 = vst.msk [vmem:[#allocation8 + $0xc] sm:$0xf] %vm110_vm4, %v142_v27 }
  0x46   :  { %235 = shalt.err (!%p232_p0)
}
  0x47   :  { %s236_s27 = scalar_lea.hbm %s342_s3, 256 }
  0x48   :  { %p237_p1 = scmp.ne.s32.totalorder %s342_s3, %s236_s27  ;;  %p240_p2 = scmp.lt.u32.totalorder %s236_s27, %s342_s3 }
  0x4a   :  { %p242_p3 = pnand %p240_p2, %p237_p1 }
  0x4c   :  { %245 = shalt.err (!%p242_p3)
}
  0x4d   :  { %126 = dma.vmem_to_hbm [thread:$0]  %s121_s23, 256, %s342_s3, [#allocation4], %s254_s1, %s254_s1, %s255_s8  }
  0x4e   :  { %250 = dma.done.wait [#allocation4], 256  }
  0x4f   :  { %251 = vsyncadd [#allocation4], 4294967040 }
  0x50   :  { %130 = vsyncpa [#allocation3], 1 }
  0x51   :  { %131 = vsyncpa [#allocation6], 1 }
  0x52   :  { %132 = vsyncpa [#allocation4], 1 }

// kernel: discriminator_forward.13
= control target key start
LH: loop header
LB: loop body
LE: loop exit
PB: predicated region body
PF: predicated region fallthrough
CT: control target
= control target key end

     0   :  { %10 = vsyncpa [#allocation4], 0  ;;  %s996_s0 = inlined_call_operand.hbm [shape: bf16[32,512], index: 0, kind: input, shape index: {}]   ;;  %s997_s1 = inlined_call_operand.hbm [shape: bf16[512,64], index: 1, kind: input, shape index: {}]   ;;  %s998_s2 = inlined_call_operand.hbm [shape: bf16[32,64], index: 2, kind: output, shape index: {0}]   ;;  %s999_s3 = inlined_call_operand.hbm [shape: f32[1,64], index: 3, kind: output, shape index: {1}]   ;;  %s1000_s4 = inlined_call_operand.hbm [shape: f32[1,64], index: 4, kind: output, shape index: {2}]  }
   0x1   :  { %11 = vsyncpa [#allocation7], 0 }
   0x2   :  { %12 = vsyncpa [#allocation5], 0 }
   0x3   :  { %13 = vsyncpa [#allocation10], 0  ;;  %s863_s15 = smov [#allocation3]   ;;  %s745_s19 = scalar_lea.hbm %s996_s0, 1024 }
   0x4   :  { %s19_s16 = sshll.u32 %s863_s15, 4  ;;  %p746_p0 = scmp.ne.s32.totalorder %s996_s0, %s745_s19  ;;  %s20_s16 = int_to_ptr.vmem [resolvable:$true] %s19_s16 }
   0x5   :  { %p749_p1 = scmp.lt.u32.totalorder %s745_s19, %s996_s0 }
   0x7   :  { %p751_p2 = pnand %p749_p1, %p746_p0 }
   0x9   :  { %754 = shalt.err (!%p751_p2)
}
   0xa   :  { %s755_s24 = scalar_lea.vmem %s20_s16, 1024  ;;  %p760_p4 = scmp.lt.s32.totalorder %s20_s16, %s20_s16 }
   0xb   :  { %p756_p3 = scmp.ne.s32.totalorder %s20_s16, %s755_s24  ;;  %p761_p5 = scmp.lt.s32.totalorder %s755_s24, %s755_s24 }
   0xd   :  { %p762_p6 = por %p761_p5, %p760_p4 }
   0xf   :  { %p763_p7 = pnand %p762_p6, %p756_p3 }
  0x11   :  { %766 = shalt.err (!%p763_p7)
}
  0x12   :  { %s864_s25 = smov 256   ;;  %s865_s26 = smov 16  }
  0x13   :  { %25 = dma.hbm_to_vmem [thread:$0]  %s996_s0, 1024, %s20_s16, [#allocation4], %s864_s25, %s864_s25, %s865_s26  }
  0x14   :  { %s866_s29 = smov [#allocation6]   ;;  %s767_s7 = scalar_lea.hbm %s997_s1, 4096 }
  0x15   :  { %s31_s30 = sshll.u32 %s866_s29, 4  ;;  %p768_p8 = scmp.ne.s32.totalorder %s997_s1, %s767_s7  ;;  %s32_s30 = int_to_ptr.vmem [resolvable:$true] %s31_s30 }
  0x16   :  { %p771_p9 = scmp.lt.u32.totalorder %s767_s7, %s997_s1 }
  0x18   :  { %p773_p10 = pnand %p771_p9, %p768_p8 }
  0x1a   :  { %776 = shalt.err (!%p773_p10)
}
  0x1b   :  { %s777_s12 = scalar_lea.vmem %s32_s30, 4096  ;;  %p782_p12 = scmp.lt.s32.totalorder %s32_s30, %s32_s30 }
  0x1c   :  { %p778_p11 = scmp.ne.s32.totalorder %s32_s30, %s777_s12  ;;  %p783_p13 = scmp.lt.s32.totalorder %s777_s12, %s777_s12 }
  0x1e   :  { %p784_p0 = por %p783_p13, %p782_p12 }
  0x20   :  { %p785_p1 = pnand %p784_p0, %p778_p11 }
  0x22   :  { %788 = shalt.err (!%p785_p1)
}
  0x23   :  { %s867_s0 = smov 64   ;;  %s868_s13 = smov 4  }
  0x24   :  { %37 = dma.hbm_to_vmem [thread:$0]  %s997_s1, 4096, %s32_s30, [#allocation7], %s867_s0, %s867_s0, %s868_s13  }
  0x25   :  { %855 = dma.done.wait [#allocation4], 1024  }
  0x26   :  { %856 = vsyncadd [#allocation4], 4294966272 }
  0x27   :  { %857 = dma.done.wait [#allocation7], 4096  }
  0x28   :  { %858 = vsyncadd [#allocation7], 4294963200  ;;  %v701_v0 = vld [vmem:[#allocation6 + $0x40] sm:$0xff]   ;;  %v705_v4 = vld [vmem:[#allocation6 + $0x48] sm:$0xff]   ;;  %vm57_vm0 = vcmask 523264   ;;  %v869_v40 = vmov 0.0  }
  0x29   :  { %v702_v1 = vld [vmem:[#allocation6 + $0xc0] sm:$0xff]   ;;  %635 = vmatprep.subr.bf16.mxu0 %v701_v0  ;;  %v706_v5 = vld [vmem:[#allocation6 + $0xc8] sm:$0xff]   ;;  %v709_v8 = vld [vmem:[#allocation6 + $0x50] sm:$0xff]   ;;  %58 = vst.msk [vmem:[#allocation2] sm:$0xff] %vm57_vm0, %v869_v40  ;;  %vm51_vm1 = vcmask 516096   ;;  %vm500_vm2 = vcmask 519168  }
  0x2a   :  { %v703_v2 = vld [vmem:[#allocation6] sm:$0xff]   ;;  %663 = vmatprep.subr.bf16.mxu1 %v702_v1  ;;  %v707_v6 = vld [vmem:[#allocation6 + $0x8] sm:$0xff]   ;;  %v710_v9 = vld [vmem:[#allocation6 + $0xd0] sm:$0xff]   ;;  %59 = vst.msk [vmem:[#allocation2 + $0x8] sm:$0xff] %vm57_vm0, %v869_v40  ;;  %s870_s1 = smov [#allocation8]  }
  0x2b   :  { %v704_v3 = vld [vmem:[#allocation6 + $0x80] sm:$0xff]   ;;  %636 = vmatpush3.bf16.msra.mxu0 %v703_v2  ;;  %v708_v7 = vld [vmem:[#allocation6 + $0x88] sm:$0xff]   ;;  %v711_v10 = vld [vmem:[#allocation6 + $0x10] sm:$0xff]   ;;  %60 = vst.msk [vmem:[#allocation2 + $0x10] sm:$0xff] %vm57_vm0, %v869_v40  ;;  %s547_s16 = sshll.u32 %s870_s1, 4  ;;  %s548_s16 = int_to_ptr.vmem [resolvable:$true] %s547_s16 }
  0x2c   :  { %664 = vmatpush3.bf16.msra.mxu1 %v704_v3  ;;  %637 = vmatprep.subr.bf16.mxu0 %v705_v4  ;;  %v712_v11 = vld [vmem:[#allocation6 + $0x90] sm:$0xff]   ;;  %v713_v12 = vld [vmem:[#allocation6 + $0x58] sm:$0xff]   ;;  %v717_v16 = vld [vmem:[#allocation6 + $0x60] sm:$0xff]   ;;  %61 = vst.msk [vmem:[#allocation2 + $0x18] sm:$0xff] %vm57_vm0, %v869_v40  ;;  %s789_s17 = scalar_lea.vmem %s548_s16, 256  ;;  %p794_p3 = scmp.lt.s32.totalorder %s548_s16, %s548_s16 }
  0x2d   :  { %665 = vmatprep.subr.bf16.mxu1 %v706_v5  ;;  %v714_v13 = vld [vmem:[#allocation6 + $0xd8] sm:$0xff]   ;;  %v718_v17 = vld [vmem:[#allocation6 + $0xe0] sm:$0xff]   ;;  %v721_v20 = vld [vmem:[#allocation6 + $0x68] sm:$0xff]   ;;  %52 = vst.msk [vmem:[#allocation9] sm:$0x1] %vm51_vm1, %v869_v40  ;;  %p790_p2 = scmp.ne.s32.totalorder %s548_s16, %s789_s17  ;;  %p795_p4 = scmp.lt.s32.totalorder %s789_s17, %s789_s17 }
  0x2e   :  { %v715_v14 = vld [vmem:[#allocation6 + $0x18] sm:$0xff]   ;;  %v719_v18 = vld [vmem:[#allocation6 + $0x20] sm:$0xff]   ;;  %v722_v21 = vld [vmem:[#allocation6 + $0xe8] sm:$0xff]   ;;  %53 = vst.msk [vmem:[#allocation11] sm:$0x1] %vm51_vm1, %v869_v40 }
  0x2f   :  { %638 = vmatpush3.bf16.msra.mxu0 %v707_v6  ;;  %v716_v15 = vld [vmem:[#allocation6 + $0x98] sm:$0xff]   ;;  %v720_v19 = vld [vmem:[#allocation6 + $0xa0] sm:$0xff]   ;;  %v723_v22 = vld [vmem:[#allocation6 + $0x28] sm:$0xff]   ;;  %p796_p5 = por %p795_p4, %p794_p3 }
  0x30   :  { %666 = vmatpush3.bf16.msra.mxu1 %v708_v7  ;;  %639 = vmatprep.subr.bf16.mxu0 %v709_v8  ;;  %v724_v23 = vld [vmem:[#allocation6 + $0xa8] sm:$0xff]   ;;  %v725_v24 = vld [vmem:[#allocation6 + $0x70] sm:$0xff]   ;;  %v729_v28 = vld [vmem:[#allocation6 + $0x78] sm:$0xff]  }
  0x31   :  { %667 = vmatprep.subr.bf16.mxu1 %v710_v9  ;;  %v726_v25 = vld [vmem:[#allocation6 + $0xf0] sm:$0xff]   ;;  %v730_v29 = vld [vmem:[#allocation6 + $0xf8] sm:$0xff]   ;;  %v62_v50 = vld [vmem:[#allocation2] sm:$0xff]  ;;  %p797_p6 = pnand %p796_p5, %p790_p2 }
  0x32   :  { %v727_v26 = vld [vmem:[#allocation6 + $0x30] sm:$0xff]   ;;  %v731_v30 = vld [vmem:[#allocation6 + $0x38] sm:$0xff]   ;;  %v63_v55 = vld [vmem:[#allocation2 + $0x8] sm:$0xff] }
  0x33   :  { %640 = vmatpush3.bf16.msra.mxu0 %v711_v10  ;;  %v728_v27 = vld [vmem:[#allocation6 + $0xb0] sm:$0xff]   ;;  %v732_v31 = vld [vmem:[#allocation6 + $0xb8] sm:$0xff]  }
  0x34   :  { %668 = vmatpush3.bf16.msra.mxu1 %v712_v11  ;;  %641 = vmatprep.subr.bf16.mxu0 %v713_v12  ;;  %v733_v32 = vld [vmem:[#allocation3] ss:$16 sps:$4 sm:$0xff]   ;;  %v735_v33 = vld [vmem:[#allocation3 + $0x4] ss:$16 sps:$4 sm:$0xff]   ;;  %v736_v34 = vld [vmem:[#allocation3 + $0x8] ss:$16 sps:$4 sm:$0xff]  }
  0x35   :  { %669 = vmatprep.subr.bf16.mxu1 %v714_v13  ;;  %v738_v35 = vld [vmem:[#allocation3 + $0xc] ss:$16 sps:$4 sm:$0xff]   ;;  %402 = vmatprep.mubr.bf16.mxu0 %v735_v33  ;;  %v739_v36 = vld [vmem:[#allocation3 + $0x24] ss:$16 sps:$4 sm:$0xff]   ;;  %v743_v38 = vld [vmem:[#allocation3 + $0x20] ss:$16 sps:$4 sm:$0xff]  }
  0x36   :  { %451 = vmatprep.mubr.bf16.mxu1 %v738_v35  ;;  %v741_v37 = vld [vmem:[#allocation3 + $0x2c] ss:$16 sps:$4 sm:$0xff]   ;;  %v744_v39 = vld [vmem:[#allocation3 + $0x28] ss:$16 sps:$4 sm:$0xff]   ;;  %v64_v4 = vld [vmem:[#allocation2 + $0x10] sm:$0xff] }
  0x37   :  { %642 = vmatpush3.bf16.msra.mxu0 %v715_v14  ;;  %v65_v9 = vld [vmem:[#allocation2 + $0x18] sm:$0xff] }
  0x38   :  { %670 = vmatpush3.bf16.msra.mxu1 %v716_v15  ;;  %643 = vmatprep.subr.bf16.mxu0 %v717_v16 }
  0x39   :  { %671 = vmatprep.subr.bf16.mxu1 %v718_v17 }
  0x3b   :  { %644 = vmatpush3.bf16.msra.mxu0 %v719_v18 }
  0x3c   :  { %672 = vmatpush3.bf16.msra.mxu1 %v720_v19  ;;  %645 = vmatprep.subr.bf16.mxu0 %v721_v20 }
  0x3d   :  { %673 = vmatprep.subr.bf16.mxu1 %v722_v21 }
  0x3f   :  { %646 = vmatpush3.bf16.msra.mxu0 %v723_v22 }
  0x40   :  { %674 = vmatpush3.bf16.msra.mxu1 %v724_v23  ;;  %647 = vmatprep.subr.bf16.mxu0 %v725_v24 }
  0x41   :  { %675 = vmatprep.subr.bf16.mxu1 %v726_v25 }
  0x43   :  { %648 = vmatpush3.bf16.msra.mxu0 %v727_v26 }
  0x44   :  { %676 = vmatpush3.bf16.msra.mxu1 %v728_v27  ;;  %649 = vmatprep.subr.bf16.mxu0 %v729_v28 }
  0x45   :  { %677 = vmatprep.subr.bf16.mxu1 %v730_v29 }
  0x47   :  { %650 = vmatpush3.bf16.msra.mxu0 %v731_v30 }
  0x48   :  { %678 = vmatpush3.bf16.msra.mxu1 %v732_v31 }
  0x4a   :  { %403 = vmatmul.mubr.bf16.vlgmr.msra.gmra.mrb[0].mxu0 %v733_v32 }
  0x4b   :  { %452 = vmatmul.mubr.bf16.vlgmr.msra.gmra.mrb[0].mxu1 %v736_v34  ;;  %410 = vmatprep.mubr.bf16.mxu0 %v739_v36 }
  0x4c   :  { %459 = vmatprep.mubr.bf16.mxu1 %v741_v37 }
  0x52   :  { %411 = vmatmul.mubr.bf16.gmra.mrb[4].mxu0 %v743_v38 }
  0x53   :  { %460 = vmatmul.mubr.bf16.gmra.mrb[4].mxu1 %v744_v39 }
 0x11d   :  { %v651_v41 = vpop.f32.mrb[0].mxu0 }
 0x11e   :  { %v679_v42 = vpop.f32.mrb[0].mxu1  ;;  %v652_v43 = vpop.f32.mrb[1].mxu0 }
 0x11f   :  { %v653_v44 = vadd.f32 %v652_v43, %v651_v41  ;;  %v680_v45 = vpop.f32.mrb[1].mxu1  ;;  %v654_v46 = vpop.f32.mrb[2].mxu0 }
 0x120   :  { %v681_v47 = vadd.f32 %v680_v45, %v679_v42  ;;  %v682_v48 = vpop.f32.mrb[2].mxu1  ;;  %v655_v49 = vpop.f32.mrb[3].mxu0 }
 0x121   :  { %v656_v51 = vadd.f32 %v655_v49, %v654_v46  ;;  %v683_v52 = vpop.f32.mrb[3].mxu1 }
 0x122   :  { %v454_v53 = vadd.f32 %v681_v47, %v653_v44  ;;  %v684_v54 = vadd.f32 %v683_v52, %v682_v48 }
 0x124   :  { %v468_v56 = vadd.f32 %v454_v53, %v62_v50  ;;  %v457_v57 = vadd.f32 %v684_v54, %v656_v51 }
 0x125   :  { %v657_v58 = vpop.f32.mrb[4].mxu0 }
 0x126   :  { %473 = vst.msk [vmem:[#allocation2] sm:$0xff] %vm57_vm0, %v468_v56  ;;  %v469_v59 = vadd.f32 %v457_v57, %v63_v55  ;;  %v685_v60 = vpop.f32.mrb[4].mxu1  ;;  %v658_v61 = vpop.f32.mrb[5].mxu0 }
 0x127   :  { %v659_v62 = vadd.f32 %v658_v61, %v657_v58  ;;  %v686_v63 = vpop.f32.mrb[5].mxu1  ;;  %v660_v0 = vpop.f32.mrb[6].mxu0 }
 0x128   :  { %474 = vst.msk [vmem:[#allocation2 + $0x8] sm:$0xff] %vm57_vm0, %v469_v59  ;;  %v687_v1 = vadd.f32 %v686_v63, %v685_v60  ;;  %v688_v2 = vpop.f32.mrb[6].mxu1  ;;  %v661_v3 = vpop.f32.mrb[7].mxu0 }
 0x129   :  { %v662_v5 = vadd.f32 %v661_v3, %v660_v0  ;;  %v689_v6 = vpop.f32.mrb[7].mxu1 }
 0x12a   :  { %v462_v7 = vadd.f32 %v687_v1, %v659_v62  ;;  %v690_v8 = vadd.f32 %v689_v6, %v688_v2 }
 0x12c   :  { %v470_v10 = vadd.f32 %v462_v7, %v64_v4  ;;  %v465_v11 = vadd.f32 %v690_v8, %v662_v5 }
 0x12d   :  { %v480_v12 = vld [vmem:[#allocation2] sm:$0xff] }
 0x12e   :  { %475 = vst.msk [vmem:[#allocation2 + $0x10] sm:$0xff] %vm57_vm0, %v470_v10  ;;  %v471_v13 = vadd.f32 %v465_v11, %v65_v9  ;;  %v631_v14 = vpack.c.bf16 %v480_v12, %v480_v12  ;;  %v523_v19 = vmul.f32 %v480_v12, %v480_v12  ;;  %v506_v20 = vsel %vm57_vm0, %v480_v12, 0.0 }
 0x12f   :  { %v481_v15 = vld [vmem:[#allocation2 + $0x8] sm:$0xff] }
 0x130   :  { %476 = vst.msk [vmem:[#allocation2 + $0x18] sm:$0xff] %vm57_vm0, %v471_v13  ;;  %v632_v16 = vpack.c.bf16 %v481_v15, %v481_v15  ;;  %v524_v17 = vmul.f32 %v481_v15, %v481_v15  ;;  %v507_v18 = vsel %vm57_vm0, %v481_v15, 0.0  ;;  %v527_v27 = vsel %vm57_vm0, %v523_v19, 0.0 }
 0x131   :  { %501 = vst.msk [vmem:[#allocation8] sm:$0xf] %vm500_vm2, %v631_v14  ;;  %v508_v23 = vadd.f32 %v507_v18, %v506_v20 }
 0x132   :  { %502 = vst.msk [vmem:[#allocation8 + $0x4] sm:$0xf] %vm500_vm2, %v632_v16  ;;  %v528_v21 = vsel %vm57_vm0, %v524_v17, 0.0 }
 0x133   :  { %v529_v30 = vadd.f32 %v528_v21, %v527_v27 }
 0x135   :  { %v482_v22 = vld [vmem:[#allocation2 + $0x10] sm:$0xff] }
 0x136   :  { %v509_v24 = vsel %vm57_vm0, %v482_v22, 0.0  ;;  %v633_v25 = vpack.c.bf16 %v482_v22, %v482_v22  ;;  %v525_v26 = vmul.f32 %v482_v22, %v482_v22 }
 0x137   :  { %v483_v28 = vld [vmem:[#allocation2 + $0x18] sm:$0xff]  ;;  %v510_v29 = vadd.f32 %v509_v24, %v508_v23 }
 0x138   :  { %v511_v31 = vsel %vm57_vm0, %v483_v28, 0.0  ;;  %v634_v32 = vpack.c.bf16 %v483_v28, %v483_v28  ;;  %503 = vst.msk [vmem:[#allocation8 + $0x8] sm:$0xf] %vm500_vm2, %v633_v25  ;;  %v526_v33 = vmul.f32 %v483_v28, %v483_v28  ;;  %v530_v34 = vsel %vm57_vm0, %v525_v26, 0.0 }
 0x139   :  { %v512_v35 = vadd.f32 %v511_v31, %v510_v29  ;;  %v531_v36 = vadd.f32 %v530_v34, %v529_v30 }
 0x13a   :  { %504 = vst.msk [vmem:[#allocation8 + $0xc] sm:$0xf] %vm500_vm2, %v634_v32  ;;  %v532_v37 = vsel %vm57_vm0, %v526_v33, 0.0 }
 0x13b   :  { %v513_v38 = vrot.slane %v512_v35, 4 }
 0x13c   :  { %800 = shalt.err (!%p797_p6)
}
 0x13d   :  { %s801_s20 = scalar_lea.hbm %s998_s2, 256 }
 0x13e   :  { %p802_p7 = scmp.ne.s32.totalorder %s998_s2, %s801_s20  ;;  %p805_p8 = scmp.lt.u32.totalorder %s801_s20, %s998_s2 }
 0x140   :  { %p807_p9 = pnand %p805_p8, %p802_p7 }
 0x142   :  { %810 = shalt.err (!%p807_p9)
}
 0x143   :  { %553 = dma.vmem_to_hbm [thread:$0]  %s548_s16, 256, %s998_s2, [#allocation5], %s867_s0, %s867_s0, %s868_s13   ;;  %v533_v39 = vadd.f32 %v532_v37, %v531_v36  ;;  %v514_v40 = vadd.f32 %v513_v38, %v512_v35  ;;  %v505_v48 = vld [vmem:[#allocation9] sm:$0x1]  ;;  %v522_v51 = vld [vmem:[#allocation11] sm:$0x1] }
 0x144   :  { %s871_s27 = smov [#allocation9]   ;;  %s872_s29 = smov [#allocation11]  }
 0x145   :  { %v534_v41 = vrot.slane %v533_v39, 4  ;;  %v515_v42 = vrot.slane %v514_v40, 2  ;;  %s560_s28 = sshll.u32 %s871_s27, 4  ;;  %s570_s30 = sshll.u32 %s872_s29, 4  ;;  %s561_s28 = int_to_ptr.vmem [resolvable:$true] %s560_s28  ;;  %s963_s30 = int_to_ptr.vmem [resolvable:$true] %s570_s30 }
 0x146   :  { %s811_s2 = scalar_lea.vmem %s561_s28, 16  ;;  %s815_s5 = scalar_lea.vmem %s561_s28, 32 }
 0x147   :  { %v535_v43 = vadd.f32 %v534_v41, %v533_v39  ;;  %v516_v44 = vadd.f32 %v515_v42, %v514_v40  ;;  %p812_p10 = scmp.ne.s32.totalorder %s561_s28, %s811_s2  ;;  %p816_p11 = scmp.lt.s32.totalorder %s561_s28, %s561_s28 }
 0x148   :  { %p817_p12 = scmp.lt.s32.totalorder %s815_s5, %s811_s2 }
 0x149   :  { %v536_v45 = vrot.slane %v535_v43, 2  ;;  %v517_v46 = vrot.slane %v516_v44, 1 }
 0x14a   :  { %p818_p13 = por %p817_p12, %p816_p11 }
 0x14b   :  { %v537_v47 = vadd.f32 %v536_v45, %v535_v43  ;;  %v518_v49 = vadd.f32 %v517_v46, %v516_v44 }
 0x14c   :  { %p819_p0 = pnand %p818_p13, %p812_p10 }
 0x14d   :  { %v538_v50 = vrot.slane %v537_v47, 1  ;;  %v519_v52 = vadd.f32 %v518_v49, %v505_v48 }
 0x14f   :  { %v539_v53 = vadd.f32 %v538_v50, %v537_v47  ;;  %521 = vst.msk [vmem:[#allocation9] sm:$0x1] %vm51_vm1, %v519_v52 }
 0x151   :  { %v540_v54 = vadd.f32 %v539_v53, %v522_v51 }
 0x152   :  { %822 = shalt.err (!%p819_p0)
}
 0x153   :  { %s823_s8 = scalar_lea.hbm %s999_s3, 16 }
 0x154   :  { %p824_p1 = scmp.ne.s32.totalorder %s999_s3, %s823_s8  ;;  %p827_p2 = scmp.lt.u32.totalorder %s823_s8, %s999_s3 }
 0x156   :  { %p829_p3 = pnand %p827_p2, %p824_p1 }
 0x158   :  { %832 = shalt.err (!%p829_p3)
}
 0x159   :  { %563 = dma.vmem_to_hbm [thread:$0]  %s561_s28, 16, %s999_s3, [#allocation10]   ;;  %541 = vst.msk [vmem:[#allocation11] sm:$0x1] %vm51_vm1, %v540_v54 }
 0x15a   :  { %s833_s14 = scalar_lea.vmem %s963_s30, 16  ;;  %s837_s15 = scalar_lea.vmem %s963_s30, 32 }
 0x15b   :  { %p834_p4 = scmp.ne.s32.totalorder %s963_s30, %s833_s14  ;;  %p838_p5 = scmp.lt.s32.totalorder %s963_s30, %s963_s30 }
 0x15c   :  { %p839_p6 = scmp.lt.s32.totalorder %s837_s15, %s833_s14 }
 0x15e   :  { %p840_p7 = por %p839_p6, %p838_p5 }
 0x160   :  { %p841_p8 = pnand %p840_p7, %p834_p4 }
 0x162   :  { %844 = shalt.err (!%p841_p8)
}
 0x163   :  { %s845_s17 = scalar_lea.hbm %s1000_s4, 16 }
 0x164   :  { %p846_p9 = scmp.ne.s32.totalorder %s1000_s4, %s845_s17  ;;  %p849_p10 = scmp.lt.u32.totalorder %s845_s17, %s1000_s4 }
 0x166   :  { %p851_p11 = pnand %p849_p10, %p846_p9 }
 0x168   :  { %854 = shalt.err (!%p851_p11)
}
 0x169   :  { %573 = dma.vmem_to_hbm [thread:$0]  %s963_s30, 16, %s1000_s4, [#allocation10]  }
 0x16a   :  { %859 = dma.done.wait [#allocation5], 256  }
 0x16b   :  { %860 = vsyncadd [#allocation5], 4294967040 }
 0x16c   :  { %861 = dma.done.wait [#allocation10], 32  }
 0x16d   :  { %862 = vsyncadd [#allocation10], 4294967264 }
 0x16e   :  { %583 = vsyncpa [#allocation4], 1 }
 0x16f   :  { %584 = vsyncpa [#allocation7], 1 }
 0x170   :  { %585 = vsyncpa [#allocation5], 1 }
 0x171   :  { %586 = vsyncpa [#allocation10], 1 }

// kernel: discriminator_forward.15
= control target key start
LH: loop header
LB: loop body
LE: loop exit
PB: predicated region body
PF: predicated region fallthrough
CT: control target
= control target key end

     0   :  { %s1206_s0 = inlined_call_operand.hbm [shape: bf16[2,1024], index: 0, kind: input, shape index: {}]   ;;  %s1207_s1 = inlined_call_operand.hbm [shape: bf16[1024,1], index: 1, kind: input, shape index: {}]   ;;  %s1208_s2 = inlined_call_operand.<no memory space> [shape: f32[1,1], index: 2, kind: input, shape index: {}]   ;;  %s1209_s3 = inlined_call_operand.hbm [shape: f32[2,1], index: 3, kind: output, shape index: {}]  }
   0x1   :  { %v8_v0 = vstv %s1208_s2 }
   0x2   :  { %9 = vst [vmem:[#allocation3] sm:$0x1] %v8_v0 }
   0x3   :  { %10 = vsyncpa [#allocation5], 0 }
   0x4   :  { %11 = vsyncpa [#allocation8], 0 }
   0x5   :  { %12 = vsyncpa [#allocation6], 0  ;;  %s1117_s14 = smov [#allocation4]   ;;  %s1118_s16 = smov [#allocation7]  }
   0x6   :  { %s19_s15 = sshll.u32 %s1117_s14, 4  ;;  %s28_s17 = sshll.u32 %s1118_s16, 4  ;;  %s20_s15 = int_to_ptr.vmem [resolvable:$true] %s19_s15  ;;  %s1147_s17 = int_to_ptr.vmem [resolvable:$true] %s28_s17 }
   0x7   :  { %s1045_s20 = scalar_lea.hbm %s1206_s0, 128 }
   0x8   :  { %p1046_p0 = scmp.ne.s32.totalorder %s1206_s0, %s1045_s20  ;;  %p1049_p1 = scmp.lt.u32.totalorder %s1045_s20, %s1206_s0 }
   0xa   :  { %p1051_p2 = pnand %p1049_p1, %p1046_p0 }
   0xc   :  { %1054 = shalt.err (!%p1051_p2)
}
   0xd   :  { %s1055_s24 = scalar_lea.vmem %s20_s15, 128  ;;  %p1060_p4 = scmp.lt.s32.totalorder %s20_s15, %s20_s15 }
   0xe   :  { %p1056_p3 = scmp.ne.s32.totalorder %s20_s15, %s1055_s24  ;;  %p1061_p5 = scmp.lt.s32.totalorder %s1055_s24, %s1055_s24 }
  0x10   :  { %p1062_p6 = por %p1061_p5, %p1060_p4 }
  0x12   :  { %p1063_p7 = pnand %p1062_p6, %p1056_p3 }
  0x14   :  { %1066 = shalt.err (!%p1063_p7)
}
  0x15   :  { %22 = dma.hbm_to_vmem [thread:$0]  %s1206_s0, 128, %s20_s15, [#allocation5]  }
  0x16   :  { %s1067_s29 = scalar_lea.hbm %s1207_s1, 8192 }
  0x17   :  { %p1068_p8 = scmp.ne.s32.totalorder %s1207_s1, %s1067_s29  ;;  %p1071_p9 = scmp.lt.u32.totalorder %s1067_s29, %s1207_s1 }
  0x19   :  { %p1073_p10 = pnand %p1071_p9, %p1068_p8 }
  0x1b   :  { %1076 = shalt.err (!%p1073_p10)
}
  0x1c   :  { %s1077_s7 = scalar_lea.vmem %s1147_s17, 8192  ;;  %p1082_p12 = scmp.lt.s32.totalorder %s1147_s17, %s1147_s17 }
  0x1d   :  { %p1078_p11 = scmp.ne.s32.totalorder %s1147_s17, %s1077_s7  ;;  %p1083_p13 = scmp.lt.s32.totalorder %s1077_s7, %s1077_s7 }
  0x1f   :  { %p1084_p0 = por %p1083_p13, %p1082_p12 }
  0x21   :  { %p1085_p1 = pnand %p1084_p0, %p1078_p11 }
  0x23   :  { %1088 = shalt.err (!%p1085_p1)
}
  0x24   :  { %s1119_s0 = smov 64   ;;  %s1120_s8 = smov 4  }
  0x25   :  { %34 = dma.hbm_to_vmem [thread:$0]  %s1207_s1, 8192, %s1147_s17, [#allocation8], %s1119_s0, %s1119_s0, %s1120_s8  }
  0x26   :  { %1111 = dma.done.wait [#allocation5], 128  }
  0x27   :  { %1112 = vsyncadd [#allocation5], 4294967168 }
  0x28   :  { %1113 = dma.done.wait [#allocation8], 8192  }
  0x29   :  { %1114 = vsyncadd [#allocation8], 4294959104  ;;  %v978_v1 = vld [vmem:[#allocation7 + $0x40] sm:$0xff]   ;;  %v982_v5 = vld [vmem:[#allocation7 + $0x48] sm:$0xff]   ;;  %v1121_v23 = vmov 1966171168   ;;  %v185_v25 = vlaneseq }
  0x2a   :  { %v979_v2 = vld [vmem:[#allocation7 + $0xc0] sm:$0xff]   ;;  %883 = vmatprep.subr.bf16.mxu0 %v978_v1  ;;  %v983_v6 = vld [vmem:[#allocation7 + $0xc8] sm:$0xff]   ;;  %v986_v9 = vld [vmem:[#allocation7 + $0x50] sm:$0xff]   ;;  %v183_v24 = vunpack.c.l.s4 %v1121_v23  ;;  %vm48_vm0 = vcmask 1024   ;;  %s1123_s1 = smov [#allocation9]  }
  0x2b   :  { %v980_v3 = vld [vmem:[#allocation7] sm:$0xff]   ;;  %905 = vmatprep.subr.bf16.mxu1 %v979_v2  ;;  %v984_v7 = vld [vmem:[#allocation7 + $0x8] sm:$0xff]   ;;  %v987_v10 = vld [vmem:[#allocation7 + $0xd0] sm:$0xff]   ;;  %v186_v31 = vshrl.u32 %v185_v25, 7  ;;  %s808_s11 = sshll.u32 %s1123_s1, 4  ;;  %s809_s11 = int_to_ptr.vmem [resolvable:$true] %s808_s11 }
  0x2c   :  { %v981_v4 = vld [vmem:[#allocation7 + $0x80] sm:$0xff]   ;;  %884 = vmatpush3.bf16.msra.mxu0 %v980_v3  ;;  %v985_v8 = vld [vmem:[#allocation7 + $0x88] sm:$0xff]   ;;  %v988_v11 = vld [vmem:[#allocation7 + $0x10] sm:$0xff]   ;;  %v184_v30 = vunpack.c.0.s8 %v183_v24  ;;  %s1089_s12 = scalar_lea.vmem %s809_s11, 32  ;;  %p1094_p3 = scmp.lt.s32.totalorder %s809_s11, %s809_s11 }
  0x2d   :  { %906 = vmatpush3.bf16.msra.mxu1 %v981_v4  ;;  %885 = vmatprep.subr.bf16.mxu0 %v982_v5  ;;  %v989_v12 = vld [vmem:[#allocation7 + $0x90] sm:$0xff]   ;;  %v990_v13 = vld [vmem:[#allocation7 + $0x58] sm:$0xff]   ;;  %v994_v17 = vld [vmem:[#allocation7 + $0x60] sm:$0xff]   ;;  %p1090_p2 = scmp.ne.s32.totalorder %s809_s11, %s1089_s12  ;;  %p1095_p4 = scmp.lt.s32.totalorder %s1089_s12, %s1089_s12 }
  0x2e   :  { %907 = vmatprep.subr.bf16.mxu1 %v983_v6  ;;  %v991_v14 = vld [vmem:[#allocation7 + $0xd8] sm:$0xff]   ;;  %v995_v18 = vld [vmem:[#allocation7 + $0xe0] sm:$0xff]   ;;  %v998_v21 = vld [vmem:[#allocation7 + $0x68] sm:$0xff]   ;;  %v1178_v36 = vsub.s32 %v184_v30, %v186_v31 }
  0x2f   :  { %v992_v15 = vld [vmem:[#allocation7 + $0x18] sm:$0xff]   ;;  %v996_v19 = vld [vmem:[#allocation7 + $0x20] sm:$0xff]   ;;  %v999_v22 = vld [vmem:[#allocation7 + $0xe8] sm:$0xff]   ;;  %p1096_p5 = por %p1095_p4, %p1094_p3 }
  0x30   :  { %886 = vmatpush3.bf16.msra.mxu0 %v984_v7  ;;  %v993_v16 = vld [vmem:[#allocation7 + $0x98] sm:$0xff]   ;;  %v997_v20 = vld [vmem:[#allocation7 + $0xa0] sm:$0xff]   ;;  %v1000_v26 = vld [vmem:[#allocation7 + $0x28] sm:$0xff]  }
  0x31   :  { %908 = vmatpush3.bf16.msra.mxu1 %v985_v8  ;;  %887 = vmatprep.subr.bf16.mxu0 %v986_v9  ;;  %v1001_v27 = vld [vmem:[#allocation7 + $0xa8] sm:$0xff]   ;;  %v1002_v28 = vld [vmem:[#allocation7 + $0x70] sm:$0xff]   ;;  %v1006_v34 = vld [vmem:[#allocation7 + $0x78] sm:$0xff]   ;;  %p1097_p6 = pnand %p1096_p5, %p1090_p2 }
  0x32   :  { %909 = vmatprep.subr.bf16.mxu1 %v987_v10  ;;  %v1003_v29 = vld [vmem:[#allocation7 + $0xf0] sm:$0xff]   ;;  %v1007_v35 = vld [vmem:[#allocation7 + $0xf8] sm:$0xff]   ;;  %v1011_v42 = vld [vmem:[#allocation7 + $0x140] sm:$0xff]  }
  0x33   :  { %v1004_v32 = vld [vmem:[#allocation7 + $0x30] sm:$0xff]   ;;  %v1008_v37 = vld [vmem:[#allocation7 + $0x38] sm:$0xff]   ;;  %v1012_v43 = vld [vmem:[#allocation7 + $0x1c0] sm:$0xff]  }
  0x34   :  { %888 = vmatpush3.bf16.msra.mxu0 %v988_v11  ;;  %v1005_v33 = vld [vmem:[#allocation7 + $0xb0] sm:$0xff]   ;;  %v1009_v38 = vld [vmem:[#allocation7 + $0xb8] sm:$0xff]   ;;  %v1013_v48 = vld [vmem:[#allocation7 + $0x100] sm:$0xff]  }
  0x35   :  { %910 = vmatpush3.bf16.msra.mxu1 %v989_v12  ;;  %889 = vmatprep.subr.bf16.mxu0 %v990_v13  ;;  %v51_v39 = vld [vmem:[#allocation4] sm:$0xff]  ;;  %v1015_v51 = vld [vmem:[#allocation7 + $0x148] sm:$0xff]   ;;  %v1014_v53 = vld [vmem:[#allocation7 + $0x180] sm:$0xff]  }
  0x36   :  { %911 = vmatprep.subr.bf16.mxu1 %v991_v14  ;;  %v181_v40 = vcombine.high %v51_v39, %v51_v39  ;;  %v188_v41 = vrot.slane %v51_v39, %v1178_v36  ;;  %v1016_v55 = vld [vmem:[#allocation7 + $0x1c8] sm:$0xff]   ;;  %v1019_v58 = vld [vmem:[#allocation7 + $0x150] sm:$0xff]   ;;  %v1023_v62 = vld [vmem:[#allocation7 + $0x158] sm:$0xff]  }
  0x37   :  { %v1017_v56 = vld [vmem:[#allocation7 + $0x108] sm:$0xff]   ;;  %v1020_v60 = vld [vmem:[#allocation7 + $0x1d0] sm:$0xff]   ;;  %v1024_v0 = vld [vmem:[#allocation7 + $0x1d8] sm:$0xff]  }
  0x38   :  { %890 = vmatpush3.bf16.msra.mxu0 %v992_v15  ;;  %v196_v44 = vcombine.high %v188_v41, %v188_v41  ;;  %v204_v45 = vrot.slane %v188_v41, %v1178_v36  ;;  %v1183_v46 = vrot.slane %v181_v40, %v1178_v36  ;;  %v1018_v59 = vld [vmem:[#allocation7 + $0x188] sm:$0xff]   ;;  %v1021_v61 = vld [vmem:[#allocation7 + $0x110] sm:$0xff]   ;;  %v1025_v1 = vld [vmem:[#allocation7 + $0x118] sm:$0xff]  }
  0x39   :  { %912 = vmatpush3.bf16.msra.mxu1 %v993_v16  ;;  %891 = vmatprep.subr.bf16.mxu0 %v994_v17  ;;  %v1022_v63 = vld [vmem:[#allocation7 + $0x190] sm:$0xff]   ;;  %v1027_v2 = vld [vmem:[#allocation7 + $0x160] sm:$0xff]   ;;  %v1026_v3 = vld [vmem:[#allocation7 + $0x198] sm:$0xff]  }
  0x3a   :  { %913 = vmatprep.subr.bf16.mxu1 %v995_v18  ;;  %v218_v47 = vrot.slane %v196_v44, %v1178_v36  ;;  %v197_v49 = vcombine.high %v1183_v46, %v1183_v46  ;;  %v226_v50 = vcombine.high %v204_v45, %v204_v45  ;;  %v1028_v4 = vld [vmem:[#allocation7 + $0x1e0] sm:$0xff]   ;;  %v1031_v6 = vld [vmem:[#allocation7 + $0x168] sm:$0xff]   ;;  %v1035_v10 = vld [vmem:[#allocation7 + $0x170] sm:$0xff]   ;;  %v211_v18 = vrot.slane %v1183_v46, %v1178_v36 }
  0x3b   :  { %v1029_v5 = vld [vmem:[#allocation7 + $0x120] sm:$0xff]   ;;  %v1032_v8 = vld [vmem:[#allocation7 + $0x1e8] sm:$0xff]   ;;  %v1036_v12 = vld [vmem:[#allocation7 + $0x1f0] sm:$0xff]  }
  0x3c   :  { %892 = vmatpush3.bf16.msra.mxu0 %v996_v19  ;;  %654 = vmatprep.mubr.bf16.mxu0 %v218_v47  ;;  %v228_v52 = vcombine.high %v218_v47, %v218_v47  ;;  %v225_v54 = vrot.slane %v197_v49, %v1178_v36  ;;  %v1030_v7 = vld [vmem:[#allocation7 + $0x1a0] sm:$0xff]   ;;  %v1033_v9 = vld [vmem:[#allocation7 + $0x128] sm:$0xff]   ;;  %v1037_v13 = vld [vmem:[#allocation7 + $0x130] sm:$0xff]  }
  0x3d   :  { %914 = vmatpush3.bf16.msra.mxu1 %v997_v20  ;;  %893 = vmatprep.subr.bf16.mxu0 %v998_v21  ;;  %v1034_v11 = vld [vmem:[#allocation7 + $0x1a8] sm:$0xff]   ;;  %v1039_v14 = vld [vmem:[#allocation7 + $0x178] sm:$0xff]   ;;  %v1038_v15 = vld [vmem:[#allocation7 + $0x1b0] sm:$0xff]   ;;  %v227_v20 = vcombine.high %v211_v18, %v211_v18  ;;  %v1122_v21 = vmov 0.0  }
  0x3e   :  { %915 = vmatprep.subr.bf16.mxu1 %v999_v22  ;;  %694 = vmatprep.mubr.bf16.mxu1 %v228_v52  ;;  %v229_v57 = vcombine.high %v225_v54, %v225_v54  ;;  %v1040_v16 = vld [vmem:[#allocation7 + $0x1f8] sm:$0xff]   ;;  %49 = vst.msk [vmem:[#allocation2] sm:$0x3] %vm48_vm0, %v1122_v21  ;;  %v882_v47 = vld [vmem:[#allocation3] ss:$0 sm:$0xff] }
  0x3f   :  { %v1041_v17 = vld [vmem:[#allocation7 + $0x138] sm:$0xff]  }
  0x40   :  { %894 = vmatpush3.bf16.msra.mxu0 %v1000_v26  ;;  %v1042_v19 = vld [vmem:[#allocation7 + $0x1b8] sm:$0xff]  }
  0x41   :  { %916 = vmatpush3.bf16.msra.mxu1 %v1001_v27  ;;  %895 = vmatprep.subr.bf16.mxu0 %v1002_v28 }
  0x42   :  { %917 = vmatprep.subr.bf16.mxu1 %v1003_v29 }
  0x44   :  { %896 = vmatpush3.bf16.msra.mxu0 %v1004_v32 }
  0x45   :  { %918 = vmatpush3.bf16.msra.mxu1 %v1005_v33  ;;  %897 = vmatprep.subr.bf16.mxu0 %v1006_v34  ;;  %v50_v44 = vld [vmem:[#allocation2] sm:$0x3] }
  0x46   :  { %919 = vmatprep.subr.bf16.mxu1 %v1007_v35 }
  0x48   :  { %898 = vmatpush3.bf16.msra.mxu0 %v1008_v37 }
  0x49   :  { %920 = vmatpush3.bf16.msra.mxu1 %v1009_v38  ;;  %927 = vmatprep.subr.bf16.mxu0 %v1011_v42 }
  0x4a   :  { %949 = vmatprep.subr.bf16.mxu1 %v1012_v43 }
  0x4b   :  { %655 = vmatmul.mubr.bf16.vlgmr.msra.gmra.mrb[0].mxu0 %v204_v45 }
  0x4c   :  { %928 = vmatpush3.bf16.msra.mxu0 %v1013_v48  ;;  %695 = vmatmul.mubr.bf16.vlgmr.msra.gmra.mrb[0].mxu1 %v226_v50 }
  0x4d   :  { %929 = vmatprep.subr.bf16.mxu0 %v1015_v51  ;;  %950 = vmatpush3.bf16.msra.mxu1 %v1014_v53 }
  0x4e   :  { %734 = vmatprep.mubr.bf16.mxu0 %v225_v54  ;;  %951 = vmatprep.subr.bf16.mxu1 %v1016_v55 }
  0x4f   :  { %774 = vmatprep.mubr.bf16.mxu1 %v229_v57 }
  0x50   :  { %930 = vmatpush3.bf16.msra.mxu0 %v1017_v56 }
  0x51   :  { %931 = vmatprep.subr.bf16.mxu0 %v1019_v58  ;;  %952 = vmatpush3.bf16.msra.mxu1 %v1018_v59 }
  0x52   :  { %953 = vmatprep.subr.bf16.mxu1 %v1020_v60 }
  0x54   :  { %932 = vmatpush3.bf16.msra.mxu0 %v1021_v61 }
  0x55   :  { %933 = vmatprep.subr.bf16.mxu0 %v1023_v62  ;;  %954 = vmatpush3.bf16.msra.mxu1 %v1022_v63 }
  0x56   :  { %955 = vmatprep.subr.bf16.mxu1 %v1024_v0 }
  0x58   :  { %934 = vmatpush3.bf16.msra.mxu0 %v1025_v1 }
  0x59   :  { %935 = vmatprep.subr.bf16.mxu0 %v1027_v2  ;;  %956 = vmatpush3.bf16.msra.mxu1 %v1026_v3 }
  0x5a   :  { %957 = vmatprep.subr.bf16.mxu1 %v1028_v4 }
  0x5c   :  { %936 = vmatpush3.bf16.msra.mxu0 %v1029_v5 }
  0x5d   :  { %937 = vmatprep.subr.bf16.mxu0 %v1031_v6  ;;  %958 = vmatpush3.bf16.msra.mxu1 %v1030_v7 }
  0x5e   :  { %959 = vmatprep.subr.bf16.mxu1 %v1032_v8 }
  0x60   :  { %938 = vmatpush3.bf16.msra.mxu0 %v1033_v9 }
  0x61   :  { %939 = vmatprep.subr.bf16.mxu0 %v1035_v10  ;;  %960 = vmatpush3.bf16.msra.mxu1 %v1034_v11 }
  0x62   :  { %961 = vmatprep.subr.bf16.mxu1 %v1036_v12 }
  0x64   :  { %940 = vmatpush3.bf16.msra.mxu0 %v1037_v13 }
  0x65   :  { %941 = vmatprep.subr.bf16.mxu0 %v1039_v14  ;;  %962 = vmatpush3.bf16.msra.mxu1 %v1038_v15 }
  0x66   :  { %963 = vmatprep.subr.bf16.mxu1 %v1040_v16 }
  0x68   :  { %942 = vmatpush3.bf16.msra.mxu0 %v1041_v17 }
  0x69   :  { %964 = vmatpush3.bf16.msra.mxu1 %v1042_v19 }
  0x6b   :  { %735 = vmatmul.mubr.bf16.vlgmr.msra.gmra.mrb[4].mxu0 %v211_v18 }
  0x6c   :  { %775 = vmatmul.mubr.bf16.vlgmr.msra.gmra.mrb[4].mxu1 %v227_v20 }
 0x11e   :  { %v899_v22 = vpop.f32.mrb[0].mxu0 }
 0x11f   :  { %v900_v23 = vpop.f32.mrb[1].mxu0  ;;  %v921_v24 = vpop.f32.mrb[0].mxu1 }
 0x120   :  { %v901_v25 = vadd.f32 %v900_v23, %v899_v22  ;;  %v902_v26 = vpop.f32.mrb[2].mxu0  ;;  %v922_v27 = vpop.f32.mrb[1].mxu1 }
 0x121   :  { %v903_v28 = vpop.f32.mrb[3].mxu0  ;;  %v923_v29 = vadd.f32 %v922_v27, %v921_v24  ;;  %v924_v30 = vpop.f32.mrb[2].mxu1 }
 0x122   :  { %v925_v31 = vpop.f32.mrb[3].mxu1 }
 0x123   :  { %v697_v32 = vadd.f32 %v923_v29, %v901_v25 }
 0x13e   :  { %v943_v33 = vpop.f32.mrb[4].mxu0 }
 0x13f   :  { %v944_v34 = vpop.f32.mrb[5].mxu0  ;;  %v965_v35 = vpop.f32.mrb[4].mxu1 }
 0x140   :  { %v945_v36 = vadd.f32 %v944_v34, %v943_v33  ;;  %v946_v37 = vpop.f32.mrb[6].mxu0  ;;  %v966_v38 = vpop.f32.mrb[5].mxu1 }
 0x141   :  { %v947_v39 = vpop.f32.mrb[7].mxu0  ;;  %v967_v41 = vadd.f32 %v966_v38, %v965_v35  ;;  %v968_v42 = vpop.f32.mrb[6].mxu1 }
 0x142   :  { %v737_v40 = vadd.f32 %v945_v36, %v697_v32  ;;  %v969_v43 = vpop.f32.mrb[7].mxu1 }
 0x144   :  { %v777_v45 = vadd.f32 %v967_v41, %v737_v40 }
 0x146   :  { %v782_v46 = vadd.f32 %v777_v45, %v50_v44 }
 0x148   :  { %784 = vst.msk [vmem:[#allocation2] sm:$0x3] %vm48_vm0, %v782_v46 }
 0x14f   :  { %v788_v48 = vld [vmem:[#allocation2] sm:$0x3] }
 0x150   :  { %v796_v49 = vadd.f32 %v882_v47, %v788_v48 }
 0x152   :  { %v797_v50 = vmul.f32 0.5, %v796_v49 }
 0x154   :  { %1043 = vtanh.f32 %v797_v50 }
 0x15e   :  { %v1044_v51 = vpop.eup %1043 }
 0x15f   :  { %v799_v52 = vadd.f32 1.0, %v1044_v51 }
 0x161   :  { %v800_v53 = vmul.f32 0.5, %v799_v52 }
 0x163   :  { %801 = vst.msk [vmem:[#allocation9] sm:$0x3] %vm48_vm0, %v800_v53 }
 0x164   :  { %1100 = shalt.err (!%p1097_p6)
}
 0x165   :  { %s1101_s15 = scalar_lea.hbm %s1209_s3, 32 }
 0x166   :  { %p1102_p7 = scmp.ne.s32.totalorder %s1209_s3, %s1101_s15  ;;  %p1105_p8 = scmp.lt.u32.totalorder %s1101_s15, %s1209_s3 }
 0x168   :  { %p1107_p9 = pnand %p1105_p8, %p1102_p7 }
 0x16a   :  { %1110 = shalt.err (!%p1107_p9)
}
 0x16b   :  { %811 = dma.vmem_to_hbm [thread:$0]  %s809_s11, 32, %s1209_s3, [#allocation6]  }
 0x16c   :  { %1115 = dma.done.wait [#allocation6], 32  }
 0x16d   :  { %1116 = vsyncadd [#allocation6], 4294967264 }
 0x16e   :  { %815 = vsyncpa [#allocation5], 1 }
 0x16f   :  { %816 = vsyncpa [#allocation8], 1 }
 0x170   :  { %817 = vsyncpa [#allocation6], 1 }

</bundles_post_ra>
